<compile_context>
chip_gen: v6e
topology: v6e:2x2x1
jax: 0.10.0
libtpu: 0.0.40
codegen_flags: <defaults>
</compile_context>

<pallas_src>
import functools

import numpy as np
import jax
import jax.numpy as jnp
from jax.experimental import pallas as pl
from jax.experimental.pallas import tpu as pltpu


KH = KW = 3      # both convs are 3x3
C_RGBW = 4       # shutter output channels (R, G, B, W)


# ---------------------------------------------------------------------------
# Fused Pallas kernel: one grid step = `nb` images packed along the lane axis.
# ---------------------------------------------------------------------------
def _fused_pconv_model_kernel(img_ref, coef_ref, weff_ref, wd_ref, out_ref):
    """shutter + PartialConv2d(4->4) + decoder conv for one width-packed block.

    img_ref  : (1, 3, Hp, Wt)    nb RGB images packed along width, each with
                                 its own 2-px zero halo (VMEM)
    coef_ref : (3, Hp, Wt)       mosaic shutter coefficients (resident VMEM)
    weff_ref : (9*4, He, Wc)     per-tap / per-out-channel effective pconv
                                 weights; mask_ratio and the decoder zero-pad
                                 ring are folded in (resident VMEM)
    wd_ref   : (9*4*cout,)       decoder weights, (ky,kx,ci,co) order (SMEM)
    out_ref  : (1, cout, H, Wo)  decoder output, still width-packed
    """
    f32 = jnp.float32
    c_out = out_ref.shape[1]
    H, Wo = out_ref.shape[2], out_ref.shape[3]
    He, Wc = weff_ref.shape[1], weff_ref.shape[2]

    # ---- hoist every SMEM decoder-weight scalar out of the mul-add chains ---
    wd = [wd_ref[i] for i in range(KH * KW * C_RGBW * c_out)]

    # ---- shutter: RGB -> single combined mosaic channel ---------------------
    # coef encodes the 2x2 RGBW mosaic (W pixels get 1/3,1/3,1/3) and zeros in
    # the halo, so x_comb holds exactly one (masked) RGBW sample per pixel.
    x_comb = (img_ref[0, 0].astype(f32) * coef_ref[0]
              + img_ref[0, 1].astype(f32) * coef_ref[1]
              + img_ref[0, 2].astype(f32) * coef_ref[2])

    # ---- polyphase PartialConv2d(4->4, 3x3, bias=False) + mask_ratio --------
    #   rgbw[co] = sum_{ky,kx} x_comb[ky:, kx:] * weff[(ky,kx), co]
    # where weff = phase-selected pconv weight * mask_ratio * zero-pad ring.
    # 36 slab madds instead of the naive 144.
    acc = [None] * C_RGBW
    for kx in range(KW):
        x_col = x_comb[:, kx:kx + Wc]                  # lane shift: once per kx
        for ky in range(KH):
            sl = x_col[ky:ky + He, :]                  # sublane slice only
            t = (ky * KW + kx) * C_RGBW
            for co in range(C_RGBW):
                term = sl * weff_ref[t + co]
                acc[co] = term if acc[co] is None else acc[co] + term
    rgbw = acc                                         # 4 slabs of (He, Wc)

    # ---- decoder: plain 3x3 conv (4 -> c_out, bias=False) -------------------
    # The 1-px ring of each image's extended domain was zeroed via weff, so
    # computing on the extended domain realizes the decoder's zero padding.
    out_acc = [None] * c_out
    for ci in range(C_RGBW):
        y_ci = rgbw[ci]
        for kx in range(KW):
            y_col = y_ci[:, kx:kx + Wo]                # lane shift: once per (ci,kx)
            for ky in range(KH):
                sl = y_col[ky:ky + H, :]               # sublane slice only
                base = ((ky * KW + kx) * C_RGBW + ci) * c_out
                for co in range(c_out):
                    term = sl * wd[base + co]
                    out_acc[co] = term if out_acc[co] is None else out_acc[co] + term
    for co in range(c_out):
        out_ref[0, co] = out_acc[co].astype(out_ref.dtype)


# ---------------------------------------------------------------------------
# Batch-invariant mosaic data (numpy, computed once per (H, W, nb))
# ---------------------------------------------------------------------------
def _mosaic_constants(H, W, nb):
    Hp, Wp = H + 4, W + 4
    Wt = nb * Wp
    He, Wc = H + 2, Wt - 2

    yy = np.arange(Hp)[:, None]
    xx = np.arange(Wt)[None, :]
    xl = xx % Wp                                     # within-image padded column
    valid = (yy >= 2) & (yy < 2 + H) & (xl >= 2) & (xl < 2 + W)
    ye, xe = (yy % 2 == 0), (xl % 2 == 0)
    masks = np.stack([valid & ye & xe,               # R
                      valid & ye & ~xe,              # G
                      valid & ~ye & xe,              # B
                      valid & ~ye & ~xe],            # W
                     ).astype(np.float32)            # (4, Hp, Wt)

    # shutter coefficients: x_comb = r*c0 + g*c1 + b*c2  (W channel = mean RGB)
    coef = np.stack([masks[0] + masks[3] / 3.0,
                     masks[1] + masks[3] / 3.0,
                     masks[2] + masks[3] / 3.0]).astype(np.float32)

    # PartialConv2d mask algebra on the extended (He, Wc) output domain
    m_all = masks.sum(0)                             # == valid (phases partition)
    msum = np.zeros((He, Wc), np.float32)
    for ky in range(KH):
        for kx in range(KW):
            msum += m_all[ky:ky + He, kx:kx + Wc]
    update_mask = np.clip(msum, 0.0, 1.0)
    slide_winsize = float(C_RGBW * KH * KW)
    mask_ratio = slide_winsize / (msum + 1e-8) * update_mask
    # zero the 1-px ring of each image's extended domain -> decoder zero padding
    mask_ratio = (mask_ratio * m_all[1:1 + He, 1:1 + Wc]).astype(np.float32)

    # per-tap phase masks shifted onto the extended domain (for effective weights)
    m_shift = np.stack([masks[:, ky:ky + He, kx:kx + Wc]
                        for ky in range(KH) for kx in range(KW)]).astype(np.float32)
    return coef, mask_ratio, m_shift                  # (3,Hp,Wt) (He,Wc) (9,4,He,Wc)


def _effective_pconv_weights(pconv_w, mask_ratio, m_shift):
    """(9*4, He, Wc): phase-selected pconv weight * mask_ratio per tap/out-chan."""
    # pconv_w (co, ci, ky, kx) OIHW -> w_taps[t, ci, co],  t = ky*3 + kx
    w_taps = jnp.reshape(jnp.transpose(pconv_w, (2, 3, 1, 0)),
                         (KH * KW, C_RGBW, C_RGBW))
    weff = jnp.einsum('tihw,tio->tohw', jnp.asarray(m_shift), w_taps,
                      precision=jax.lax.Precision.HIGHEST)
    weff = weff * jnp.asarray(mask_ratio)[None, None]
    return weff.reshape(KH * KW * C_RGBW, *mask_ratio.shape)


# ---------------------------------------------------------------------------
# Wrapper
# ---------------------------------------------------------------------------
def _auto_images_per_block(N, Wp):
    """Largest divisor of N whose packed width <= 512 lanes, keeping >= 2 grid
    steps (so both v7x TensorCores get work)."""
    best = 1
    for nb in range(1, N + 1):
        if N % nb != 0:
            continue
        if N >= 2 and N // nb < 2:
            continue
        if nb * Wp <= 512:
            best = nb
    return best


def pconv_model_forward(image, pconv_w, dec_w, *, images_per_block=None):
    N, C, H, W = image.shape
    assert C == 3
    c_out, c_mid, kh, kw = dec_w.shape
    assert (kh, kw) == (KH, KW) and c_mid == C_RGBW
    assert pconv_w.shape == (C_RGBW, C_RGBW, KH, KW)

    Hp, Wp = H + 4, W + 4
    nb = (images_per_block if images_per_block is not None
          else _auto_images_per_block(N, Wp))
    assert N % nb == 0
    G = N // nb
    Wt = nb * Wp
    He, Wc = H + 2, Wt - 2
    Wo = Wt - 4

    # --- width-pack the batch (lane-dense layout); each image keeps a 2-px halo
    xp = jnp.pad(image, ((0, 0), (0, 0), (2, 2), (2, 2)))           # (N,3,Hp,Wp)
    xp = xp.reshape(G, nb, 3, Hp, Wp).transpose(0, 2, 3, 1, 4).reshape(G, 3, Hp, Wt)

    # --- batch-invariant mosaic data + effective pconv weights (computed once
    #     per call; resident in VMEM across all grid steps via constant index maps)
    coef_np, mask_ratio_np, m_shift_np = _mosaic_constants(H, W, nb)
    coef = jnp.asarray(coef_np)
    weff = _effective_pconv_weights(pconv_w, mask_ratio_np, m_shift_np)
    wd_flat = jnp.transpose(dec_w, (2, 3, 1, 0)).reshape(-1)        # (ky,kx,ci,co)

    # TODO(synk): for production-size images (large H*W) add an H-tiling grid
    # axis with a 2-row halo so the resident weff slabs and per-step blocks fit
    # v7x's 64 MiB VMEM; at these sizes everything is well under 1 MiB.
    out_wide = pl.pallas_call(
        _fused_pconv_model_kernel,
        out_shape=jax.ShapeDtypeStruct((G, c_out, H, Wo), image.dtype),
        grid=(G,),
        in_specs=[
            pl.BlockSpec((1, 3, Hp, Wt), lambda n: (n, 0, 0, 0)),
            pl.BlockSpec((3, Hp, Wt), lambda n: (0, 0, 0)),                    # resident
            pl.BlockSpec((KH * KW * C_RGBW, He, Wc), lambda n: (0, 0, 0)),     # resident
            pl.BlockSpec(memory_space=pltpu.MemorySpace.SMEM),
        ],
        out_specs=pl.BlockSpec((1, c_out, H, Wo), lambda n: (n, 0, 0, 0)),
        compiler_params=pltpu.CompilerParams(
            dimension_semantics=("parallel",),
            vmem_limit_bytes=32 * 1024 * 1024,   # v5e scoped default is only 16 MiB
        ),
    )(xp, coef, weff, wd_flat)

    # --- un-pack the width-packed output back to (N, c_out, H, W)
    out_wide = jnp.pad(out_wide, ((0, 0), (0, 0), (0, 0), (0, Wt - Wo)))
    out = out_wide.reshape(G, c_out, H, nb, Wp)[..., :W]
    return out.transpose(0, 3, 1, 2, 4).reshape(N, c_out, H, W)


# ---------------------------------------------------------------------------
# Shutter (pure-JAX reference of the in-kernel mosaic) + model
# ---------------------------------------------------------------------------
def rgbw_shutter(image):
    """'rgbw' shutter: RGB image -> sparsely-sampled 4-channel RGBW raw + mask."""
    N, _, H, Wd = image.shape
    w_chan = jnp.mean(image, axis=1, keepdims=True)
    rgbw = jnp.concatenate([image, w_chan], axis=1)             # (N, 4, H, W)
    yy = jnp.arange(H)[:, None]
    xx = jnp.arange(Wd)[None, :]
    patterns = [
        (yy % 2 == 0) & (xx % 2 == 0),   # R
        (yy % 2 == 0) & (xx % 2 == 1),   # G
        (yy % 2 == 1) & (xx % 2 == 0),   # B
        (yy % 2 == 1) & (xx % 2 == 1),   # W
    ]
    mask = jnp.stack(patterns, axis=0).astype(image.dtype)      # (4, H, W)
    mask = jnp.broadcast_to(mask[None], (N, 4, H, Wd))
    return rgbw * mask, mask


class PConvModelPallas:
    """Pallas equivalent of PConvModel.forward (fully fused)."""

    def __init__(self, key, images_per_block=None):
        k1, k2 = jax.random.split(key)
        # PartialConv2d(in=4, out=4, k=3, pad=1, bias=False) -- OIHW like torch
        self.pconv_weight = 0.1 * jax.random.normal(k1, (4, 4, 3, 3), jnp.float32)
        # TODO(synk): `decoder` is an injected module in the original code; a
        # deterministic 3x3 conv (4 -> 3, bias=False) is used as a stand-in.
        self.dec_weight = 0.1 * jax.random.normal(k2, (3, 4, 3, 3), jnp.float32)
        self._fwd = jax.jit(functools.partial(pconv_model_forward,
                                              images_per_block=images_per_block))

    def __call__(self, image):
        return self._fwd(image, self.pconv_weight, self.dec_weight)


# ---------------------------------------------------------------------------
# Pure-JAX reference (for correctness check)
# ---------------------------------------------------------------------------
def _ref_forward(image, pconv_w, dec_w):
    rgbw_raw, mask = rgbw_shutter(image)
    dn = ("NCHW", "OIHW", "NCHW")

    def conv(x, w):
        return jax.lax.conv_general_dilated(
            x, w, (1, 1), ((1, 1), (1, 1)), dimension_numbers=dn,
            precision=jax.lax.Precision.HIGHEST)

    raw_out = conv(rgbw_raw * mask, pconv_w)
    upd = conv(mask, jnp.ones_like(pconv_w))
    ratio = float(pconv_w.shape[1] * pconv_w.shape[2] * pconv_w.shape[3]) / (upd + 1e-8)
    upd_c = jnp.clip(upd, 0.0, 1.0)
    rgbw = raw_out * ratio * upd_c
    return conv(rgbw, dec_w)


if __name__ == "__main__":
    key = jax.random.PRNGKey(0)
    k_param, k_img = jax.random.split(key)

    model = PConvModelPallas(k_param)

    # batch=2 (nb=1, grid=2): matches the module's expected small input
    image = jax.random.normal(k_img, (2, 3, 16, 16), jnp.float32)
    out = jax.block_until_ready(model(image))
    ref = _ref_forward(image, model.pconv_weight, model.dec_weight)
    np.testing.assert_allclose(np.asarray(out), np.asarray(ref),
                               rtol=1e-4, atol=1e-4)

    # batch=4 (auto nb=2, grid=2): exercises the width-packed lane-dense path
    image4 = jax.random.normal(jax.random.PRNGKey(1), (4, 3, 16, 16), jnp.float32)
    out4 = jax.block_until_ready(model(image4))
    ref4 = _ref_forward(image4, model.pconv_weight, model.dec_weight)
    np.testing.assert_allclose(np.asarray(out4), np.asarray(ref4),
                               rtol=1e-4, atol=1e-4)

    print("KERNEL_OK")
</pallas_src>

<mosaic_0001>
module attributes {stable_mosaic.version = 11 : i64} {
  func.func @_fused_pconv_model_kernel(%arg0: i32, %arg1: memref<1x3x20x20xf32, #tpu.memory_space<vmem>>, %arg2: memref<3x20x20xf32, #tpu.memory_space<vmem>>, %arg3: memref<36x18x18xf32, #tpu.memory_space<vmem>>, %arg4: memref<108xf32, #tpu.memory_space<smem>>, %arg5: memref<1x3x16x16xf32, #tpu.memory_space<vmem>>) attributes {dimension_semantics = [#tpu.dimension_semantics<parallel>], iteration_bounds = array<i64: 2>, scalar_prefetch = 0 : i64, scratch_operands = 0 : i64, tpu.core_type = #tpu.core_type<tc>, window_params = [{transform_indices = @transform_0, window_bounds = array<i64: 1, 3, 20, 20>}, {pipeline_mode = #tpu.pipeline_mode<synchronous>, transform_indices = @transform_1, window_bounds = array<i64: 3, 20, 20>}, {pipeline_mode = #tpu.pipeline_mode<synchronous>, transform_indices = @transform_2, window_bounds = array<i64: 36, 18, 18>}, {transform_indices = @transform_3, window_bounds = array<i64: 108>}, {transform_indices = @transform_4, window_bounds = array<i64: 1, 3, 16, 16>}]} {
    %c0 = arith.constant 0 : index
    %0 = memref.load %arg4[%c0] : memref<108xf32, #tpu.memory_space<smem>>
    %c1 = arith.constant 1 : index
    %1 = memref.load %arg4[%c1] : memref<108xf32, #tpu.memory_space<smem>>
    %c2 = arith.constant 2 : index
    %2 = memref.load %arg4[%c2] : memref<108xf32, #tpu.memory_space<smem>>
    %c3 = arith.constant 3 : index
    %3 = memref.load %arg4[%c3] : memref<108xf32, #tpu.memory_space<smem>>
    %c4 = arith.constant 4 : index
    %4 = memref.load %arg4[%c4] : memref<108xf32, #tpu.memory_space<smem>>
    %c5 = arith.constant 5 : index
    %5 = memref.load %arg4[%c5] : memref<108xf32, #tpu.memory_space<smem>>
    %c6 = arith.constant 6 : index
    %6 = memref.load %arg4[%c6] : memref<108xf32, #tpu.memory_space<smem>>
    %c7 = arith.constant 7 : index
    %7 = memref.load %arg4[%c7] : memref<108xf32, #tpu.memory_space<smem>>
    %c8 = arith.constant 8 : index
    %8 = memref.load %arg4[%c8] : memref<108xf32, #tpu.memory_space<smem>>
    %c9 = arith.constant 9 : index
    %9 = memref.load %arg4[%c9] : memref<108xf32, #tpu.memory_space<smem>>
    %c10 = arith.constant 10 : index
    %10 = memref.load %arg4[%c10] : memref<108xf32, #tpu.memory_space<smem>>
    %c11 = arith.constant 11 : index
    %11 = memref.load %arg4[%c11] : memref<108xf32, #tpu.memory_space<smem>>
    %c12 = arith.constant 12 : index
    %12 = memref.load %arg4[%c12] : memref<108xf32, #tpu.memory_space<smem>>
    %c13 = arith.constant 13 : index
    %13 = memref.load %arg4[%c13] : memref<108xf32, #tpu.memory_space<smem>>
    %c14 = arith.constant 14 : index
    %14 = memref.load %arg4[%c14] : memref<108xf32, #tpu.memory_space<smem>>
    %c15 = arith.constant 15 : index
    %15 = memref.load %arg4[%c15] : memref<108xf32, #tpu.memory_space<smem>>
    %c16 = arith.constant 16 : index
    %16 = memref.load %arg4[%c16] : memref<108xf32, #tpu.memory_space<smem>>
    %c17 = arith.constant 17 : index
    %17 = memref.load %arg4[%c17] : memref<108xf32, #tpu.memory_space<smem>>
    %c18 = arith.constant 18 : index
    %18 = memref.load %arg4[%c18] : memref<108xf32, #tpu.memory_space<smem>>
    %c19 = arith.constant 19 : index
    %19 = memref.load %arg4[%c19] : memref<108xf32, #tpu.memory_space<smem>>
    %c20 = arith.constant 20 : index
    %20 = memref.load %arg4[%c20] : memref<108xf32, #tpu.memory_space<smem>>
    %c21 = arith.constant 21 : index
    %21 = memref.load %arg4[%c21] : memref<108xf32, #tpu.memory_space<smem>>
    %c22 = arith.constant 22 : index
    %22 = memref.load %arg4[%c22] : memref<108xf32, #tpu.memory_space<smem>>
    %c23 = arith.constant 23 : index
    %23 = memref.load %arg4[%c23] : memref<108xf32, #tpu.memory_space<smem>>
    %c24 = arith.constant 24 : index
    %24 = memref.load %arg4[%c24] : memref<108xf32, #tpu.memory_space<smem>>
    %c25 = arith.constant 25 : index
    %25 = memref.load %arg4[%c25] : memref<108xf32, #tpu.memory_space<smem>>
    %c26 = arith.constant 26 : index
    %26 = memref.load %arg4[%c26] : memref<108xf32, #tpu.memory_space<smem>>
    %c27 = arith.constant 27 : index
    %27 = memref.load %arg4[%c27] : memref<108xf32, #tpu.memory_space<smem>>
    %c28 = arith.constant 28 : index
    %28 = memref.load %arg4[%c28] : memref<108xf32, #tpu.memory_space<smem>>
    %c29 = arith.constant 29 : index
    %29 = memref.load %arg4[%c29] : memref<108xf32, #tpu.memory_space<smem>>
    %c30 = arith.constant 30 : index
    %30 = memref.load %arg4[%c30] : memref<108xf32, #tpu.memory_space<smem>>
    %c31 = arith.constant 31 : index
    %31 = memref.load %arg4[%c31] : memref<108xf32, #tpu.memory_space<smem>>
    %c32 = arith.constant 32 : index
    %32 = memref.load %arg4[%c32] : memref<108xf32, #tpu.memory_space<smem>>
    %c33 = arith.constant 33 : index
    %33 = memref.load %arg4[%c33] : memref<108xf32, #tpu.memory_space<smem>>
    %c34 = arith.constant 34 : index
    %34 = memref.load %arg4[%c34] : memref<108xf32, #tpu.memory_space<smem>>
    %c35 = arith.constant 35 : index
    %35 = memref.load %arg4[%c35] : memref<108xf32, #tpu.memory_space<smem>>
    %c36 = arith.constant 36 : index
    %36 = memref.load %arg4[%c36] : memref<108xf32, #tpu.memory_space<smem>>
    %c37 = arith.constant 37 : index
    %37 = memref.load %arg4[%c37] : memref<108xf32, #tpu.memory_space<smem>>
    %c38 = arith.constant 38 : index
    %38 = memref.load %arg4[%c38] : memref<108xf32, #tpu.memory_space<smem>>
    %c39 = arith.constant 39 : index
    %39 = memref.load %arg4[%c39] : memref<108xf32, #tpu.memory_space<smem>>
    %c40 = arith.constant 40 : index
    %40 = memref.load %arg4[%c40] : memref<108xf32, #tpu.memory_space<smem>>
    %c41 = arith.constant 41 : index
    %41 = memref.load %arg4[%c41] : memref<108xf32, #tpu.memory_space<smem>>
    %c42 = arith.constant 42 : index
    %42 = memref.load %arg4[%c42] : memref<108xf32, #tpu.memory_space<smem>>
    %c43 = arith.constant 43 : index
    %43 = memref.load %arg4[%c43] : memref<108xf32, #tpu.memory_space<smem>>
    %c44 = arith.constant 44 : index
    %44 = memref.load %arg4[%c44] : memref<108xf32, #tpu.memory_space<smem>>
    %c45 = arith.constant 45 : index
    %45 = memref.load %arg4[%c45] : memref<108xf32, #tpu.memory_space<smem>>
    %c46 = arith.constant 46 : index
    %46 = memref.load %arg4[%c46] : memref<108xf32, #tpu.memory_space<smem>>
    %c47 = arith.constant 47 : index
    %47 = memref.load %arg4[%c47] : memref<108xf32, #tpu.memory_space<smem>>
    %c48 = arith.constant 48 : index
    %48 = memref.load %arg4[%c48] : memref<108xf32, #tpu.memory_space<smem>>
    %c49 = arith.constant 49 : index
    %49 = memref.load %arg4[%c49] : memref<108xf32, #tpu.memory_space<smem>>
    %c50 = arith.constant 50 : index
    %50 = memref.load %arg4[%c50] : memref<108xf32, #tpu.memory_space<smem>>
    %c51 = arith.constant 51 : index
    %51 = memref.load %arg4[%c51] : memref<108xf32, #tpu.memory_space<smem>>
    %c52 = arith.constant 52 : index
    %52 = memref.load %arg4[%c52] : memref<108xf32, #tpu.memory_space<smem>>
    %c53 = arith.constant 53 : index
    %53 = memref.load %arg4[%c53] : memref<108xf32, #tpu.memory_space<smem>>
    %c54 = arith.constant 54 : index
    %54 = memref.load %arg4[%c54] : memref<108xf32, #tpu.memory_space<smem>>
    %c55 = arith.constant 55 : index
    %55 = memref.load %arg4[%c55] : memref<108xf32, #tpu.memory_space<smem>>
    %c56 = arith.constant 56 : index
    %56 = memref.load %arg4[%c56] : memref<108xf32, #tpu.memory_space<smem>>
    %c57 = arith.constant 57 : index
    %57 = memref.load %arg4[%c57] : memref<108xf32, #tpu.memory_space<smem>>
    %c58 = arith.constant 58 : index
    %58 = memref.load %arg4[%c58] : memref<108xf32, #tpu.memory_space<smem>>
    %c59 = arith.constant 59 : index
    %59 = memref.load %arg4[%c59] : memref<108xf32, #tpu.memory_space<smem>>
    %c60 = arith.constant 60 : index
    %60 = memref.load %arg4[%c60] : memref<108xf32, #tpu.memory_space<smem>>
    %c61 = arith.constant 61 : index
    %61 = memref.load %arg4[%c61] : memref<108xf32, #tpu.memory_space<smem>>
    %c62 = arith.constant 62 : index
    %62 = memref.load %arg4[%c62] : memref<108xf32, #tpu.memory_space<smem>>
    %c63 = arith.constant 63 : index
    %63 = memref.load %arg4[%c63] : memref<108xf32, #tpu.memory_space<smem>>
    %c64 = arith.constant 64 : index
    %64 = memref.load %arg4[%c64] : memref<108xf32, #tpu.memory_space<smem>>
    %c65 = arith.constant 65 : index
    %65 = memref.load %arg4[%c65] : memref<108xf32, #tpu.memory_space<smem>>
    %c66 = arith.constant 66 : index
    %66 = memref.load %arg4[%c66] : memref<108xf32, #tpu.memory_space<smem>>
    %c67 = arith.constant 67 : index
    %67 = memref.load %arg4[%c67] : memref<108xf32, #tpu.memory_space<smem>>
    %c68 = arith.constant 68 : index
    %68 = memref.load %arg4[%c68] : memref<108xf32, #tpu.memory_space<smem>>
    %c69 = arith.constant 69 : index
    %69 = memref.load %arg4[%c69] : memref<108xf32, #tpu.memory_space<smem>>
    %c70 = arith.constant 70 : index
    %70 = memref.load %arg4[%c70] : memref<108xf32, #tpu.memory_space<smem>>
    %c71 = arith.constant 71 : index
    %71 = memref.load %arg4[%c71] : memref<108xf32, #tpu.memory_space<smem>>
    %c72 = arith.constant 72 : index
    %72 = memref.load %arg4[%c72] : memref<108xf32, #tpu.memory_space<smem>>
    %c73 = arith.constant 73 : index
    %73 = memref.load %arg4[%c73] : memref<108xf32, #tpu.memory_space<smem>>
    %c74 = arith.constant 74 : index
    %74 = memref.load %arg4[%c74] : memref<108xf32, #tpu.memory_space<smem>>
    %c75 = arith.constant 75 : index
    %75 = memref.load %arg4[%c75] : memref<108xf32, #tpu.memory_space<smem>>
    %c76 = arith.constant 76 : index
    %76 = memref.load %arg4[%c76] : memref<108xf32, #tpu.memory_space<smem>>
    %c77 = arith.constant 77 : index
    %77 = memref.load %arg4[%c77] : memref<108xf32, #tpu.memory_space<smem>>
    %c78 = arith.constant 78 : index
    %78 = memref.load %arg4[%c78] : memref<108xf32, #tpu.memory_space<smem>>
    %c79 = arith.constant 79 : index
    %79 = memref.load %arg4[%c79] : memref<108xf32, #tpu.memory_space<smem>>
    %c80 = arith.constant 80 : index
    %80 = memref.load %arg4[%c80] : memref<108xf32, #tpu.memory_space<smem>>
    %c81 = arith.constant 81 : index
    %81 = memref.load %arg4[%c81] : memref<108xf32, #tpu.memory_space<smem>>
    %c82 = arith.constant 82 : index
    %82 = memref.load %arg4[%c82] : memref<108xf32, #tpu.memory_space<smem>>
    %c83 = arith.constant 83 : index
    %83 = memref.load %arg4[%c83] : memref<108xf32, #tpu.memory_space<smem>>
    %c84 = arith.constant 84 : index
    %84 = memref.load %arg4[%c84] : memref<108xf32, #tpu.memory_space<smem>>
    %c85 = arith.constant 85 : index
    %85 = memref.load %arg4[%c85] : memref<108xf32, #tpu.memory_space<smem>>
    %c86 = arith.constant 86 : index
    %86 = memref.load %arg4[%c86] : memref<108xf32, #tpu.memory_space<smem>>
    %c87 = arith.constant 87 : index
    %87 = memref.load %arg4[%c87] : memref<108xf32, #tpu.memory_space<smem>>
    %c88 = arith.constant 88 : index
    %88 = memref.load %arg4[%c88] : memref<108xf32, #tpu.memory_space<smem>>
    %c89 = arith.constant 89 : index
    %89 = memref.load %arg4[%c89] : memref<108xf32, #tpu.memory_space<smem>>
    %c90 = arith.constant 90 : index
    %90 = memref.load %arg4[%c90] : memref<108xf32, #tpu.memory_space<smem>>
    %c91 = arith.constant 91 : index
    %91 = memref.load %arg4[%c91] : memref<108xf32, #tpu.memory_space<smem>>
    %c92 = arith.constant 92 : index
    %92 = memref.load %arg4[%c92] : memref<108xf32, #tpu.memory_space<smem>>
    %c93 = arith.constant 93 : index
    %93 = memref.load %arg4[%c93] : memref<108xf32, #tpu.memory_space<smem>>
    %c94 = arith.constant 94 : index
    %94 = memref.load %arg4[%c94] : memref<108xf32, #tpu.memory_space<smem>>
    %c95 = arith.constant 95 : index
    %95 = memref.load %arg4[%c95] : memref<108xf32, #tpu.memory_space<smem>>
    %c96 = arith.constant 96 : index
    %96 = memref.load %arg4[%c96] : memref<108xf32, #tpu.memory_space<smem>>
    %c97 = arith.constant 97 : index
    %97 = memref.load %arg4[%c97] : memref<108xf32, #tpu.memory_space<smem>>
    %c98 = arith.constant 98 : index
    %98 = memref.load %arg4[%c98] : memref<108xf32, #tpu.memory_space<smem>>
    %c99 = arith.constant 99 : index
    %99 = memref.load %arg4[%c99] : memref<108xf32, #tpu.memory_space<smem>>
    %c100 = arith.constant 100 : index
    %100 = memref.load %arg4[%c100] : memref<108xf32, #tpu.memory_space<smem>>
    %c101 = arith.constant 101 : index
    %101 = memref.load %arg4[%c101] : memref<108xf32, #tpu.memory_space<smem>>
    %c102 = arith.constant 102 : index
    %102 = memref.load %arg4[%c102] : memref<108xf32, #tpu.memory_space<smem>>
    %c103 = arith.constant 103 : index
    %103 = memref.load %arg4[%c103] : memref<108xf32, #tpu.memory_space<smem>>
    %c104 = arith.constant 104 : index
    %104 = memref.load %arg4[%c104] : memref<108xf32, #tpu.memory_space<smem>>
    %c105 = arith.constant 105 : index
    %105 = memref.load %arg4[%c105] : memref<108xf32, #tpu.memory_space<smem>>
    %c106 = arith.constant 106 : index
    %106 = memref.load %arg4[%c106] : memref<108xf32, #tpu.memory_space<smem>>
    %c107 = arith.constant 107 : index
    %107 = memref.load %arg4[%c107] : memref<108xf32, #tpu.memory_space<smem>>
    %c0_0 = arith.constant 0 : index
    %c0_1 = arith.constant 0 : index
    %c0_2 = arith.constant 0 : index
    %c0_3 = arith.constant 0 : index
    %108 = vector.load %arg1[%c0_0, %c0_1, %c0_2, %c0_3] : memref<1x3x20x20xf32, #tpu.memory_space<vmem>>, vector<1x1x20x20xf32>
    %109 = vector.shape_cast %108 : vector<1x1x20x20xf32> to vector<20x20xf32>
    %c0_4 = arith.constant 0 : index
    %c0_5 = arith.constant 0 : index
    %c0_6 = arith.constant 0 : index
    %110 = vector.load %arg2[%c0_4, %c0_5, %c0_6] : memref<3x20x20xf32, #tpu.memory_space<vmem>>, vector<1x20x20xf32>
    %111 = vector.shape_cast %110 : vector<1x20x20xf32> to vector<20x20xf32>
    %112 = arith.mulf %109, %111 : vector<20x20xf32>
    %c0_7 = arith.constant 0 : index
    %c1_8 = arith.constant 1 : index
    %c0_9 = arith.constant 0 : index
    %c0_10 = arith.constant 0 : index
    %113 = vector.load %arg1[%c0_7, %c1_8, %c0_9, %c0_10] : memref<1x3x20x20xf32, #tpu.memory_space<vmem>>, vector<1x1x20x20xf32>
    %114 = vector.shape_cast %113 : vector<1x1x20x20xf32> to vector<20x20xf32>
    %c1_11 = arith.constant 1 : index
    %c0_12 = arith.constant 0 : index
    %c0_13 = arith.constant 0 : index
    %115 = vector.load %arg2[%c1_11, %c0_12, %c0_13] : memref<3x20x20xf32, #tpu.memory_space<vmem>>, vector<1x20x20xf32>
    %116 = vector.shape_cast %115 : vector<1x20x20xf32> to vector<20x20xf32>
    %117 = arith.mulf %114, %116 : vector<20x20xf32>
    %118 = arith.addf %112, %117 : vector<20x20xf32>
    %c0_14 = arith.constant 0 : index
    %c2_15 = arith.constant 2 : index
    %c0_16 = arith.constant 0 : index
    %c0_17 = arith.constant 0 : index
    %119 = vector.load %arg1[%c0_14, %c2_15, %c0_16, %c0_17] : memref<1x3x20x20xf32, #tpu.memory_space<vmem>>, vector<1x1x20x20xf32>
    %120 = vector.shape_cast %119 : vector<1x1x20x20xf32> to vector<20x20xf32>
    %c2_18 = arith.constant 2 : index
    %c0_19 = arith.constant 0 : index
    %c0_20 = arith.constant 0 : index
    %121 = vector.load %arg2[%c2_18, %c0_19, %c0_20] : memref<3x20x20xf32, #tpu.memory_space<vmem>>, vector<1x20x20xf32>
    %122 = vector.shape_cast %121 : vector<1x20x20xf32> to vector<20x20xf32>
    %123 = arith.mulf %120, %122 : vector<20x20xf32>
    %124 = arith.addf %118, %123 : vector<20x20xf32>
    %125 = vector.extract_strided_slice %124 {offsets = [0, 0], sizes = [20, 18], strides = [1, 1]} : vector<20x20xf32> to vector<20x18xf32>
    %126 = vector.extract_strided_slice %125 {offsets = [0, 0], sizes = [18, 18], strides = [1, 1]} : vector<20x18xf32> to vector<18x18xf32>
    %c0_21 = arith.constant 0 : index
    %c0_22 = arith.constant 0 : index
    %c0_23 = arith.constant 0 : index
    %127 = vector.load %arg3[%c0_21, %c0_22, %c0_23] : memref<36x18x18xf32, #tpu.memory_space<vmem>>, vector<1x18x18xf32>
    %128 = vector.shape_cast %127 : vector<1x18x18xf32> to vector<18x18xf32>
    %129 = arith.mulf %126, %128 : vector<18x18xf32>
    %c1_24 = arith.constant 1 : index
    %c0_25 = arith.constant 0 : index
    %c0_26 = arith.constant 0 : index
    %130 = vector.load %arg3[%c1_24, %c0_25, %c0_26] : memref<36x18x18xf32, #tpu.memory_space<vmem>>, vector<1x18x18xf32>
    %131 = vector.shape_cast %130 : vector<1x18x18xf32> to vector<18x18xf32>
    %132 = arith.mulf %126, %131 : vector<18x18xf32>
    %c2_27 = arith.constant 2 : index
    %c0_28 = arith.constant 0 : index
    %c0_29 = arith.constant 0 : index
    %133 = vector.load %arg3[%c2_27, %c0_28, %c0_29] : memref<36x18x18xf32, #tpu.memory_space<vmem>>, vector<1x18x18xf32>
    %134 = vector.shape_cast %133 : vector<1x18x18xf32> to vector<18x18xf32>
    %135 = arith.mulf %126, %134 : vector<18x18xf32>
    %c3_30 = arith.constant 3 : index
    %c0_31 = arith.constant 0 : index
    %c0_32 = arith.constant 0 : index
    %136 = vector.load %arg3[%c3_30, %c0_31, %c0_32] : memref<36x18x18xf32, #tpu.memory_space<vmem>>, vector<1x18x18xf32>
    %137 = vector.shape_cast %136 : vector<1x18x18xf32> to vector<18x18xf32>
    %138 = arith.mulf %126, %137 : vector<18x18xf32>
    %139 = vector.extract_strided_slice %125 {offsets = [1, 0], sizes = [18, 18], strides = [1, 1]} : vector<20x18xf32> to vector<18x18xf32>
    %c12_33 = arith.constant 12 : index
    %c0_34 = arith.constant 0 : index
    %c0_35 = arith.constant 0 : index
    %140 = vector.load %arg3[%c12_33, %c0_34, %c0_35] : memref<36x18x18xf32, #tpu.memory_space<vmem>>, vector<1x18x18xf32>
    %141 = vector.shape_cast %140 : vector<1x18x18xf32> to vector<18x18xf32>
    %142 = arith.mulf %139, %141 : vector<18x18xf32>
    %143 = arith.addf %129, %142 : vector<18x18xf32>
    %c13_36 = arith.constant 13 : index
    %c0_37 = arith.constant 0 : index
    %c0_38 = arith.constant 0 : index
    %144 = vector.load %arg3[%c13_36, %c0_37, %c0_38] : memref<36x18x18xf32, #tpu.memory_space<vmem>>, vector<1x18x18xf32>
    %145 = vector.shape_cast %144 : vector<1x18x18xf32> to vector<18x18xf32>
    %146 = arith.mulf %139, %145 : vector<18x18xf32>
    %147 = arith.addf %132, %146 : vector<18x18xf32>
    %c14_39 = arith.constant 14 : index
    %c0_40 = arith.constant 0 : index
    %c0_41 = arith.constant 0 : index
    %148 = vector.load %arg3[%c14_39, %c0_40, %c0_41] : memref<36x18x18xf32, #tpu.memory_space<vmem>>, vector<1x18x18xf32>
    %149 = vector.shape_cast %148 : vector<1x18x18xf32> to vector<18x18xf32>
    %150 = arith.mulf %139, %149 : vector<18x18xf32>
    %151 = arith.addf %135, %150 : vector<18x18xf32>
    %c15_42 = arith.constant 15 : index
    %c0_43 = arith.constant 0 : index
    %c0_44 = arith.constant 0 : index
    %152 = vector.load %arg3[%c15_42, %c0_43, %c0_44] : memref<36x18x18xf32, #tpu.memory_space<vmem>>, vector<1x18x18xf32>
    %153 = vector.shape_cast %152 : vector<1x18x18xf32> to vector<18x18xf32>
    %154 = arith.mulf %139, %153 : vector<18x18xf32>
    %155 = arith.addf %138, %154 : vector<18x18xf32>
    %156 = vector.extract_strided_slice %125 {offsets = [2, 0], sizes = [18, 18], strides = [1, 1]} : vector<20x18xf32> to vector<18x18xf32>
    %c24_45 = arith.constant 24 : index
    %c0_46 = arith.constant 0 : index
    %c0_47 = arith.constant 0 : index
    %157 = vector.load %arg3[%c24_45, %c0_46, %c0_47] : memref<36x18x18xf32, #tpu.memory_space<vmem>>, vector<1x18x18xf32>
    %158 = vector.shape_cast %157 : vector<1x18x18xf32> to vector<18x18xf32>
    %159 = arith.mulf %156, %158 : vector<18x18xf32>
    %160 = arith.addf %143, %159 : vector<18x18xf32>
    %c25_48 = arith.constant 25 : index
    %c0_49 = arith.constant 0 : index
    %c0_50 = arith.constant 0 : index
    %161 = vector.load %arg3[%c25_48, %c0_49, %c0_50] : memref<36x18x18xf32, #tpu.memory_space<vmem>>, vector<1x18x18xf32>
    %162 = vector.shape_cast %161 : vector<1x18x18xf32> to vector<18x18xf32>
    %163 = arith.mulf %156, %162 : vector<18x18xf32>
    %164 = arith.addf %147, %163 : vector<18x18xf32>
    %c26_51 = arith.constant 26 : index
    %c0_52 = arith.constant 0 : index
    %c0_53 = arith.constant 0 : index
    %165 = vector.load %arg3[%c26_51, %c0_52, %c0_53] : memref<36x18x18xf32, #tpu.memory_space<vmem>>, vector<1x18x18xf32>
    %166 = vector.shape_cast %165 : vector<1x18x18xf32> to vector<18x18xf32>
    %167 = arith.mulf %156, %166 : vector<18x18xf32>
    %168 = arith.addf %151, %167 : vector<18x18xf32>
    %c27_54 = arith.constant 27 : index
    %c0_55 = arith.constant 0 : index
    %c0_56 = arith.constant 0 : index
    %169 = vector.load %arg3[%c27_54, %c0_55, %c0_56] : memref<36x18x18xf32, #tpu.memory_space<vmem>>, vector<1x18x18xf32>
    %170 = vector.shape_cast %169 : vector<1x18x18xf32> to vector<18x18xf32>
    %171 = arith.mulf %156, %170 : vector<18x18xf32>
    %172 = arith.addf %155, %171 : vector<18x18xf32>
    %173 = vector.extract_strided_slice %124 {offsets = [0, 1], sizes = [20, 18], strides = [1, 1]} : vector<20x20xf32> to vector<20x18xf32>
    %174 = vector.extract_strided_slice %173 {offsets = [0, 0], sizes = [18, 18], strides = [1, 1]} : vector<20x18xf32> to vector<18x18xf32>
    %c4_57 = arith.constant 4 : index
    %c0_58 = arith.constant 0 : index
    %c0_59 = arith.constant 0 : index
    %175 = vector.load %arg3[%c4_57, %c0_58, %c0_59] : memref<36x18x18xf32, #tpu.memory_space<vmem>>, vector<1x18x18xf32>
    %176 = vector.shape_cast %175 : vector<1x18x18xf32> to vector<18x18xf32>
    %177 = arith.mulf %174, %176 : vector<18x18xf32>
    %178 = arith.addf %160, %177 : vector<18x18xf32>
    %c5_60 = arith.constant 5 : index
    %c0_61 = arith.constant 0 : index
    %c0_62 = arith.constant 0 : index
    %179 = vector.load %arg3[%c5_60, %c0_61, %c0_62] : memref<36x18x18xf32, #tpu.memory_space<vmem>>, vector<1x18x18xf32>
    %180 = vector.shape_cast %179 : vector<1x18x18xf32> to vector<18x18xf32>
    %181 = arith.mulf %174, %180 : vector<18x18xf32>
    %182 = arith.addf %164, %181 : vector<18x18xf32>
    %c6_63 = arith.constant 6 : index
    %c0_64 = arith.constant 0 : index
    %c0_65 = arith.constant 0 : index
    %183 = vector.load %arg3[%c6_63, %c0_64, %c0_65] : memref<36x18x18xf32, #tpu.memory_space<vmem>>, vector<1x18x18xf32>
    %184 = vector.shape_cast %183 : vector<1x18x18xf32> to vector<18x18xf32>
    %185 = arith.mulf %174, %184 : vector<18x18xf32>
    %186 = arith.addf %168, %185 : vector<18x18xf32>
    %c7_66 = arith.constant 7 : index
    %c0_67 = arith.constant 0 : index
    %c0_68 = arith.constant 0 : index
    %187 = vector.load %arg3[%c7_66, %c0_67, %c0_68] : memref<36x18x18xf32, #tpu.memory_space<vmem>>, vector<1x18x18xf32>
    %188 = vector.shape_cast %187 : vector<1x18x18xf32> to vector<18x18xf32>
    %189 = arith.mulf %174, %188 : vector<18x18xf32>
    %190 = arith.addf %172, %189 : vector<18x18xf32>
    %191 = vector.extract_strided_slice %173 {offsets = [1, 0], sizes = [18, 18], strides = [1, 1]} : vector<20x18xf32> to vector<18x18xf32>
    %c16_69 = arith.constant 16 : index
    %c0_70 = arith.constant 0 : index
    %c0_71 = arith.constant 0 : index
    %192 = vector.load %arg3[%c16_69, %c0_70, %c0_71] : memref<36x18x18xf32, #tpu.memory_space<vmem>>, vector<1x18x18xf32>
    %193 = vector.shape_cast %192 : vector<1x18x18xf32> to vector<18x18xf32>
    %194 = arith.mulf %191, %193 : vector<18x18xf32>
    %195 = arith.addf %178, %194 : vector<18x18xf32>
    %c17_72 = arith.constant 17 : index
    %c0_73 = arith.constant 0 : index
    %c0_74 = arith.constant 0 : index
    %196 = vector.load %arg3[%c17_72, %c0_73, %c0_74] : memref<36x18x18xf32, #tpu.memory_space<vmem>>, vector<1x18x18xf32>
    %197 = vector.shape_cast %196 : vector<1x18x18xf32> to vector<18x18xf32>
    %198 = arith.mulf %191, %197 : vector<18x18xf32>
    %199 = arith.addf %182, %198 : vector<18x18xf32>
    %c18_75 = arith.constant 18 : index
    %c0_76 = arith.constant 0 : index
    %c0_77 = arith.constant 0 : index
    %200 = vector.load %arg3[%c18_75, %c0_76, %c0_77] : memref<36x18x18xf32, #tpu.memory_space<vmem>>, vector<1x18x18xf32>
    %201 = vector.shape_cast %200 : vector<1x18x18xf32> to vector<18x18xf32>
    %202 = arith.mulf %191, %201 : vector<18x18xf32>
    %203 = arith.addf %186, %202 : vector<18x18xf32>
    %c19_78 = arith.constant 19 : index
    %c0_79 = arith.constant 0 : index
    %c0_80 = arith.constant 0 : index
    %204 = vector.load %arg3[%c19_78, %c0_79, %c0_80] : memref<36x18x18xf32, #tpu.memory_space<vmem>>, vector<1x18x18xf32>
    %205 = vector.shape_cast %204 : vector<1x18x18xf32> to vector<18x18xf32>
    %206 = arith.mulf %191, %205 : vector<18x18xf32>
    %207 = arith.addf %190, %206 : vector<18x18xf32>
    %208 = vector.extract_strided_slice %173 {offsets = [2, 0], sizes = [18, 18], strides = [1, 1]} : vector<20x18xf32> to vector<18x18xf32>
    %c28_81 = arith.constant 28 : index
    %c0_82 = arith.constant 0 : index
    %c0_83 = arith.constant 0 : index
    %209 = vector.load %arg3[%c28_81, %c0_82, %c0_83] : memref<36x18x18xf32, #tpu.memory_space<vmem>>, vector<1x18x18xf32>
    %210 = vector.shape_cast %209 : vector<1x18x18xf32> to vector<18x18xf32>
    %211 = arith.mulf %208, %210 : vector<18x18xf32>
    %212 = arith.addf %195, %211 : vector<18x18xf32>
    %c29_84 = arith.constant 29 : index
    %c0_85 = arith.constant 0 : index
    %c0_86 = arith.constant 0 : index
    %213 = vector.load %arg3[%c29_84, %c0_85, %c0_86] : memref<36x18x18xf32, #tpu.memory_space<vmem>>, vector<1x18x18xf32>
    %214 = vector.shape_cast %213 : vector<1x18x18xf32> to vector<18x18xf32>
    %215 = arith.mulf %208, %214 : vector<18x18xf32>
    %216 = arith.addf %199, %215 : vector<18x18xf32>
    %c30_87 = arith.constant 30 : index
    %c0_88 = arith.constant 0 : index
    %c0_89 = arith.constant 0 : index
    %217 = vector.load %arg3[%c30_87, %c0_88, %c0_89] : memref<36x18x18xf32, #tpu.memory_space<vmem>>, vector<1x18x18xf32>
    %218 = vector.shape_cast %217 : vector<1x18x18xf32> to vector<18x18xf32>
    %219 = arith.mulf %208, %218 : vector<18x18xf32>
    %220 = arith.addf %203, %219 : vector<18x18xf32>
    %c31_90 = arith.constant 31 : index
    %c0_91 = arith.constant 0 : index
    %c0_92 = arith.constant 0 : index
    %221 = vector.load %arg3[%c31_90, %c0_91, %c0_92] : memref<36x18x18xf32, #tpu.memory_space<vmem>>, vector<1x18x18xf32>
    %222 = vector.shape_cast %221 : vector<1x18x18xf32> to vector<18x18xf32>
    %223 = arith.mulf %208, %222 : vector<18x18xf32>
    %224 = arith.addf %207, %223 : vector<18x18xf32>
    %225 = vector.extract_strided_slice %124 {offsets = [0, 2], sizes = [20, 18], strides = [1, 1]} : vector<20x20xf32> to vector<20x18xf32>
    %226 = vector.extract_strided_slice %225 {offsets = [0, 0], sizes = [18, 18], strides = [1, 1]} : vector<20x18xf32> to vector<18x18xf32>
    %c8_93 = arith.constant 8 : index
    %c0_94 = arith.constant 0 : index
    %c0_95 = arith.constant 0 : index
    %227 = vector.load %arg3[%c8_93, %c0_94, %c0_95] : memref<36x18x18xf32, #tpu.memory_space<vmem>>, vector<1x18x18xf32>
    %228 = vector.shape_cast %227 : vector<1x18x18xf32> to vector<18x18xf32>
    %229 = arith.mulf %226, %228 : vector<18x18xf32>
    %230 = arith.addf %212, %229 : vector<18x18xf32>
    %c9_96 = arith.constant 9 : index
    %c0_97 = arith.constant 0 : index
    %c0_98 = arith.constant 0 : index
    %231 = vector.load %arg3[%c9_96, %c0_97, %c0_98] : memref<36x18x18xf32, #tpu.memory_space<vmem>>, vector<1x18x18xf32>
    %232 = vector.shape_cast %231 : vector<1x18x18xf32> to vector<18x18xf32>
    %233 = arith.mulf %226, %232 : vector<18x18xf32>
    %234 = arith.addf %216, %233 : vector<18x18xf32>
    %c10_99 = arith.constant 10 : index
    %c0_100 = arith.constant 0 : index
    %c0_101 = arith.constant 0 : index
    %235 = vector.load %arg3[%c10_99, %c0_100, %c0_101] : memref<36x18x18xf32, #tpu.memory_space<vmem>>, vector<1x18x18xf32>
    %236 = vector.shape_cast %235 : vector<1x18x18xf32> to vector<18x18xf32>
    %237 = arith.mulf %226, %236 : vector<18x18xf32>
    %238 = arith.addf %220, %237 : vector<18x18xf32>
    %c11_102 = arith.constant 11 : index
    %c0_103 = arith.constant 0 : index
    %c0_104 = arith.constant 0 : index
    %239 = vector.load %arg3[%c11_102, %c0_103, %c0_104] : memref<36x18x18xf32, #tpu.memory_space<vmem>>, vector<1x18x18xf32>
    %240 = vector.shape_cast %239 : vector<1x18x18xf32> to vector<18x18xf32>
    %241 = arith.mulf %226, %240 : vector<18x18xf32>
    %242 = arith.addf %224, %241 : vector<18x18xf32>
    %243 = vector.extract_strided_slice %225 {offsets = [1, 0], sizes = [18, 18], strides = [1, 1]} : vector<20x18xf32> to vector<18x18xf32>
    %c20_105 = arith.constant 20 : index
    %c0_106 = arith.constant 0 : index
    %c0_107 = arith.constant 0 : index
    %244 = vector.load %arg3[%c20_105, %c0_106, %c0_107] : memref<36x18x18xf32, #tpu.memory_space<vmem>>, vector<1x18x18xf32>
    %245 = vector.shape_cast %244 : vector<1x18x18xf32> to vector<18x18xf32>
    %246 = arith.mulf %243, %245 : vector<18x18xf32>
    %247 = arith.addf %230, %246 : vector<18x18xf32>
    %c21_108 = arith.constant 21 : index
    %c0_109 = arith.constant 0 : index
    %c0_110 = arith.constant 0 : index
    %248 = vector.load %arg3[%c21_108, %c0_109, %c0_110] : memref<36x18x18xf32, #tpu.memory_space<vmem>>, vector<1x18x18xf32>
    %249 = vector.shape_cast %248 : vector<1x18x18xf32> to vector<18x18xf32>
    %250 = arith.mulf %243, %249 : vector<18x18xf32>
    %251 = arith.addf %234, %250 : vector<18x18xf32>
    %c22_111 = arith.constant 22 : index
    %c0_112 = arith.constant 0 : index
    %c0_113 = arith.constant 0 : index
    %252 = vector.load %arg3[%c22_111, %c0_112, %c0_113] : memref<36x18x18xf32, #tpu.memory_space<vmem>>, vector<1x18x18xf32>
    %253 = vector.shape_cast %252 : vector<1x18x18xf32> to vector<18x18xf32>
    %254 = arith.mulf %243, %253 : vector<18x18xf32>
    %255 = arith.addf %238, %254 : vector<18x18xf32>
    %c23_114 = arith.constant 23 : index
    %c0_115 = arith.constant 0 : index
    %c0_116 = arith.constant 0 : index
    %256 = vector.load %arg3[%c23_114, %c0_115, %c0_116] : memref<36x18x18xf32, #tpu.memory_space<vmem>>, vector<1x18x18xf32>
    %257 = vector.shape_cast %256 : vector<1x18x18xf32> to vector<18x18xf32>
    %258 = arith.mulf %243, %257 : vector<18x18xf32>
    %259 = arith.addf %242, %258 : vector<18x18xf32>
    %260 = vector.extract_strided_slice %225 {offsets = [2, 0], sizes = [18, 18], strides = [1, 1]} : vector<20x18xf32> to vector<18x18xf32>
    %c32_117 = arith.constant 32 : index
    %c0_118 = arith.constant 0 : index
    %c0_119 = arith.constant 0 : index
    %261 = vector.load %arg3[%c32_117, %c0_118, %c0_119] : memref<36x18x18xf32, #tpu.memory_space<vmem>>, vector<1x18x18xf32>
    %262 = vector.shape_cast %261 : vector<1x18x18xf32> to vector<18x18xf32>
    %263 = arith.mulf %260, %262 : vector<18x18xf32>
    %264 = arith.addf %247, %263 : vector<18x18xf32>
    %c33_120 = arith.constant 33 : index
    %c0_121 = arith.constant 0 : index
    %c0_122 = arith.constant 0 : index
    %265 = vector.load %arg3[%c33_120, %c0_121, %c0_122] : memref<36x18x18xf32, #tpu.memory_space<vmem>>, vector<1x18x18xf32>
    %266 = vector.shape_cast %265 : vector<1x18x18xf32> to vector<18x18xf32>
    %267 = arith.mulf %260, %266 : vector<18x18xf32>
    %268 = arith.addf %251, %267 : vector<18x18xf32>
    %c34_123 = arith.constant 34 : index
    %c0_124 = arith.constant 0 : index
    %c0_125 = arith.constant 0 : index
    %269 = vector.load %arg3[%c34_123, %c0_124, %c0_125] : memref<36x18x18xf32, #tpu.memory_space<vmem>>, vector<1x18x18xf32>
    %270 = vector.shape_cast %269 : vector<1x18x18xf32> to vector<18x18xf32>
    %271 = arith.mulf %260, %270 : vector<18x18xf32>
    %272 = arith.addf %255, %271 : vector<18x18xf32>
    %c35_126 = arith.constant 35 : index
    %c0_127 = arith.constant 0 : index
    %c0_128 = arith.constant 0 : index
    %273 = vector.load %arg3[%c35_126, %c0_127, %c0_128] : memref<36x18x18xf32, #tpu.memory_space<vmem>>, vector<1x18x18xf32>
    %274 = vector.shape_cast %273 : vector<1x18x18xf32> to vector<18x18xf32>
    %275 = arith.mulf %260, %274 : vector<18x18xf32>
    %276 = arith.addf %259, %275 : vector<18x18xf32>
    %277 = vector.extract_strided_slice %264 {offsets = [0, 0], sizes = [18, 16], strides = [1, 1]} : vector<18x18xf32> to vector<18x16xf32>
    %278 = vector.extract_strided_slice %277 {offsets = [0, 0], sizes = [16, 16], strides = [1, 1]} : vector<18x16xf32> to vector<16x16xf32>
    %279 = vector.broadcast %0 : f32 to vector<16x16xf32>
    %280 = arith.mulf %278, %279 : vector<16x16xf32>
    %281 = vector.broadcast %1 : f32 to vector<16x16xf32>
    %282 = arith.mulf %278, %281 : vector<16x16xf32>
    %283 = vector.broadcast %2 : f32 to vector<16x16xf32>
    %284 = arith.mulf %278, %283 : vector<16x16xf32>
    %285 = vector.extract_strided_slice %277 {offsets = [1, 0], sizes = [16, 16], strides = [1, 1]} : vector<18x16xf32> to vector<16x16xf32>
    %286 = vector.broadcast %36 : f32 to vector<16x16xf32>
    %287 = arith.mulf %285, %286 : vector<16x16xf32>
    %288 = arith.addf %280, %287 : vector<16x16xf32>
    %289 = vector.broadcast %37 : f32 to vector<16x16xf32>
    %290 = arith.mulf %285, %289 : vector<16x16xf32>
    %291 = arith.addf %282, %290 : vector<16x16xf32>
    %292 = vector.broadcast %38 : f32 to vector<16x16xf32>
    %293 = arith.mulf %285, %292 : vector<16x16xf32>
    %294 = arith.addf %284, %293 : vector<16x16xf32>
    %295 = vector.extract_strided_slice %277 {offsets = [2, 0], sizes = [16, 16], strides = [1, 1]} : vector<18x16xf32> to vector<16x16xf32>
    %296 = vector.broadcast %72 : f32 to vector<16x16xf32>
    %297 = arith.mulf %295, %296 : vector<16x16xf32>
    %298 = arith.addf %288, %297 : vector<16x16xf32>
    %299 = vector.broadcast %73 : f32 to vector<16x16xf32>
    %300 = arith.mulf %295, %299 : vector<16x16xf32>
    %301 = arith.addf %291, %300 : vector<16x16xf32>
    %302 = vector.broadcast %74 : f32 to vector<16x16xf32>
    %303 = arith.mulf %295, %302 : vector<16x16xf32>
    %304 = arith.addf %294, %303 : vector<16x16xf32>
    %305 = vector.extract_strided_slice %264 {offsets = [0, 1], sizes = [18, 16], strides = [1, 1]} : vector<18x18xf32> to vector<18x16xf32>
    %306 = vector.extract_strided_slice %305 {offsets = [0, 0], sizes = [16, 16], strides = [1, 1]} : vector<18x16xf32> to vector<16x16xf32>
    %307 = vector.broadcast %12 : f32 to vector<16x16xf32>
    %308 = arith.mulf %306, %307 : vector<16x16xf32>
    %309 = arith.addf %298, %308 : vector<16x16xf32>
    %310 = vector.broadcast %13 : f32 to vector<16x16xf32>
    %311 = arith.mulf %306, %310 : vector<16x16xf32>
    %312 = arith.addf %301, %311 : vector<16x16xf32>
    %313 = vector.broadcast %14 : f32 to vector<16x16xf32>
    %314 = arith.mulf %306, %313 : vector<16x16xf32>
    %315 = arith.addf %304, %314 : vector<16x16xf32>
    %316 = vector.extract_strided_slice %305 {offsets = [1, 0], sizes = [16, 16], strides = [1, 1]} : vector<18x16xf32> to vector<16x16xf32>
    %317 = vector.broadcast %48 : f32 to vector<16x16xf32>
    %318 = arith.mulf %316, %317 : vector<16x16xf32>
    %319 = arith.addf %309, %318 : vector<16x16xf32>
    %320 = vector.broadcast %49 : f32 to vector<16x16xf32>
    %321 = arith.mulf %316, %320 : vector<16x16xf32>
    %322 = arith.addf %312, %321 : vector<16x16xf32>
    %323 = vector.broadcast %50 : f32 to vector<16x16xf32>
    %324 = arith.mulf %316, %323 : vector<16x16xf32>
    %325 = arith.addf %315, %324 : vector<16x16xf32>
    %326 = vector.extract_strided_slice %305 {offsets = [2, 0], sizes = [16, 16], strides = [1, 1]} : vector<18x16xf32> to vector<16x16xf32>
    %327 = vector.broadcast %84 : f32 to vector<16x16xf32>
    %328 = arith.mulf %326, %327 : vector<16x16xf32>
    %329 = arith.addf %319, %328 : vector<16x16xf32>
    %330 = vector.broadcast %85 : f32 to vector<16x16xf32>
    %331 = arith.mulf %326, %330 : vector<16x16xf32>
    %332 = arith.addf %322, %331 : vector<16x16xf32>
    %333 = vector.broadcast %86 : f32 to vector<16x16xf32>
    %334 = arith.mulf %326, %333 : vector<16x16xf32>
    %335 = arith.addf %325, %334 : vector<16x16xf32>
    %336 = vector.extract_strided_slice %264 {offsets = [0, 2], sizes = [18, 16], strides = [1, 1]} : vector<18x18xf32> to vector<18x16xf32>
    %337 = vector.extract_strided_slice %336 {offsets = [0, 0], sizes = [16, 16], strides = [1, 1]} : vector<18x16xf32> to vector<16x16xf32>
    %338 = vector.broadcast %24 : f32 to vector<16x16xf32>
    %339 = arith.mulf %337, %338 : vector<16x16xf32>
    %340 = arith.addf %329, %339 : vector<16x16xf32>
    %341 = vector.broadcast %25 : f32 to vector<16x16xf32>
    %342 = arith.mulf %337, %341 : vector<16x16xf32>
    %343 = arith.addf %332, %342 : vector<16x16xf32>
    %344 = vector.broadcast %26 : f32 to vector<16x16xf32>
    %345 = arith.mulf %337, %344 : vector<16x16xf32>
    %346 = arith.addf %335, %345 : vector<16x16xf32>
    %347 = vector.extract_strided_slice %336 {offsets = [1, 0], sizes = [16, 16], strides = [1, 1]} : vector<18x16xf32> to vector<16x16xf32>
    %348 = vector.broadcast %60 : f32 to vector<16x16xf32>
    %349 = arith.mulf %347, %348 : vector<16x16xf32>
    %350 = arith.addf %340, %349 : vector<16x16xf32>
    %351 = vector.broadcast %61 : f32 to vector<16x16xf32>
    %352 = arith.mulf %347, %351 : vector<16x16xf32>
    %353 = arith.addf %343, %352 : vector<16x16xf32>
    %354 = vector.broadcast %62 : f32 to vector<16x16xf32>
    %355 = arith.mulf %347, %354 : vector<16x16xf32>
    %356 = arith.addf %346, %355 : vector<16x16xf32>
    %357 = vector.extract_strided_slice %336 {offsets = [2, 0], sizes = [16, 16], strides = [1, 1]} : vector<18x16xf32> to vector<16x16xf32>
    %358 = vector.broadcast %96 : f32 to vector<16x16xf32>
    %359 = arith.mulf %357, %358 : vector<16x16xf32>
    %360 = arith.addf %350, %359 : vector<16x16xf32>
    %361 = vector.broadcast %97 : f32 to vector<16x16xf32>
    %362 = arith.mulf %357, %361 : vector<16x16xf32>
    %363 = arith.addf %353, %362 : vector<16x16xf32>
    %364 = vector.broadcast %98 : f32 to vector<16x16xf32>
    %365 = arith.mulf %357, %364 : vector<16x16xf32>
    %366 = arith.addf %356, %365 : vector<16x16xf32>
    %367 = vector.extract_strided_slice %268 {offsets = [0, 0], sizes = [18, 16], strides = [1, 1]} : vector<18x18xf32> to vector<18x16xf32>
    %368 = vector.extract_strided_slice %367 {offsets = [0, 0], sizes = [16, 16], strides = [1, 1]} : vector<18x16xf32> to vector<16x16xf32>
    %369 = vector.broadcast %3 : f32 to vector<16x16xf32>
    %370 = arith.mulf %368, %369 : vector<16x16xf32>
    %371 = arith.addf %360, %370 : vector<16x16xf32>
    %372 = vector.broadcast %4 : f32 to vector<16x16xf32>
    %373 = arith.mulf %368, %372 : vector<16x16xf32>
    %374 = arith.addf %363, %373 : vector<16x16xf32>
    %375 = vector.broadcast %5 : f32 to vector<16x16xf32>
    %376 = arith.mulf %368, %375 : vector<16x16xf32>
    %377 = arith.addf %366, %376 : vector<16x16xf32>
    %378 = vector.extract_strided_slice %367 {offsets = [1, 0], sizes = [16, 16], strides = [1, 1]} : vector<18x16xf32> to vector<16x16xf32>
    %379 = vector.broadcast %39 : f32 to vector<16x16xf32>
    %380 = arith.mulf %378, %379 : vector<16x16xf32>
    %381 = arith.addf %371, %380 : vector<16x16xf32>
    %382 = vector.broadcast %40 : f32 to vector<16x16xf32>
    %383 = arith.mulf %378, %382 : vector<16x16xf32>
    %384 = arith.addf %374, %383 : vector<16x16xf32>
    %385 = vector.broadcast %41 : f32 to vector<16x16xf32>
    %386 = arith.mulf %378, %385 : vector<16x16xf32>
    %387 = arith.addf %377, %386 : vector<16x16xf32>
    %388 = vector.extract_strided_slice %367 {offsets = [2, 0], sizes = [16, 16], strides = [1, 1]} : vector<18x16xf32> to vector<16x16xf32>
    %389 = vector.broadcast %75 : f32 to vector<16x16xf32>
    %390 = arith.mulf %388, %389 : vector<16x16xf32>
    %391 = arith.addf %381, %390 : vector<16x16xf32>
    %392 = vector.broadcast %76 : f32 to vector<16x16xf32>
    %393 = arith.mulf %388, %392 : vector<16x16xf32>
    %394 = arith.addf %384, %393 : vector<16x16xf32>
    %395 = vector.broadcast %77 : f32 to vector<16x16xf32>
    %396 = arith.mulf %388, %395 : vector<16x16xf32>
    %397 = arith.addf %387, %396 : vector<16x16xf32>
    %398 = vector.extract_strided_slice %268 {offsets = [0, 1], sizes = [18, 16], strides = [1, 1]} : vector<18x18xf32> to vector<18x16xf32>
    %399 = vector.extract_strided_slice %398 {offsets = [0, 0], sizes = [16, 16], strides = [1, 1]} : vector<18x16xf32> to vector<16x16xf32>
    %400 = vector.broadcast %15 : f32 to vector<16x16xf32>
    %401 = arith.mulf %399, %400 : vector<16x16xf32>
    %402 = arith.addf %391, %401 : vector<16x16xf32>
    %403 = vector.broadcast %16 : f32 to vector<16x16xf32>
    %404 = arith.mulf %399, %403 : vector<16x16xf32>
    %405 = arith.addf %394, %404 : vector<16x16xf32>
    %406 = vector.broadcast %17 : f32 to vector<16x16xf32>
    %407 = arith.mulf %399, %406 : vector<16x16xf32>
    %408 = arith.addf %397, %407 : vector<16x16xf32>
    %409 = vector.extract_strided_slice %398 {offsets = [1, 0], sizes = [16, 16], strides = [1, 1]} : vector<18x16xf32> to vector<16x16xf32>
    %410 = vector.broadcast %51 : f32 to vector<16x16xf32>
    %411 = arith.mulf %409, %410 : vector<16x16xf32>
    %412 = arith.addf %402, %411 : vector<16x16xf32>
    %413 = vector.broadcast %52 : f32 to vector<16x16xf32>
    %414 = arith.mulf %409, %413 : vector<16x16xf32>
    %415 = arith.addf %405, %414 : vector<16x16xf32>
    %416 = vector.broadcast %53 : f32 to vector<16x16xf32>
    %417 = arith.mulf %409, %416 : vector<16x16xf32>
    %418 = arith.addf %408, %417 : vector<16x16xf32>
    %419 = vector.extract_strided_slice %398 {offsets = [2, 0], sizes = [16, 16], strides = [1, 1]} : vector<18x16xf32> to vector<16x16xf32>
    %420 = vector.broadcast %87 : f32 to vector<16x16xf32>
    %421 = arith.mulf %419, %420 : vector<16x16xf32>
    %422 = arith.addf %412, %421 : vector<16x16xf32>
    %423 = vector.broadcast %88 : f32 to vector<16x16xf32>
    %424 = arith.mulf %419, %423 : vector<16x16xf32>
    %425 = arith.addf %415, %424 : vector<16x16xf32>
    %426 = vector.broadcast %89 : f32 to vector<16x16xf32>
    %427 = arith.mulf %419, %426 : vector<16x16xf32>
    %428 = arith.addf %418, %427 : vector<16x16xf32>
    %429 = vector.extract_strided_slice %268 {offsets = [0, 2], sizes = [18, 16], strides = [1, 1]} : vector<18x18xf32> to vector<18x16xf32>
    %430 = vector.extract_strided_slice %429 {offsets = [0, 0], sizes = [16, 16], strides = [1, 1]} : vector<18x16xf32> to vector<16x16xf32>
    %431 = vector.broadcast %27 : f32 to vector<16x16xf32>
    %432 = arith.mulf %430, %431 : vector<16x16xf32>
    %433 = arith.addf %422, %432 : vector<16x16xf32>
    %434 = vector.broadcast %28 : f32 to vector<16x16xf32>
    %435 = arith.mulf %430, %434 : vector<16x16xf32>
    %436 = arith.addf %425, %435 : vector<16x16xf32>
    %437 = vector.broadcast %29 : f32 to vector<16x16xf32>
    %438 = arith.mulf %430, %437 : vector<16x16xf32>
    %439 = arith.addf %428, %438 : vector<16x16xf32>
    %440 = vector.extract_strided_slice %429 {offsets = [1, 0], sizes = [16, 16], strides = [1, 1]} : vector<18x16xf32> to vector<16x16xf32>
    %441 = vector.broadcast %63 : f32 to vector<16x16xf32>
    %442 = arith.mulf %440, %441 : vector<16x16xf32>
    %443 = arith.addf %433, %442 : vector<16x16xf32>
    %444 = vector.broadcast %64 : f32 to vector<16x16xf32>
    %445 = arith.mulf %440, %444 : vector<16x16xf32>
    %446 = arith.addf %436, %445 : vector<16x16xf32>
    %447 = vector.broadcast %65 : f32 to vector<16x16xf32>
    %448 = arith.mulf %440, %447 : vector<16x16xf32>
    %449 = arith.addf %439, %448 : vector<16x16xf32>
    %450 = vector.extract_strided_slice %429 {offsets = [2, 0], sizes = [16, 16], strides = [1, 1]} : vector<18x16xf32> to vector<16x16xf32>
    %451 = vector.broadcast %99 : f32 to vector<16x16xf32>
    %452 = arith.mulf %450, %451 : vector<16x16xf32>
    %453 = arith.addf %443, %452 : vector<16x16xf32>
    %454 = vector.broadcast %100 : f32 to vector<16x16xf32>
    %455 = arith.mulf %450, %454 : vector<16x16xf32>
    %456 = arith.addf %446, %455 : vector<16x16xf32>
    %457 = vector.broadcast %101 : f32 to vector<16x16xf32>
    %458 = arith.mulf %450, %457 : vector<16x16xf32>
    %459 = arith.addf %449, %458 : vector<16x16xf32>
    %460 = vector.extract_strided_slice %272 {offsets = [0, 0], sizes = [18, 16], strides = [1, 1]} : vector<18x18xf32> to vector<18x16xf32>
    %461 = vector.extract_strided_slice %460 {offsets = [0, 0], sizes = [16, 16], strides = [1, 1]} : vector<18x16xf32> to vector<16x16xf32>
    %462 = vector.broadcast %6 : f32 to vector<16x16xf32>
    %463 = arith.mulf %461, %462 : vector<16x16xf32>
    %464 = arith.addf %453, %463 : vector<16x16xf32>
    %465 = vector.broadcast %7 : f32 to vector<16x16xf32>
    %466 = arith.mulf %461, %465 : vector<16x16xf32>
    %467 = arith.addf %456, %466 : vector<16x16xf32>
    %468 = vector.broadcast %8 : f32 to vector<16x16xf32>
    %469 = arith.mulf %461, %468 : vector<16x16xf32>
    %470 = arith.addf %459, %469 : vector<16x16xf32>
    %471 = vector.extract_strided_slice %460 {offsets = [1, 0], sizes = [16, 16], strides = [1, 1]} : vector<18x16xf32> to vector<16x16xf32>
    %472 = vector.broadcast %42 : f32 to vector<16x16xf32>
    %473 = arith.mulf %471, %472 : vector<16x16xf32>
    %474 = arith.addf %464, %473 : vector<16x16xf32>
    %475 = vector.broadcast %43 : f32 to vector<16x16xf32>
    %476 = arith.mulf %471, %475 : vector<16x16xf32>
    %477 = arith.addf %467, %476 : vector<16x16xf32>
    %478 = vector.broadcast %44 : f32 to vector<16x16xf32>
    %479 = arith.mulf %471, %478 : vector<16x16xf32>
    %480 = arith.addf %470, %479 : vector<16x16xf32>
    %481 = vector.extract_strided_slice %460 {offsets = [2, 0], sizes = [16, 16], strides = [1, 1]} : vector<18x16xf32> to vector<16x16xf32>
    %482 = vector.broadcast %78 : f32 to vector<16x16xf32>
    %483 = arith.mulf %481, %482 : vector<16x16xf32>
    %484 = arith.addf %474, %483 : vector<16x16xf32>
    %485 = vector.broadcast %79 : f32 to vector<16x16xf32>
    %486 = arith.mulf %481, %485 : vector<16x16xf32>
    %487 = arith.addf %477, %486 : vector<16x16xf32>
    %488 = vector.broadcast %80 : f32 to vector<16x16xf32>
    %489 = arith.mulf %481, %488 : vector<16x16xf32>
    %490 = arith.addf %480, %489 : vector<16x16xf32>
    %491 = vector.extract_strided_slice %272 {offsets = [0, 1], sizes = [18, 16], strides = [1, 1]} : vector<18x18xf32> to vector<18x16xf32>
    %492 = vector.extract_strided_slice %491 {offsets = [0, 0], sizes = [16, 16], strides = [1, 1]} : vector<18x16xf32> to vector<16x16xf32>
    %493 = vector.broadcast %18 : f32 to vector<16x16xf32>
    %494 = arith.mulf %492, %493 : vector<16x16xf32>
    %495 = arith.addf %484, %494 : vector<16x16xf32>
    %496 = vector.broadcast %19 : f32 to vector<16x16xf32>
    %497 = arith.mulf %492, %496 : vector<16x16xf32>
    %498 = arith.addf %487, %497 : vector<16x16xf32>
    %499 = vector.broadcast %20 : f32 to vector<16x16xf32>
    %500 = arith.mulf %492, %499 : vector<16x16xf32>
    %501 = arith.addf %490, %500 : vector<16x16xf32>
    %502 = vector.extract_strided_slice %491 {offsets = [1, 0], sizes = [16, 16], strides = [1, 1]} : vector<18x16xf32> to vector<16x16xf32>
    %503 = vector.broadcast %54 : f32 to vector<16x16xf32>
    %504 = arith.mulf %502, %503 : vector<16x16xf32>
    %505 = arith.addf %495, %504 : vector<16x16xf32>
    %506 = vector.broadcast %55 : f32 to vector<16x16xf32>
    %507 = arith.mulf %502, %506 : vector<16x16xf32>
    %508 = arith.addf %498, %507 : vector<16x16xf32>
    %509 = vector.broadcast %56 : f32 to vector<16x16xf32>
    %510 = arith.mulf %502, %509 : vector<16x16xf32>
    %511 = arith.addf %501, %510 : vector<16x16xf32>
    %512 = vector.extract_strided_slice %491 {offsets = [2, 0], sizes = [16, 16], strides = [1, 1]} : vector<18x16xf32> to vector<16x16xf32>
    %513 = vector.broadcast %90 : f32 to vector<16x16xf32>
    %514 = arith.mulf %512, %513 : vector<16x16xf32>
    %515 = arith.addf %505, %514 : vector<16x16xf32>
    %516 = vector.broadcast %91 : f32 to vector<16x16xf32>
    %517 = arith.mulf %512, %516 : vector<16x16xf32>
    %518 = arith.addf %508, %517 : vector<16x16xf32>
    %519 = vector.broadcast %92 : f32 to vector<16x16xf32>
    %520 = arith.mulf %512, %519 : vector<16x16xf32>
    %521 = arith.addf %511, %520 : vector<16x16xf32>
    %522 = vector.extract_strided_slice %272 {offsets = [0, 2], sizes = [18, 16], strides = [1, 1]} : vector<18x18xf32> to vector<18x16xf32>
    %523 = vector.extract_strided_slice %522 {offsets = [0, 0], sizes = [16, 16], strides = [1, 1]} : vector<18x16xf32> to vector<16x16xf32>
    %524 = vector.broadcast %30 : f32 to vector<16x16xf32>
    %525 = arith.mulf %523, %524 : vector<16x16xf32>
    %526 = arith.addf %515, %525 : vector<16x16xf32>
    %527 = vector.broadcast %31 : f32 to vector<16x16xf32>
    %528 = arith.mulf %523, %527 : vector<16x16xf32>
    %529 = arith.addf %518, %528 : vector<16x16xf32>
    %530 = vector.broadcast %32 : f32 to vector<16x16xf32>
    %531 = arith.mulf %523, %530 : vector<16x16xf32>
    %532 = arith.addf %521, %531 : vector<16x16xf32>
    %533 = vector.extract_strided_slice %522 {offsets = [1, 0], sizes = [16, 16], strides = [1, 1]} : vector<18x16xf32> to vector<16x16xf32>
    %534 = vector.broadcast %66 : f32 to vector<16x16xf32>
    %535 = arith.mulf %533, %534 : vector<16x16xf32>
    %536 = arith.addf %526, %535 : vector<16x16xf32>
    %537 = vector.broadcast %67 : f32 to vector<16x16xf32>
    %538 = arith.mulf %533, %537 : vector<16x16xf32>
    %539 = arith.addf %529, %538 : vector<16x16xf32>
    %540 = vector.broadcast %68 : f32 to vector<16x16xf32>
    %541 = arith.mulf %533, %540 : vector<16x16xf32>
    %542 = arith.addf %532, %541 : vector<16x16xf32>
    %543 = vector.extract_strided_slice %522 {offsets = [2, 0], sizes = [16, 16], strides = [1, 1]} : vector<18x16xf32> to vector<16x16xf32>
    %544 = vector.broadcast %102 : f32 to vector<16x16xf32>
    %545 = arith.mulf %543, %544 : vector<16x16xf32>
    %546 = arith.addf %536, %545 : vector<16x16xf32>
    %547 = vector.broadcast %103 : f32 to vector<16x16xf32>
    %548 = arith.mulf %543, %547 : vector<16x16xf32>
    %549 = arith.addf %539, %548 : vector<16x16xf32>
    %550 = vector.broadcast %104 : f32 to vector<16x16xf32>
    %551 = arith.mulf %543, %550 : vector<16x16xf32>
    %552 = arith.addf %542, %551 : vector<16x16xf32>
    %553 = vector.extract_strided_slice %276 {offsets = [0, 0], sizes = [18, 16], strides = [1, 1]} : vector<18x18xf32> to vector<18x16xf32>
    %554 = vector.extract_strided_slice %553 {offsets = [0, 0], sizes = [16, 16], strides = [1, 1]} : vector<18x16xf32> to vector<16x16xf32>
    %555 = vector.broadcast %9 : f32 to vector<16x16xf32>
    %556 = arith.mulf %554, %555 : vector<16x16xf32>
    %557 = arith.addf %546, %556 : vector<16x16xf32>
    %558 = vector.broadcast %10 : f32 to vector<16x16xf32>
    %559 = arith.mulf %554, %558 : vector<16x16xf32>
    %560 = arith.addf %549, %559 : vector<16x16xf32>
    %561 = vector.broadcast %11 : f32 to vector<16x16xf32>
    %562 = arith.mulf %554, %561 : vector<16x16xf32>
    %563 = arith.addf %552, %562 : vector<16x16xf32>
    %564 = vector.extract_strided_slice %553 {offsets = [1, 0], sizes = [16, 16], strides = [1, 1]} : vector<18x16xf32> to vector<16x16xf32>
    %565 = vector.broadcast %45 : f32 to vector<16x16xf32>
    %566 = arith.mulf %564, %565 : vector<16x16xf32>
    %567 = arith.addf %557, %566 : vector<16x16xf32>
    %568 = vector.broadcast %46 : f32 to vector<16x16xf32>
    %569 = arith.mulf %564, %568 : vector<16x16xf32>
    %570 = arith.addf %560, %569 : vector<16x16xf32>
    %571 = vector.broadcast %47 : f32 to vector<16x16xf32>
    %572 = arith.mulf %564, %571 : vector<16x16xf32>
    %573 = arith.addf %563, %572 : vector<16x16xf32>
    %574 = vector.extract_strided_slice %553 {offsets = [2, 0], sizes = [16, 16], strides = [1, 1]} : vector<18x16xf32> to vector<16x16xf32>
    %575 = vector.broadcast %81 : f32 to vector<16x16xf32>
    %576 = arith.mulf %574, %575 : vector<16x16xf32>
    %577 = arith.addf %567, %576 : vector<16x16xf32>
    %578 = vector.broadcast %82 : f32 to vector<16x16xf32>
    %579 = arith.mulf %574, %578 : vector<16x16xf32>
    %580 = arith.addf %570, %579 : vector<16x16xf32>
    %581 = vector.broadcast %83 : f32 to vector<16x16xf32>
    %582 = arith.mulf %574, %581 : vector<16x16xf32>
    %583 = arith.addf %573, %582 : vector<16x16xf32>
    %584 = vector.extract_strided_slice %276 {offsets = [0, 1], sizes = [18, 16], strides = [1, 1]} : vector<18x18xf32> to vector<18x16xf32>
    %585 = vector.extract_strided_slice %584 {offsets = [0, 0], sizes = [16, 16], strides = [1, 1]} : vector<18x16xf32> to vector<16x16xf32>
    %586 = vector.broadcast %21 : f32 to vector<16x16xf32>
    %587 = arith.mulf %585, %586 : vector<16x16xf32>
    %588 = arith.addf %577, %587 : vector<16x16xf32>
    %589 = vector.broadcast %22 : f32 to vector<16x16xf32>
    %590 = arith.mulf %585, %589 : vector<16x16xf32>
    %591 = arith.addf %580, %590 : vector<16x16xf32>
    %592 = vector.broadcast %23 : f32 to vector<16x16xf32>
    %593 = arith.mulf %585, %592 : vector<16x16xf32>
    %594 = arith.addf %583, %593 : vector<16x16xf32>
    %595 = vector.extract_strided_slice %584 {offsets = [1, 0], sizes = [16, 16], strides = [1, 1]} : vector<18x16xf32> to vector<16x16xf32>
    %596 = vector.broadcast %57 : f32 to vector<16x16xf32>
    %597 = arith.mulf %595, %596 : vector<16x16xf32>
    %598 = arith.addf %588, %597 : vector<16x16xf32>
    %599 = vector.broadcast %58 : f32 to vector<16x16xf32>
    %600 = arith.mulf %595, %599 : vector<16x16xf32>
    %601 = arith.addf %591, %600 : vector<16x16xf32>
    %602 = vector.broadcast %59 : f32 to vector<16x16xf32>
    %603 = arith.mulf %595, %602 : vector<16x16xf32>
    %604 = arith.addf %594, %603 : vector<16x16xf32>
    %605 = vector.extract_strided_slice %584 {offsets = [2, 0], sizes = [16, 16], strides = [1, 1]} : vector<18x16xf32> to vector<16x16xf32>
    %606 = vector.broadcast %93 : f32 to vector<16x16xf32>
    %607 = arith.mulf %605, %606 : vector<16x16xf32>
    %608 = arith.addf %598, %607 : vector<16x16xf32>
    %609 = vector.broadcast %94 : f32 to vector<16x16xf32>
    %610 = arith.mulf %605, %609 : vector<16x16xf32>
    %611 = arith.addf %601, %610 : vector<16x16xf32>
    %612 = vector.broadcast %95 : f32 to vector<16x16xf32>
    %613 = arith.mulf %605, %612 : vector<16x16xf32>
    %614 = arith.addf %604, %613 : vector<16x16xf32>
    %615 = vector.extract_strided_slice %276 {offsets = [0, 2], sizes = [18, 16], strides = [1, 1]} : vector<18x18xf32> to vector<18x16xf32>
    %616 = vector.extract_strided_slice %615 {offsets = [0, 0], sizes = [16, 16], strides = [1, 1]} : vector<18x16xf32> to vector<16x16xf32>
    %617 = vector.broadcast %33 : f32 to vector<16x16xf32>
    %618 = arith.mulf %616, %617 : vector<16x16xf32>
    %619 = arith.addf %608, %618 : vector<16x16xf32>
    %620 = vector.broadcast %34 : f32 to vector<16x16xf32>
    %621 = arith.mulf %616, %620 : vector<16x16xf32>
    %622 = arith.addf %611, %621 : vector<16x16xf32>
    %623 = vector.broadcast %35 : f32 to vector<16x16xf32>
    %624 = arith.mulf %616, %623 : vector<16x16xf32>
    %625 = arith.addf %614, %624 : vector<16x16xf32>
    %626 = vector.extract_strided_slice %615 {offsets = [1, 0], sizes = [16, 16], strides = [1, 1]} : vector<18x16xf32> to vector<16x16xf32>
    %627 = vector.broadcast %69 : f32 to vector<16x16xf32>
    %628 = arith.mulf %626, %627 : vector<16x16xf32>
    %629 = arith.addf %619, %628 : vector<16x16xf32>
    %630 = vector.broadcast %70 : f32 to vector<16x16xf32>
    %631 = arith.mulf %626, %630 : vector<16x16xf32>
    %632 = arith.addf %622, %631 : vector<16x16xf32>
    %633 = vector.broadcast %71 : f32 to vector<16x16xf32>
    %634 = arith.mulf %626, %633 : vector<16x16xf32>
    %635 = arith.addf %625, %634 : vector<16x16xf32>
    %636 = vector.extract_strided_slice %615 {offsets = [2, 0], sizes = [16, 16], strides = [1, 1]} : vector<18x16xf32> to vector<16x16xf32>
    %637 = vector.broadcast %105 : f32 to vector<16x16xf32>
    %638 = arith.mulf %636, %637 : vector<16x16xf32>
    %639 = arith.addf %629, %638 : vector<16x16xf32>
    %640 = vector.broadcast %106 : f32 to vector<16x16xf32>
    %641 = arith.mulf %636, %640 : vector<16x16xf32>
    %642 = arith.addf %632, %641 : vector<16x16xf32>
    %643 = vector.broadcast %107 : f32 to vector<16x16xf32>
    %644 = arith.mulf %636, %643 : vector<16x16xf32>
    %645 = arith.addf %635, %644 : vector<16x16xf32>
    %c0_129 = arith.constant 0 : index
    %c0_130 = arith.constant 0 : index
    %c0_131 = arith.constant 0 : index
    %c0_132 = arith.constant 0 : index
    %646 = vector.load %arg5[%c0_129, %c0_130, %c0_131, %c0_132] : memref<1x3x16x16xf32, #tpu.memory_space<vmem>>, vector<1x1x16x16xf32>
    %647 = vector.shape_cast %646 : vector<1x1x16x16xf32> to vector<16x16xf32>
    %648 = vector.shape_cast %639 : vector<16x16xf32> to vector<1x1x16x16xf32>
    tpu.vector_store %arg5[%c0_129, %c0_130, %c0_131, %c0_132], %648 {strides = array<i32>} : memref<1x3x16x16xf32, #tpu.memory_space<vmem>>, vector<1x1x16x16xf32>,
    %c0_133 = arith.constant 0 : index
    %c1_134 = arith.constant 1 : index
    %c0_135 = arith.constant 0 : index
    %c0_136 = arith.constant 0 : index
    %649 = vector.load %arg5[%c0_133, %c1_134, %c0_135, %c0_136] : memref<1x3x16x16xf32, #tpu.memory_space<vmem>>, vector<1x1x16x16xf32>
    %650 = vector.shape_cast %649 : vector<1x1x16x16xf32> to vector<16x16xf32>
    %651 = vector.shape_cast %642 : vector<16x16xf32> to vector<1x1x16x16xf32>
    tpu.vector_store %arg5[%c0_133, %c1_134, %c0_135, %c0_136], %651 {strides = array<i32>} : memref<1x3x16x16xf32, #tpu.memory_space<vmem>>, vector<1x1x16x16xf32>,
    %c0_137 = arith.constant 0 : index
    %c2_138 = arith.constant 2 : index
    %c0_139 = arith.constant 0 : index
    %c0_140 = arith.constant 0 : index
    %652 = vector.load %arg5[%c0_137, %c2_138, %c0_139, %c0_140] : memref<1x3x16x16xf32, #tpu.memory_space<vmem>>, vector<1x1x16x16xf32>
    %653 = vector.shape_cast %652 : vector<1x1x16x16xf32> to vector<16x16xf32>
    %654 = vector.shape_cast %645 : vector<16x16xf32> to vector<1x1x16x16xf32>
    tpu.vector_store %arg5[%c0_137, %c2_138, %c0_139, %c0_140], %654 {strides = array<i32>} : memref<1x3x16x16xf32, #tpu.memory_space<vmem>>, vector<1x1x16x16xf32>,
    return
  }
  func.func @transform_0(%arg0: i32) -> (i32, i32, i32, i32) {
    %c0_i32 = arith.constant 0 : i32
    %c0_i32_0 = arith.constant 0 : i32
    %c0_i32_1 = arith.constant 0 : i32
    %c0_i32_2 = arith.constant 0 : i32
    return %arg0, %c0_i32, %c0_i32_0, %c0_i32_1 : i32, i32, i32, i32
  }
  func.func @transform_1(%arg0: i32) -> (i32, i32, i32) {
    %c0_i32 = arith.constant 0 : i32
    %c0_i32_0 = arith.constant 0 : i32
    %c0_i32_1 = arith.constant 0 : i32
    %c0_i32_2 = arith.constant 0 : i32
    return %c0_i32, %c0_i32_0, %c0_i32_1 : i32, i32, i32
  }
  func.func @transform_2(%arg0: i32) -> (i32, i32, i32) {
    %c0_i32 = arith.constant 0 : i32
    %c0_i32_0 = arith.constant 0 : i32
    %c0_i32_1 = arith.constant 0 : i32
    %c0_i32_2 = arith.constant 0 : i32
    return %c0_i32, %c0_i32_0, %c0_i32_1 : i32, i32, i32
  }
  func.func @transform_3(%arg0: i32) -> i32 {
    %c0_i32 = arith.constant 0 : i32
    %c0_i32_0 = arith.constant 0 : i32
    return %c0_i32 : i32
  }
  func.func @transform_4(%arg0: i32) -> (i32, i32, i32, i32) {
    %c0_i32 = arith.constant 0 : i32
    %c0_i32_0 = arith.constant 0 : i32
    %c0_i32_1 = arith.constant 0 : i32
    %c0_i32_2 = arith.constant 0 : i32
    return %arg0, %c0_i32, %c0_i32_0, %c0_i32_1 : i32, i32, i32, i32
  }
}

</mosaic_0001>

<bundles_post_ra>
// kernel: pconv_model_forward.1
= control target key start
LH: loop header
LB: loop body
LE: loop exit
PB: predicated region body
PF: predicated region fallthrough
CT: control target
= control target key end

     0   :  { %9 = vsyncpa [#allocation3], 0  ;;  %s3727_s15 = smov 0   ;;  %s5869_s0 = inlined_call_operand.vmem [shape: f32[2,3,20,20], index: 0, kind: input, shape index: {}]   ;;  %s5870_s1 = inlined_call_operand.vmem [shape: f32[3,20,20], index: 1, kind: input, shape index: {}]   ;;  %s5871_s2 = inlined_call_operand.vmem [shape: f32[36,18,18], index: 2, kind: input, shape index: {}]   ;;  %s5872_s3 = inlined_call_operand.vmem [shape: f32[108], index: 3, kind: input, shape index: {}]   ;;  %s5873_s4 = inlined_call_operand.vmem [shape: f32[2,3,16,16], index: 4, kind: output, shape index: {}]  }
   0x1 LB: > { %s3733_s16 = sadd.s32 4294967295, %s3695_s15   ;;  %p3408_p0 = scmp.ge.s32.totalorder %s3695_s15, 1  ;;  %s3695_s15 = sphi %s3727_s15, %s15_s15  }
   0x2   : > { %p135_p1 = scmp.lt.s32.totalorder %s3695_s15, 3  ;;  %s154_s19 = sshll.u32 %s5872_s3, 4  ;;  %s155_s19 = int_to_ptr.vmem [resolvable:$true] %s154_s19 }
   0x3   : > { %p3655_p3 = scmp.eq.s32.totalorder %s3733_s16, 0  ;;  %s3670_s21 = scalar_lea.vmem %s155_s19, 16 }
   0x4   : > { %p3740_p2 = pnand %p3408_p0, %p135_p1  ;;  %p3671_p6 = scmp.ne.s32.totalorder %s155_s19, %s3670_s21 }
   0x5   : > { %p3678_p10 = scmp.lt.s32.totalorder %s155_s19, %s155_s19  ;;  %p3679_p11 = scmp.lt.s32.totalorder %s3670_s21, %s3670_s21 }
   0x6   : > { %p3651_p4 = pneg %p3740_p2 }
   0x7   : > { %p3680_p12 = por %p3679_p11, %p3678_p10 }
   0x8   : > { %p3652_p5 = pnand %p3655_p3, %p3651_p4 }
   0xa   : > { %p3672_p7 = pneg %p3652_p5 }
   0xc   : > { %p3673_p8 = pnand %p3672_p7, %p3671_p6 }
   0xe   : > { %p3674_p9 = pneg %p3673_p8 }
  0x10   : > { %p3681_p13 = pnand %p3680_p12, %p3674_p9 }
  0x12   : > { %3684 = shalt.err (!%p3681_p13)
}
  0x13   : > { %s3697_s22 = smov [#allocation2]   ;;  %175 = sbr.rel (%p3740_p2) target bundleno = 2305 (0x901), region = 36 }
  0x14   : > { %3654 = dma.vmem_to_smem (!%p3652_p5), %s155_s19, 16, %s3697_s22, [#allocation3]  }
  0x18   : > { %3690 = dma.done.wait (%p3655_p3), [#allocation3], 16  }
  0x19   : > { %3692 = vsyncadd (%p3655_p3), [#allocation3], 4294967280 }
  0x1a   : > { %181 = sfence }
  0x1b   : > { %v3567_v0 = vld [vmem:[%s5871_s2 + $0x60] sm:$0xff]  ;;  %v3569_v1 = vld [vmem:[%s5871_s2 + $0x70] sm:$0x3]  ;;  %s3698_s27 = smov 1   ;;  %v3568_v2 = vld [vmem:[%s5871_s2 + $0x68] sm:$0xff]  ;;  %vm391_vm0 = vcmask 1040384  }
  0x1c   : > { %651 = vrot.lane.b32.xlu0 %v3567_v0, %s3698_s27  ;;  %655 = vrot.lane.b32.xlu1 %v3569_v1, %s3698_s27  ;;  %v3571_v3 = vld [vmem:[%s5871_s2 + $0x80] sm:$0xff]  ;;  %v3570_v4 = vld [vmem:[%s5871_s2 + $0x78] sm:$0xff]  ;;  %vm521_vm1 = vcmask 1041408   ;;  %p202_p0 = scmp.lt.s32.totalorder %s3733_s16, 1  ;;  %s3699_s19 = smov 127   ;;  %vm406_vm2 = vcmask 1046528  }
  0x1d   : > { %v3574_v5 = vld [vmem:[%s5871_s2 + $0x98] sm:$0xff]  ;;  %v3579_v6 = vld [vmem:[%s5871_s2 + $0x180] sm:$0xff]  ;;  %v3580_v7 = vld [vmem:[%s5871_s2 + $0x188] sm:$0xff]  ;;  %vm536_vm3 = vcmask 1045504   ;;  %s3700_s28 = smov 2   ;;  %s3701_s7 = smov 126  }
  0x1e   : > { %v3572_v8 = vld [vmem:[%s5871_s2 + $0x88] sm:$0x3]  ;;  %v3577_v9 = vld [vmem:[%s5871_s2 + $0xb0] sm:$0xff]  ;;  %v787_v10 = vrot.slane %v3579_v6, 7  ;;  %v788_v11 = vrot.slane %v3580_v7, 7  ;;  %v3582_v12 = vld [vmem:[%s5871_s2 + $0x198] sm:$0xff] }
  0x1f   : > { %v3583_v13 = vld [vmem:[%s5871_s2 + $0x1a0] sm:$0xff]  ;;  %v3573_v14 = vld [vmem:[%s5871_s2 + $0x90] sm:$0xff]  ;;  %v831_v16 = vrot.slane %v3582_v12, 7  ;;  %v3586_v19 = vld [vmem:[%s5871_s2 + $0x1b8] sm:$0xff]  ;;  %s6016_s16 = smov (!%p202_p0, %s3733_s16), 1  ;;  %s3486_s26 = sld [smem:[#allocation2 + $0x48]] }
  0x20   : > { %653 = vrot.lane.b32.xlu0 %v3568_v2, %s3698_s27  ;;  %687 = vrot.lane.b32.xlu1 %v3571_v3, %s3698_s27  ;;  %v789_v15 = vsel %vm391_vm0, %v787_v10, %v788_v11  ;;  %v832_v17 = vrot.slane %v3583_v13, 7  ;;  %v3585_v18 = vld [vmem:[%s5871_s2 + $0x1b0] sm:$0xff]  ;;  %v3575_v20 = vld [vmem:[%s5871_s2 + $0xa0] sm:$0x3]  ;;  %v876_v23 = vrot.slane %v3586_v19, 7  ;;  %s3645_s20 = smul.u32 72, %s6016_s16 }
  0x21   : > { %v875_v22 = vrot.slane %v3585_v18, 7  ;;  %v3588_v24 = vld [vmem:[%s5871_s2 + $0x1c8] sm:$0xff]  ;;  %v3589_v25 = vld [vmem:[%s5871_s2 + $0x1d0] sm:$0xff]  ;;  %v3591_v30 = vld [vmem:[%s5871_s2 + $0x2a0] sm:$0xff]  ;;  %s4464_s29 = sld [smem:[#allocation2]]  ;;  %vm3330_vm4 = vcmask 130048  }
  0x22   : > { %v833_v21 = vsel %vm391_vm0, %v831_v16, %v832_v17  ;;  %v3576_v26 = vld [vmem:[%s5871_s2 + $0xa8] sm:$0xff]  ;;  %v919_v28 = vrot.slane %v3588_v24, 7  ;;  %v920_v29 = vrot.slane %v3589_v25, 7  ;;  %v3578_v32 = vld [vmem:[%s5871_s2 + $0xb8] sm:$0x3]  ;;  %v963_v34 = vrot.slane %v3591_v30, 6  ;;  %s206_s23 = scalar_lea.vmem %s5869_s0, %s3645_s20 }
  0x23   : > { %v877_v27 = vsel %vm391_vm0, %v875_v22, %v876_v23  ;;  %v3592_v31 = vld [vmem:[%s5871_s2 + $0x2a8] sm:$0xff]  ;;  %v3581_v36 = vld [vmem:[%s5871_s2 + $0x190] sm:$0x3]  ;;  %v3594_v37 = vld [vmem:[%s5871_s2 + $0x2b8] sm:$0xff]  ;;  %s3451_s30 = sld [smem:[#allocation2 + $0x25]] }
  0x24   : > { %685 = vrot.lane.b32.xlu0 %v3570_v4, %s3698_s27  ;;  %721 = vrot.lane.b32.xlu1 %v3574_v5, %s3698_s27  ;;  %v921_v33 = vsel %vm391_vm0, %v919_v28, %v920_v29  ;;  %v964_v35 = vrot.slane %v3592_v31, 6  ;;  %v3595_v38 = vld [vmem:[%s5871_s2 + $0x2c0] sm:$0xff]  ;;  %v790_v39 = vrot.slane %v3581_v36, 7  ;;  %v1007_v41 = vrot.slane %v3594_v37, 6  ;;  %v3598_v43 = vld [vmem:[%s5871_s2 + $0x2d8] sm:$0xff]  ;;  %s3487_s5 = sld [smem:[#allocation2 + $0x49]] }
  0x25   : > { %v1008_v42 = vrot.slane %v3595_v38, 6  ;;  %v3597_v44 = vld [vmem:[%s5871_s2 + $0x2d0] sm:$0xff]  ;;  %v1052_v47 = vrot.slane %v3598_v43, 6  ;;  %v3584_v48 = vld [vmem:[%s5871_s2 + $0x1a8] sm:$0x3]  ;;  %v320_v4 = vld [vmem:[%s206_s23] sm:$0xff] }
  0x26   : > { %v965_v40 = vsel %vm521_vm1, %v963_v34, %v964_v35  ;;  %v791_v45 = vsel %vm391_vm0, %v788_v11, %v790_v39  ;;  %v1051_v49 = vrot.slane %v3597_v44, 6  ;;  %v834_v50 = vrot.slane %v3584_v48, 7  ;;  %v3587_v53 = vld [vmem:[%s5871_s2 + $0x1c0] sm:$0x3]  ;;  %v3590_v56 = vld [vmem:[%s5871_s2 + $0x1d8] sm:$0x3] }
  0x27   : > { %v1009_v46 = vsel %vm521_vm1, %v1007_v41, %v1008_v42  ;;  %v878_v54 = vrot.slane %v3587_v53, 7  ;;  %v922_v57 = vrot.slane %v3590_v56, 7  ;;  %v3593_v59 = vld [vmem:[%s5871_s2 + $0x2b0] sm:$0x3]  ;;  %v3596_v62 = vld [vmem:[%s5871_s2 + $0x2c8] sm:$0x3] }
  0x28   : > { %689 = vrot.lane.b32.xlu0 %v3572_v8, %s3698_s27  ;;  %755 = vrot.lane.b32.xlu1 %v3577_v9, %s3698_s27  ;;  %v1053_v51 = vsel %vm521_vm1, %v1051_v49, %v1052_v47  ;;  %v835_v52 = vsel %vm391_vm0, %v832_v17, %v834_v50  ;;  %v966_v60 = vrot.slane %v3593_v59, 6  ;;  %v1010_v63 = vrot.slane %v3596_v62, 6  ;;  %v3599_v1 = vld [vmem:[%s5871_s2 + $0x2e0] sm:$0x3]  ;;  %v3522_v6 = vld [vmem:[%s206_s23 + $0x18] sm:$0xff]  ;;  %s4471_s6 = sld [smem:[#allocation2 + $0x1]] }
  0x29   : > { %v879_v55 = vsel %vm391_vm0, %v876_v23, %v878_v54  ;;  %v923_v58 = vsel %vm391_vm0, %v920_v29, %v922_v57  ;;  %v1054_v2 = vrot.slane %v3599_v1, 6  ;;  %v323_v5 = vld [vmem:[%s5870_s1] sm:$0xff]  ;;  %v3525_v7 = vld [vmem:[%s5870_s1 + $0x18] sm:$0xff]  ;;  %v322_v8 = vld [vmem:[%s206_s23 + $0x10] sm:$0xf]  ;;  %s4474_s8 = sld [smem:[#allocation2 + $0x2]] }
  0x2a   : > { %v967_v61 = vsel %vm521_vm1, %v964_v35, %v966_v60  ;;  %v1011_v0 = vsel %vm521_vm1, %v1008_v42, %v1010_v63  ;;  %v325_v9 = vld [vmem:[%s5870_s1 + $0x10] sm:$0xf]  ;;  %v3527_v11 = vld [vmem:[%s5870_s1 + $0x28] sm:$0xf]  ;;  %v326_v12 = vmul.f32 %v323_v5, %v320_v4  ;;  %v337_v13 = vmul.f32 %v3525_v7, %v3522_v6  ;;  %v3523_v18 = vld [vmem:[%s206_s23 + $0x20] sm:$0xff]  ;;  %s3452_s9 = sld [smem:[#allocation2 + $0x26]] }
  0x2b   : > { %v1055_v3 = vsel %vm521_vm1, %v1052_v47, %v1054_v2  ;;  %v324_v17 = vld [vmem:[%s5870_s1 + $0x8] sm:$0xff]  ;;  %v3526_v19 = vld [vmem:[%s5870_s1 + $0x20] sm:$0xff]  ;;  %v3532_v29 = vld [vmem:[%s5870_s1 + $0x38] sm:$0xff]  ;;  %s3488_s10 = sld [smem:[#allocation2 + $0x4a]] }
  0x2c   : > { %719 = vrot.lane.b32.xlu0 %v3573_v14, %s3698_s27  ;;  %794 = vrot.lane.b32.xlu1 %v789_v15, %s3698_s27  ;;  %v3528_v14 = vld [vmem:[%s206_s23 + $0x30] sm:$0xff]  ;;  %v3533_v23 = vld [vmem:[%s5870_s1 + $0x40] sm:$0xf]  ;;  %v340_v24 = vadd.f32 %v337_v13, %v326_v12  ;;  %s3453_s14 = sld [smem:[#allocation2 + $0x27]] }
  0x2d   : > { %v3531_v15 = vld [vmem:[%s5870_s1 + $0x30] sm:$0xff]  ;;  %s3489_s17 = sld [smem:[#allocation2 + $0x4b]] }
  0x2e   : > { %v351_v25 = vmul.f32 %v3531_v15, %v3528_v14  ;;  %s3454_s18 = sld [smem:[#allocation2 + $0x28]] }
  0x2f   : > { %s3490_s20 = sld [smem:[#allocation2 + $0x4c]] }
  0x30   : > { %723 = vrot.lane.b32.xlu0 %v3575_v20, %s3698_s27  ;;  %838 = vrot.lane.b32.xlu1 %v833_v21, %s3698_s27  ;;  %v328_v20 = vmul.f32 %v325_v9, %v322_v8  ;;  %s3455_s21 = sld [smem:[#allocation2 + $0x29]] }
  0x31   : > { %s3491_s22 = sld [smem:[#allocation2 + $0x4d]] }
  0x32   : > { %s3498_s24 = sld [smem:[#allocation2 + $0x54]] }
  0x33   : > { %s4761_s25 = sld [smem:[#allocation2 + $0x55]] }
  0x34   : > { %753 = vrot.lane.b32.xlu0 %v3576_v26, %s3698_s27  ;;  %882 = vrot.lane.b32.xlu1 %v877_v27, %s3698_s27  ;;  %v338_v27 = vmul.f32 %v3526_v19, %v3523_v18  ;;  %s3474_s11 = sld [smem:[#allocation2 + $0x3c]] }
  0x35   : > { %s4947_s12 = sld [smem:[#allocation2 + $0x1a]] }
  0x36   : > { %s3475_s13 = sld [smem:[#allocation2 + $0x3d]] }
  0x38   : > { %757 = vrot.lane.b32.xlu0 %v3578_v32, %s3698_s27  ;;  %926 = vrot.lane.b32.xlu1 %v921_v33, %s3698_s27  ;;  %v3936_v32 = vadd.f32 %v351_v25, %v340_v24 }
  0x3c   : > { %792 = vrot.lane.b32.xlu0 %v787_v10, %s3698_s27  ;;  %970 = vrot.lane.b32.xlu1 %v965_v40, %s3698_s27  ;;  %v3524_v10 = vld [vmem:[%s206_s23 + $0x28] sm:$0xf] }
  0x3d   : > { %v339_v21 = vmul.f32 %v3527_v11, %v3524_v10 }
  0x3f   : > { %v342_v30 = vadd.f32 %v339_v21, %v328_v20 }
  0x40   : > { %796 = vrot.lane.b32.xlu0 %v791_v45, %s3698_s27  ;;  %1014 = vrot.lane.b32.xlu1 %v1009_v46, %s3698_s27 }
  0x44   : > { %836 = vrot.lane.b32.xlu0 %v831_v16, %s3698_s27  ;;  %1058 = vrot.lane.b32.xlu1 %v1053_v51, %s3698_s27  ;;  %v321_v16 = vld [vmem:[%s206_s23 + $0x8] sm:$0xff] }
  0x45   : > { %v327_v26 = vmul.f32 %v324_v17, %v321_v16 }
  0x47   : > { %v341_v33 = vadd.f32 %v338_v27, %v327_v26 }
  0x48   : > { %840 = vrot.lane.b32.xlu0 %v835_v52, %s3698_s27 }
  0x4c   : > { %880 = vrot.lane.b32.xlu0 %v875_v22, %s3698_s27  ;;  %v3530_v22 = vld [vmem:[%s206_s23 + $0x40] sm:$0xf] }
  0x4d   : > { %v353_v31 = vmul.f32 %v3533_v23, %v3530_v22 }
  0x4f   : > { %v3938_v35 = vadd.f32 %v353_v31, %v342_v30 }
  0x50   : > { %884 = vrot.lane.b32.xlu0 %v879_v55, %s3698_s27 }
  0x54   : > { %924 = vrot.lane.b32.xlu0 %v919_v28, %s3698_s27  ;;  %v3529_v28 = vld [vmem:[%s206_s23 + $0x38] sm:$0xff]  ;;  %s3464_s23 = sld [smem:[#allocation2 + $0x32]] }
  0x58   : > { %928 = vrot.lane.b32.xlu0 %v923_v58, %s3698_s27 }
  0x5c   : > { %968 = vrot.lane.b32.xlu0 %v963_v34, %s3698_s27  ;;  %v352_v34 = vmul.f32 %v3532_v29, %v3529_v28 }
  0x5e   : > { %v3941_v39 = vadd.f32 %v352_v34, %v341_v33 }
  0x60   : > { %972 = vrot.lane.b32.xlu0 %v967_v61, %s3698_s27 }
  0x64   : > { %1012 = vrot.lane.b32.xlu0 %v1007_v41, %s3698_s27 }
  0x68   : > { %1016 = vrot.lane.b32.xlu0 %v1011_v0, %s3698_s27 }
  0x6c   : > { %1056 = vrot.lane.b32.xlu0 %v1051_v49, %s3698_s27 }
  0x70   : > { %1060 = vrot.lane.b32.xlu0 %v1055_v3, %s3698_s27 }
  0x8e   : > { %v652_v36 = vpop.permute.xlu0 %651  ;;  %v656_v37 = vpop.permute.xlu1 %655 }
  0x8f   : > { %v660_v38 = vmul.f32 %v652_v36, %v3936_v32  ;;  %v662_v40 = vmul.f32 %v656_v37, %v3938_v35 }
  0x91   : > { %666 = vrot.lane.b32.xlu1 %v660_v38, %s3699_s19 }
  0x92   : > { %v654_v41 = vpop.permute.xlu0 %653  ;;  %v688_v42 = vpop.permute.xlu1 %687 }
  0x93   : > { %v661_v43 = vmul.f32 %v654_v41, %v3941_v39  ;;  %v695_v44 = vmul.f32 %v688_v42, %v3941_v39 }
  0x95   : > { %668 = vrot.lane.b32.xlu0 %v661_v43, %s3699_s19  ;;  %670 = vrot.lane.b32.xlu1 %v662_v40, %s3699_s19 }
  0x96   : > { %v686_v45 = vpop.permute.xlu0 %685  ;;  %v722_v46 = vpop.permute.xlu1 %721 }
  0x97   : > { %v694_v47 = vmul.f32 %v686_v45, %v3936_v32  ;;  %v729_v48 = vmul.f32 %v722_v46, %v3941_v39 }
  0x99   : > { %700 = vrot.lane.b32.xlu1 %v694_v47, %s3699_s19  ;;  %702 = vrot.lane.b32.xlu0 %v695_v44, %s3699_s19 }
  0x9a   : > { %v690_v49 = vpop.permute.xlu0 %689  ;;  %v756_v51 = vpop.permute.xlu1 %755 }
  0x9b   : > { %v696_v50 = vmul.f32 %v690_v49, %v3938_v35  ;;  %v763_v52 = vmul.f32 %v756_v51, %v3941_v39 }
  0x9d   : > { %704 = vrot.lane.b32.xlu1 %v696_v50, %s3699_s19  ;;  %736 = vrot.lane.b32.xlu0 %v729_v48, %s3699_s19 }
  0x9e   : > { %v720_v53 = vpop.permute.xlu0 %719  ;;  %v795_v62 = vpop.permute.xlu1 %794 }
  0x9f   : > { %v728_v54 = vmul.f32 %v720_v53, %v3936_v32  ;;  %v3967_v63 = vmul.f32 %v795_v62, %v3941_v39 }
  0xa1   : > { %734 = vrot.lane.b32.xlu1 %v728_v54, %s3699_s19  ;;  %770 = vrot.lane.b32.xlu0 %v763_v52, %s3699_s19  ;;  %v808_v2 = vrot.slane %v3967_v63, 1  ;;  %v3601_v63 = vld [vmem:[%s5871_s2 + $0x2f0] sm:$0xff] }
  0xa2   : > { %v724_v55 = vpop.permute.xlu0 %723  ;;  %v839_v5 = vpop.permute.xlu1 %838 }
  0xa3   : > { %v730_v56 = vmul.f32 %v724_v55, %v3938_v35  ;;  %v3977_v7 = vmul.f32 %v839_v5, %v3941_v39  ;;  %v1096_v5 = vrot.slane %v3601_v63, 6 }
  0xa5   : > { %738 = vrot.lane.b32.xlu1 %v730_v56, %s3699_s19  ;;  %v852_v10 = vrot.slane %v3977_v7, 1 }
  0xa6   : > { %v754_v57 = vpop.permute.xlu0 %753  ;;  %v883_v13 = vpop.permute.xlu1 %882 }
  0xa7   : > { %v762_v58 = vmul.f32 %v754_v57, %v3936_v32  ;;  %v3987_v15 = vmul.f32 %v883_v13, %v3941_v39 }
  0xa9   : > { %768 = vrot.lane.b32.xlu1 %v762_v58, %s3699_s19  ;;  %v896_v18 = vrot.slane %v3987_v15, 1 }
  0xaa   : > { %v758_v59 = vpop.permute.xlu0 %757  ;;  %v927_v21 = vpop.permute.xlu1 %926 }
  0xab   : > { %v764_v60 = vmul.f32 %v758_v59, %v3938_v35  ;;  %v3997_v23 = vmul.f32 %v927_v21, %v3941_v39 }
  0xad   : > { %772 = vrot.lane.b32.xlu1 %v764_v60, %s3699_s19  ;;  %v940_v26 = vrot.slane %v3997_v23, 1 }
  0xae   : > { %v793_v61 = vpop.permute.xlu0 %792  ;;  %v971_v29 = vpop.permute.xlu1 %970 }
  0xaf   : > { %v978_v31 = vmul.f32 %v971_v29, %v3941_v39  ;;  %v801_v43 = vmul.f32 %v793_v61, %v3936_v32  ;;  %v3600_v61 = vld [vmem:[%s5871_s2 + $0x2e8] sm:$0xff] }
  0xb1   : > { %v984_v36 = vrot.slane %v978_v31, 2  ;;  %v807_v49 = vrot.slane %v801_v43, 1 }
  0xb2   : > { %v797_v0 = vpop.permute.xlu0 %796  ;;  %v1015_v40 = vpop.permute.xlu1 %1014 }
  0xb3   : > { %v803_v1 = vmul.f32 %v797_v0, %v3938_v35  ;;  %v1022_v42 = vmul.f32 %v1015_v40, %v3941_v39  ;;  %v809_v57 = vsel %vm406_vm2, %v807_v49, %v808_v2 }
  0xb5   : > { %v810_v3 = vrot.slane %v803_v1, 1  ;;  %v1028_v47 = vrot.slane %v1022_v42, 2 }
  0xb6   : > { %v837_v4 = vpop.permute.xlu0 %836  ;;  %v1059_v46 = vpop.permute.xlu1 %1058 }
  0xb7   : > { %816 = vrot.lane.b32.xlu1 %v810_v3, %s3699_s19  ;;  %v811_v6 = vsel %vm406_vm2, %v808_v2, %v810_v3  ;;  %v845_v50 = vmul.f32 %v837_v4, %v3936_v32  ;;  %v1066_v53 = vmul.f32 %v1059_v46, %v3941_v39  ;;  %v3602_v2 = vld [vmem:[%s5871_s2 + $0x2f8] sm:$0x3]  ;;  %v1095_v4 = vrot.slane %v3600_v61, 6 }
  0xb8   : > { %814 = vrot.lane.b32.xlu0 %v811_v6, %s3699_s19  ;;  %v1098_v6 = vrot.slane %v3602_v2, 6 }
  0xb9   : > { %v851_v54 = vrot.slane %v845_v50, 1  ;;  %v1072_v59 = vrot.slane %v1066_v53, 2 }
  0xba   : > { %v841_v8 = vpop.permute.xlu0 %840 }
  0xbb   : > { %v847_v9 = vmul.f32 %v841_v8, %v3938_v35  ;;  %v853_v1 = vsel %vm406_vm2, %v851_v54, %v852_v10 }
  0xbd   : > { %v854_v11 = vrot.slane %v847_v9, 1 }
  0xbe   : > { %v881_v12 = vpop.permute.xlu0 %880 }
  0xbf   : > { %860 = vrot.lane.b32.xlu1 %v854_v11, %s3699_s19  ;;  %v855_v14 = vsel %vm406_vm2, %v852_v10, %v854_v11  ;;  %v889_v55 = vmul.f32 %v881_v12, %v3936_v32  ;;  %v1099_v10 = vsel %vm521_vm1, %v1096_v5, %v1098_v6  ;;  %v3604_v6 = vld [vmem:[%s5871_s2 + $0xc8] sm:$0xff] }
  0xc0   : > { %858 = vrot.lane.b32.xlu0 %v855_v14, %s3699_s19 }
  0xc1   : > { %v895_v62 = vrot.slane %v889_v55, 1 }
  0xc2   : > { %v885_v16 = vpop.permute.xlu0 %884 }
  0xc3   : > { %v891_v17 = vmul.f32 %v885_v16, %v3938_v35  ;;  %v897_v9 = vsel %vm406_vm2, %v895_v62, %v896_v18 }
  0xc5   : > { %v898_v19 = vrot.slane %v891_v17, 1 }
  0xc6   : > { %v925_v20 = vpop.permute.xlu0 %924 }
  0xc7   : > { %904 = vrot.lane.b32.xlu1 %v898_v19, %s3699_s19  ;;  %v899_v22 = vsel %vm406_vm2, %v896_v18, %v898_v19  ;;  %v933_v0 = vmul.f32 %v925_v20, %v3936_v32  ;;  %v1097_v20 = vsel %vm521_vm1, %v1095_v4, %v1096_v5  ;;  %v3605_v5 = vld [vmem:[%s5871_s2 + $0xd0] sm:$0x3] }
  0xc8   : > { %902 = vrot.lane.b32.xlu0 %v899_v22, %s3699_s19 }
  0xc9   : > { %v939_v7 = vrot.slane %v933_v0, 1 }
  0xca   : > { %v929_v24 = vpop.permute.xlu0 %928 }
  0xcb   : > { %v935_v25 = vmul.f32 %v929_v24, %v3938_v35  ;;  %v941_v13 = vsel %vm406_vm2, %v939_v7, %v940_v26 }
  0xcd   : > { %v942_v27 = vrot.slane %v935_v25, 1 }
  0xce   : > { %v969_v28 = vpop.permute.xlu0 %968 }
  0xcf   : > { %948 = vrot.lane.b32.xlu1 %v942_v27, %s3699_s19  ;;  %v943_v30 = vsel %vm406_vm2, %v940_v26, %v942_v27  ;;  %v977_v8 = vmul.f32 %v969_v28, %v3936_v32 }
  0xd0   : > { %946 = vrot.lane.b32.xlu0 %v943_v30, %s3699_s19 }
  0xd1   : > { %v983_v11 = vrot.slane %v977_v8, 2 }
  0xd2   : > { %v973_v33 = vpop.permute.xlu0 %972 }
  0xd3   : > { %v979_v34 = vmul.f32 %v973_v33, %v3938_v35  ;;  %v985_v16 = vsel %vm536_vm3, %v983_v11, %v984_v36 }
  0xd5   : > { %v986_v37 = vrot.slane %v979_v34, 2 }
  0xd6   : > { %v1013_v38 = vpop.permute.xlu0 %1012 }
  0xd7   : > { %992 = vrot.lane.b32.xlu1 %v986_v37, %s3699_s19  ;;  %v987_v41 = vsel %vm536_vm3, %v984_v36, %v986_v37  ;;  %v1021_v12 = vmul.f32 %v1013_v38, %v3936_v32 }
  0xd8   : > { %990 = vrot.lane.b32.xlu0 %v987_v41, %s3699_s19 }
  0xd9   : > { %v1027_v15 = vrot.slane %v1021_v12, 2 }
  0xda   : > { %v1017_v44 = vpop.permute.xlu0 %1016 }
  0xdb   : > { %v1023_v45 = vmul.f32 %v1017_v44, %v3938_v35  ;;  %v1029_v18 = vsel %vm536_vm3, %v1027_v15, %v1028_v47 }
  0xdd   : > { %v1030_v48 = vrot.slane %v1023_v45, 2 }
  0xde   : > { %v1057_v51 = vpop.permute.xlu0 %1056 }
  0xdf   : > { %1036 = vrot.lane.b32.xlu1 %v1030_v48, %s3699_s19  ;;  %v1031_v52 = vsel %vm536_vm3, %v1028_v47, %v1030_v48  ;;  %v1065_v14 = vmul.f32 %v1057_v51, %v3936_v32 }
  0xe0   : > { %1034 = vrot.lane.b32.xlu0 %v1031_v52, %s3699_s19 }
  0xe1   : > { %v1071_v17 = vrot.slane %v1065_v14, 2 }
  0xe2   : > { %v1061_v56 = vpop.permute.xlu0 %1060 }
  0xe3   : > { %v1067_v58 = vmul.f32 %v1061_v56, %v3938_v35  ;;  %812 = vrot.lane.b32.xlu1 %v809_v57, %s3699_s19  ;;  %v1073_v19 = vsel %vm536_vm3, %v1071_v17, %v1072_v59  ;;  %v3606_v17 = vld [vmem:[%s5871_s2 + $0xd8] sm:$0xff] }
  0xe5   : > { %v1074_v60 = vrot.slane %v1067_v58, 2 }
  0xe7   : > { %856 = vrot.lane.b32.xlu1 %v853_v1, %s3699_s19  ;;  %v1075_v3 = vsel %vm536_vm3, %v1072_v59, %v1074_v60 }
  0xe8   : > { %1078 = vrot.lane.b32.xlu0 %v1075_v3, %s3699_s19 }
  0xeb   : > { %900 = vrot.lane.b32.xlu1 %v897_v9, %s3699_s19 }
  0xec   : > { %1100 = vrot.lane.b32.xlu0 %v1095_v4, %s3698_s27  ;;  %v3603_v4 = vld [vmem:[%s5871_s2 + $0xc0] sm:$0xff] }
  0xef   : > { %944 = vrot.lane.b32.xlu1 %v941_v13, %s3699_s19 }
  0xf0   : > { %1104 = vrot.lane.b32.xlu0 %v1099_v10, %s3698_s27 }
  0xf3   : > { %988 = vrot.lane.b32.xlu1 %v985_v16, %s3699_s19  ;;  %v3607_v16 = vld [vmem:[%s5871_s2 + $0xe0] sm:$0xff] }
  0xf7   : > { %1032 = vrot.lane.b32.xlu1 %v1029_v18, %s3699_s19  ;;  %v3608_v18 = vld [vmem:[%s5871_s2 + $0xe8] sm:$0x3] }
  0xfb   : > { %1076 = vrot.lane.b32.xlu1 %v1073_v19, %s3699_s19 }
  0xff   : > { %1080 = vrot.lane.b32.xlu1 %v1074_v60, %s3699_s19 }
 0x103   : > { %1102 = vrot.lane.b32.xlu1 %v1097_v20, %s3698_s27  ;;  %v4060_v21 = vpop.permute.xlu1 %666  ;;  %s3450_s27 = sld [smem:[#allocation2 + $0x24]] }
 0x107   : > { %v4062_v22 = vpop.permute.xlu1 %670  ;;  %v4074_v28 = vpop.permute.xlu0 %668 }
 0x10b   : > { %v4064_v23 = vpop.permute.xlu1 %700  ;;  %v4078_v30 = vpop.permute.xlu0 %702 }
 0x10f   : > { %v4066_v24 = vpop.permute.xlu1 %704  ;;  %v4082_v33 = vpop.permute.xlu0 %736 }
 0x113   : > { %v4068_v25 = vpop.permute.xlu1 %734  ;;  %v4088_v37 = vpop.permute.xlu0 %770 }
 0x114   : > { %5875 = vst [vmem:[#allocation5_spill] sm:$0xff] %v4068_v25  ;;  %5880 = vst [vmem:[#allocation10_spill] sm:$0xff] %v4088_v37 }
 0x117   : > { %v4070_v26 = vpop.permute.xlu1 %738 }
 0x118   : > { %5876 = vst [vmem:[#allocation6_spill] sm:$0xff] %v4070_v26 }
 0x11b   : > { %v4072_v27 = vpop.permute.xlu1 %768 }
 0x11c   : > { %5877 = vst [vmem:[#allocation7_spill] sm:$0xff] %v4072_v27 }
 0x11f   : > { %v4076_v29 = vpop.permute.xlu1 %772 }
 0x120   : > { %5878 = vst [vmem:[#allocation8_spill] sm:$0xff] %v4076_v29 }
 0x129   : > { %v4080_v31 = vpop.permute.xlu1 %816 }
 0x12a   : > { %v4092_v40 = vpop.permute.xlu0 %814 }
 0x131   : > { %v4084_v34 = vpop.permute.xlu1 %860 }
 0x132   : > { %v4096_v42 = vpop.permute.xlu0 %858 }
 0x139   : > { %v4086_v36 = vpop.permute.xlu1 %904 }
 0x13a   : > { %5879 = vst [vmem:[#allocation9_spill] sm:$0xff] %v4086_v36  ;;  %v4100_v44 = vpop.permute.xlu0 %902 }
 0x13b   : > { %5882 = vst [vmem:[#allocation12_spill] sm:$0xff] %v4100_v44 }
 0x141   : > { %v4090_v38 = vpop.permute.xlu1 %948 }
 0x142   : > { %5881 = vst [vmem:[#allocation11_spill] sm:$0xff] %v4090_v38  ;;  %v4104_v46 = vpop.permute.xlu0 %946 }
 0x143   : > { %5883 = vst [vmem:[#allocation13_spill] sm:$0xff] %v4104_v46 }
 0x149   : > { %v4094_v41 = vpop.permute.xlu1 %992 }
 0x14a   : > { %v4108_v48 = vpop.permute.xlu0 %990 }
 0x151   : > { %v4098_v43 = vpop.permute.xlu1 %1036 }
 0x152   : > { %v4112_v50 = vpop.permute.xlu0 %1034 }
 0x155   : > { %v4102_v45 = vpop.permute.xlu1 %812 }
 0x159   : > { %v4106_v47 = vpop.permute.xlu1 %856 }
 0x15a   : > { %v4116_v52 = vpop.permute.xlu0 %1078 }
 0x15b   : > { %5886 = vst [vmem:[#allocation16_spill] sm:$0xff] %v4116_v52 }
 0x15d   : > { %v4110_v49 = vpop.permute.xlu1 %900 }
 0x15e   : > { %5884 = vst [vmem:[#allocation14_spill] sm:$0xff] %v4110_v49  ;;  %v1101_v55 = vpop.permute.xlu0 %1100 }
 0x15f   : > { %v1109_v59 = vmul.f32 %v1101_v55, %v3936_v32 }
 0x161   : > { %v4114_v51 = vpop.permute.xlu1 %944  ;;  %v1115_v62 = vrot.slane %v1109_v59, 2 }
 0x162   : > { %5885 = vst [vmem:[#allocation15_spill] sm:$0xff] %v4114_v51  ;;  %v1105_v57 = vpop.permute.xlu0 %1104  ;;  %v3628_v51 = vld [vmem:[%s5871_s2 + $0x308] sm:$0xff] }
 0x163   : > { %v1111_v60 = vmul.f32 %v1105_v57, %v3938_v35 }
 0x165   : > { %v4118_v53 = vpop.permute.xlu1 %988  ;;  %v1118_v0 = vrot.slane %v1111_v60, 2 }
 0x169   : > { %v4120_v54 = vpop.permute.xlu1 %1032 }
 0x16d   : > { %v4122_v56 = vpop.permute.xlu1 %1076 }
 0x16e   : > { %5887 = vst [vmem:[#allocation17_spill] sm:$0xff] %v4122_v56 }
 0x171   : > { %v4124_v58 = vpop.permute.xlu1 %1080 }
 0x172   : > { %5888 = vst [vmem:[#allocation18_spill] sm:$0xff] %v4124_v58 }
 0x175   : > { %v1103_v61 = vpop.permute.xlu1 %1102 }
 0x176   : > { %v1110_v1 = vmul.f32 %v1103_v61, %v3941_v39 }
 0x178   : > { %v1116_v63 = vrot.slane %v1110_v1, 2 }
 0x17a   : > { %v1119_v2 = vsel %vm536_vm3, %v1116_v63, %v1118_v0  ;;  %v1117_v3 = vsel %vm536_vm3, %v1115_v62, %v1116_v63  ;;  %v3610_v63 = vld [vmem:[%s5871_s2 + $0xf8] sm:$0xff] }
 0x17b   : > { %1122 = vrot.lane.b32.xlu0 %v1119_v2, %s3699_s19  ;;  %1120 = vrot.lane.b32.xlu1 %v1117_v3, %s3699_s19  ;;  %v3611_v2 = vld [vmem:[%s5871_s2 + $0x100] sm:$0x3] }
 0x17f   : > { %1139 = vrot.lane.b32.xlu0 %v3603_v4, %s3700_s28  ;;  %1124 = vrot.lane.b32.xlu1 %v1118_v0, %s3699_s19  ;;  %v3609_v0 = vld [vmem:[%s5871_s2 + $0xf0] sm:$0xff] }
 0x183   : > { %1143 = vrot.lane.b32.xlu0 %v3605_v5, %s3700_s28  ;;  %1141 = vrot.lane.b32.xlu1 %v3604_v6, %s3700_s28 }
 0x1ed   : > { %v4146_v7 = vpop.permute.xlu0 %1122  ;;  %v4148_v8 = vpop.permute.xlu1 %1120 }
 0x1ee   : > { %5889 = vst [vmem:[#allocation19_spill] sm:$0xff] %v4146_v7  ;;  %5890 = vst [vmem:[#allocation20_spill] sm:$0xff] %v4148_v8 }
 0x1f1   : > { %v1140_v9 = vpop.permute.xlu0 %1139  ;;  %v4150_v10 = vpop.permute.xlu1 %1124 }
 0x1f2   : > { %5891 = vst [vmem:[#allocation21_spill] sm:$0xff] %v4150_v10  ;;  %v1148_v11 = vmul.f32 %v1140_v9, %v3936_v32  ;;  %v3625_v10 = vld [vmem:[%s5871_s2 + $0x230] sm:$0xff] }
 0x1f4   : > { %1154 = vrot.lane.b32.xlu1 %v1148_v11, %s3701_s7 }
 0x1f5   : > { %v1144_v12 = vpop.permute.xlu0 %1143  ;;  %v1142_v13 = vpop.permute.xlu1 %1141 }
 0x1f6   : > { %v1150_v14 = vmul.f32 %v1144_v12, %v3938_v35  ;;  %v1149_v15 = vmul.f32 %v1142_v13, %v3941_v39 }
 0x1f8   : > { %1158 = vrot.lane.b32.xlu1 %v1150_v14, %s3701_s7  ;;  %1156 = vrot.lane.b32.xlu0 %v1149_v15, %s3701_s7  ;;  %v3613_v15 = vld [vmem:[%s5871_s2 + $0x110] sm:$0xff] }
 0x1fc   : > { %1175 = vrot.lane.b32.xlu1 %v3607_v16, %s3700_s28  ;;  %1173 = vrot.lane.b32.xlu0 %v3606_v17, %s3700_s28  ;;  %v3612_v16 = vld [vmem:[%s5871_s2 + $0x108] sm:$0xff]  ;;  %v3614_v17 = vld [vmem:[%s5871_s2 + $0x118] sm:$0x3] }
 0x200   : > { %1177 = vrot.lane.b32.xlu0 %v3608_v18, %s3700_s28 }
 0x266   : > { %v4170_v19 = vpop.permute.xlu1 %1154 }
 0x26a   : > { %v4172_v20 = vpop.permute.xlu0 %1156  ;;  %v4174_v55 = vpop.permute.xlu1 %1158 }
 0x26e   : > { %v1174_v57 = vpop.permute.xlu0 %1173  ;;  %v1176_v59 = vpop.permute.xlu1 %1175 }
 0x26f   : > { %v1182_v60 = vmul.f32 %v1174_v57, %v3936_v32  ;;  %v1183_v61 = vmul.f32 %v1176_v59, %v3941_v39 }
 0x271   : > { %1188 = vrot.lane.b32.xlu1 %v1182_v60, %s3701_s7  ;;  %1190 = vrot.lane.b32.xlu0 %v1183_v61, %s3701_s7 }
 0x272   : > { %v1178_v62 = vpop.permute.xlu0 %1177 }
 0x273   : > { %v1184_v1 = vmul.f32 %v1178_v62, %v3938_v35  ;;  %v3615_v62 = vld [vmem:[%s5871_s2 + $0x1e0] sm:$0xff] }
 0x275   : > { %1192 = vrot.lane.b32.xlu1 %v1184_v1, %s3701_s7  ;;  %1207 = vrot.lane.b32.xlu0 %v3609_v0, %s3700_s28 }
 0x279   : > { %1209 = vrot.lane.b32.xlu1 %v3610_v63, %s3700_s28  ;;  %1211 = vrot.lane.b32.xlu0 %v3611_v2, %s3700_s28  ;;  %v3616_v63 = vld [vmem:[%s5871_s2 + $0x1e8] sm:$0xff]  ;;  %v3617_v2 = vld [vmem:[%s5871_s2 + $0x1f0] sm:$0x3] }
 0x2e3   : > { %v4194_v3 = vpop.permute.xlu0 %1190  ;;  %v4196_v4 = vpop.permute.xlu1 %1188 }
 0x2e7   : > { %v1208_v5 = vpop.permute.xlu0 %1207  ;;  %v4198_v6 = vpop.permute.xlu1 %1192 }
 0x2e8   : > { %v1216_v9 = vmul.f32 %v1208_v5, %v3936_v32  ;;  %v1275_v5 = vrot.slane %v3615_v62, 7 }
 0x2ea   : > { %1222 = vrot.lane.b32.xlu1 %v1216_v9, %s3701_s7 }
 0x2eb   : > { %v1212_v11 = vpop.permute.xlu0 %1211  ;;  %v1210_v12 = vpop.permute.xlu1 %1209 }
 0x2ec   : > { %v1218_v13 = vmul.f32 %v1212_v11, %v3938_v35  ;;  %v1217_v14 = vmul.f32 %v1210_v12, %v3941_v39  ;;  %v1276_v11 = vrot.slane %v3616_v63, 7  ;;  %v1278_v12 = vrot.slane %v3617_v2, 7 }
 0x2ee   : > { %1226 = vrot.lane.b32.xlu1 %v1218_v13, %s3701_s7  ;;  %1224 = vrot.lane.b32.xlu0 %v1217_v14, %s3701_s7  ;;  %v1277_v14 = vsel %vm391_vm0, %v1275_v5, %v1276_v11 }
 0x2f2   : > { %1243 = vrot.lane.b32.xlu1 %v3613_v15, %s3700_s28  ;;  %1241 = vrot.lane.b32.xlu0 %v3612_v16, %s3700_s28  ;;  %v1279_v15 = vsel %vm391_vm0, %v1276_v11, %v1278_v12  ;;  %v3618_v12 = vld [vmem:[%s5871_s2 + $0x1f8] sm:$0xff] }
 0x2f6   : > { %1245 = vrot.lane.b32.xlu0 %v3614_v17, %s3700_s28 }
 0x35c   : > { %v4218_v18 = vpop.permute.xlu1 %1222 }
 0x35d   : > { %5892 = vst [vmem:[#allocation22_spill] sm:$0xff] %v4218_v18 }
 0x360   : > { %v4220_v57 = vpop.permute.xlu0 %1224  ;;  %v4222_v59 = vpop.permute.xlu1 %1226 }
 0x361   : > { %5893 = vst [vmem:[#allocation23_spill] sm:$0xff] %v4220_v57  ;;  %5894 = vst [vmem:[#allocation24_spill] sm:$0xff] %v4222_v59 }
 0x364   : > { %v1242_v60 = vpop.permute.xlu0 %1241  ;;  %v1244_v61 = vpop.permute.xlu1 %1243 }
 0x365   : > { %v1250_v0 = vmul.f32 %v1242_v60, %v3936_v32  ;;  %v1251_v1 = vmul.f32 %v1244_v61, %v3941_v39 }
 0x367   : > { %1256 = vrot.lane.b32.xlu1 %v1250_v0, %s3701_s7  ;;  %1258 = vrot.lane.b32.xlu0 %v1251_v1, %s3701_s7 }
 0x368   : > { %v1246_v9 = vpop.permute.xlu0 %1245 }
 0x369   : > { %v1252_v13 = vmul.f32 %v1246_v9, %v3938_v35 }
 0x36b   : > { %1260 = vrot.lane.b32.xlu1 %v1252_v13, %s3701_s7  ;;  %1280 = vrot.lane.b32.xlu0 %v1275_v5, %s3700_s28  ;;  %v3619_v13 = vld [vmem:[%s5871_s2 + $0x200] sm:$0xff] }
 0x36f   : > { %1282 = vrot.lane.b32.xlu1 %v1277_v14, %s3700_s28  ;;  %1284 = vrot.lane.b32.xlu0 %v1279_v15, %s3700_s28  ;;  %v3620_v14 = vld [vmem:[%s5871_s2 + $0x208] sm:$0x3] }
 0x3d9   : > { %v4244_v16 = vpop.permute.xlu0 %1258  ;;  %v4246_v17 = vpop.permute.xlu1 %1256 }
 0x3da   : > { %5895 = vst [vmem:[#allocation25_spill] sm:$0xff] %v4244_v16  ;;  %5896 = vst [vmem:[#allocation26_spill] sm:$0xff] %v4246_v17 }
 0x3dd   : > { %v1281_v60 = vpop.permute.xlu0 %1280  ;;  %v4248_v61 = vpop.permute.xlu1 %1260 }
 0x3de   : > { %5897 = vst [vmem:[#allocation27_spill] sm:$0xff] %v4248_v61  ;;  %v1289_v62 = vmul.f32 %v1281_v60, %v3936_v32  ;;  %v3622_v61 = vld [vmem:[%s5871_s2 + $0x218] sm:$0xff] }
 0x3e0   : > { %v1295_v63 = vrot.slane %v1289_v62, 1  ;;  %v1319_v62 = vrot.slane %v3618_v12, 7 }
 0x3e1   : > { %v1285_v0 = vpop.permute.xlu0 %1284  ;;  %v1283_v1 = vpop.permute.xlu1 %1282 }
 0x3e2   : > { %v1291_v2 = vmul.f32 %v1285_v0, %v3938_v35  ;;  %v1290_v5 = vmul.f32 %v1283_v1, %v3941_v39  ;;  %v1320_v0 = vrot.slane %v3619_v13, 7  ;;  %v1322_v1 = vrot.slane %v3620_v14, 7 }
 0x3e4   : > { %v1298_v9 = vrot.slane %v1291_v2, 1  ;;  %v1296_v11 = vrot.slane %v1290_v5, 1  ;;  %v1323_v2 = vsel %vm391_vm0, %v1320_v0, %v1322_v1  ;;  %v1321_v5 = vsel %vm391_vm0, %v1319_v62, %v1320_v0 }
 0x3e6   : > { %v1299_v15 = vsel %vm406_vm2, %v1296_v11, %v1298_v9  ;;  %v1297_v60 = vsel %vm406_vm2, %v1295_v63, %v1296_v11 }
 0x3e7   : > { %1302 = vrot.lane.b32.xlu0 %v1299_v15, %s3701_s7  ;;  %1300 = vrot.lane.b32.xlu1 %v1297_v60, %s3701_s7 }
 0x3eb   : > { %1324 = vrot.lane.b32.xlu0 %v1319_v62, %s3700_s28  ;;  %1304 = vrot.lane.b32.xlu1 %v1298_v9, %s3701_s7 }
 0x3ef   : > { %1328 = vrot.lane.b32.xlu0 %v1323_v2, %s3700_s28  ;;  %1326 = vrot.lane.b32.xlu1 %v1321_v5, %s3700_s28  ;;  %v3621_v5 = vld [vmem:[%s5871_s2 + $0x210] sm:$0xff] }
 0x459   : > { %v4272_v63 = vpop.permute.xlu0 %1302  ;;  %v4274_v11 = vpop.permute.xlu1 %1300 }
 0x45d   : > { %v1325_v15 = vpop.permute.xlu0 %1324  ;;  %v4276_v12 = vpop.permute.xlu1 %1304 }
 0x45e   : > { %v1333_v13 = vmul.f32 %v1325_v15, %v3936_v32  ;;  %v3623_v15 = vld [vmem:[%s5871_s2 + $0x220] sm:$0x3] }
 0x460   : > { %v1339_v9 = vrot.slane %v1333_v13, 1 }
 0x461   : > { %v1329_v14 = vpop.permute.xlu0 %1328  ;;  %v1327_v60 = vpop.permute.xlu1 %1326 }
 0x462   : > { %v1335_v1 = vmul.f32 %v1329_v14, %v3938_v35  ;;  %v1334_v62 = vmul.f32 %v1327_v60, %v3941_v39  ;;  %v1363_v60 = vrot.slane %v3621_v5, 7 }
 0x464   : > { %v1342_v0 = vrot.slane %v1335_v1, 1  ;;  %v1340_v2 = vrot.slane %v1334_v62, 1  ;;  %v1364_v1 = vrot.slane %v3622_v61, 7  ;;  %v1366_v62 = vrot.slane %v3623_v15, 7 }
 0x466   : > { %v1343_v13 = vsel %vm406_vm2, %v1340_v2, %v1342_v0  ;;  %v1341_v14 = vsel %vm406_vm2, %v1339_v9, %v1340_v2  ;;  %v1367_v17 = vsel %vm391_vm0, %v1364_v1, %v1366_v62  ;;  %v1365_v16 = vsel %vm391_vm0, %v1363_v60, %v1364_v1 }
 0x467   : > { %1346 = vrot.lane.b32.xlu0 %v1343_v13, %s3701_s7  ;;  %1344 = vrot.lane.b32.xlu1 %v1341_v14, %s3701_s7 }
 0x46b   : > { %1368 = vrot.lane.b32.xlu0 %v1363_v60, %s3700_s28  ;;  %1348 = vrot.lane.b32.xlu1 %v1342_v0, %s3701_s7 }
 0x46f   : > { %1372 = vrot.lane.b32.xlu0 %v1367_v17, %s3700_s28  ;;  %1370 = vrot.lane.b32.xlu1 %v1365_v16, %s3700_s28  ;;  %v3624_v16 = vld [vmem:[%s5871_s2 + $0x228] sm:$0xff] }
 0x4d9   : > { %v4300_v9 = vpop.permute.xlu0 %1346  ;;  %v4302_v2 = vpop.permute.xlu1 %1344 }
 0x4dd   : > { %v1369_v13 = vpop.permute.xlu0 %1368  ;;  %v4304_v5 = vpop.permute.xlu1 %1348 }
 0x4de   : > { %v1377_v61 = vmul.f32 %v1369_v13, %v3936_v32  ;;  %v3626_v13 = vld [vmem:[%s5871_s2 + $0x238] sm:$0x3] }
 0x4e0   : > { %v1383_v0 = vrot.slane %v1377_v61, 1 }
 0x4e1   : > { %v1373_v15 = vpop.permute.xlu0 %1372  ;;  %v1371_v14 = vpop.permute.xlu1 %1370 }
 0x4e2   : > { %v1379_v62 = vmul.f32 %v1373_v15, %v3938_v35  ;;  %v1378_v60 = vmul.f32 %v1371_v14, %v3941_v39  ;;  %v1407_v14 = vrot.slane %v3624_v16, 7 }
 0x4e4   : > { %v1386_v1 = vrot.slane %v1379_v62, 1  ;;  %v1384_v17 = vrot.slane %v1378_v60, 1  ;;  %v1408_v62 = vrot.slane %v3625_v10, 7  ;;  %v1410_v60 = vrot.slane %v3626_v13, 7 }
 0x4e6   : > { %v1387_v61 = vsel %vm406_vm2, %v1384_v17, %v1386_v1  ;;  %v1385_v15 = vsel %vm406_vm2, %v1383_v0, %v1384_v17  ;;  %v1411_v8 = vsel %vm391_vm0, %v1408_v62, %v1410_v60  ;;  %v1409_v7 = vsel %vm391_vm0, %v1407_v14, %v1408_v62 }
 0x4e7   : > { %1390 = vrot.lane.b32.xlu0 %v1387_v61, %s3701_s7  ;;  %1388 = vrot.lane.b32.xlu1 %v1385_v15, %s3701_s7 }
 0x4eb   : > { %1412 = vrot.lane.b32.xlu0 %v1407_v14, %s3700_s28  ;;  %1392 = vrot.lane.b32.xlu1 %v1386_v1, %s3701_s7 }
 0x4ef   : > { %1416 = vrot.lane.b32.xlu0 %v1411_v8, %s3700_s28  ;;  %1414 = vrot.lane.b32.xlu1 %v1409_v7, %s3700_s28  ;;  %v3627_v7 = vld [vmem:[%s5871_s2 + $0x300] sm:$0xff] }
 0x559   : > { %v4328_v0 = vpop.permute.xlu0 %1390  ;;  %v4330_v17 = vpop.permute.xlu1 %1388 }
 0x55a   : > { %5898 = vst [vmem:[#allocation28_spill] sm:$0xff] %v4328_v0  ;;  %5899 = vst [vmem:[#allocation29_spill] sm:$0xff] %v4330_v17 }
 0x55d   : > { %v1413_v61 = vpop.permute.xlu0 %1412  ;;  %v4332_v16 = vpop.permute.xlu1 %1392 }
 0x55e   : > { %5900 = vst [vmem:[#allocation30_spill] sm:$0xff] %v4332_v16  ;;  %v1421_v10 = vmul.f32 %v1413_v61, %v3936_v32  ;;  %v3629_v61 = vld [vmem:[%s5871_s2 + $0x310] sm:$0x3] }
 0x560   : > { %v1427_v1 = vrot.slane %v1421_v10, 1 }
 0x561   : > { %v1417_v13 = vpop.permute.xlu0 %1416  ;;  %v1415_v15 = vpop.permute.xlu1 %1414 }
 0x562   : > { %v1423_v60 = vmul.f32 %v1417_v13, %v3938_v35  ;;  %v1422_v14 = vmul.f32 %v1415_v15, %v3941_v39  ;;  %v1451_v15 = vrot.slane %v3627_v7, 6 }
 0x564   : > { %v1430_v62 = vrot.slane %v1423_v60, 1  ;;  %v1428_v8 = vrot.slane %v1422_v14, 1  ;;  %v1452_v60 = vrot.slane %v3628_v51, 6  ;;  %v1454_v14 = vrot.slane %v3629_v61, 6 }
 0x566   : > { %v1431_v10 = vsel %vm406_vm2, %v1428_v8, %v1430_v62  ;;  %v1429_v13 = vsel %vm406_vm2, %v1427_v1, %v1428_v8  ;;  %v1455_v38 = vsel %vm521_vm1, %v1452_v60, %v1454_v14  ;;  %v1453_v46 = vsel %vm521_vm1, %v1451_v15, %v1452_v60 }
 0x567   : > { %1434 = vrot.lane.b32.xlu0 %v1431_v10, %s3701_s7  ;;  %1432 = vrot.lane.b32.xlu1 %v1429_v13, %s3701_s7 }
 0x56b   : > { %1456 = vrot.lane.b32.xlu0 %v1451_v15, %s3700_s28  ;;  %1436 = vrot.lane.b32.xlu1 %v1430_v62, %s3701_s7 }
 0x56f   : > { %1460 = vrot.lane.b32.xlu0 %v1455_v38, %s3700_s28  ;;  %1458 = vrot.lane.b32.xlu1 %v1453_v46, %s3700_s28  ;;  %v3630_v46 = vld [vmem:[%s5871_s2 + $0x318] sm:$0xff] }
 0x5d9   : > { %v4356_v1 = vpop.permute.xlu0 %1434  ;;  %v4358_v8 = vpop.permute.xlu1 %1432 }
 0x5da   : > { %5901 = vst [vmem:[#allocation31_spill] sm:$0xff] %v4356_v1  ;;  %5902 = vst [vmem:[#allocation32_spill] sm:$0xff] %v4358_v8  ;;  %v3631_v8 = vld [vmem:[%s5871_s2 + $0x320] sm:$0xff] }
 0x5dd   : > { %v1457_v10 = vpop.permute.xlu0 %1456  ;;  %v4360_v7 = vpop.permute.xlu1 %1436 }
 0x5de   : > { %5903 = vst [vmem:[#allocation33_spill] sm:$0xff] %v4360_v7  ;;  %v1465_v51 = vmul.f32 %v1457_v10, %v3936_v32  ;;  %v3632_v10 = vld [vmem:[%s5871_s2 + $0x328] sm:$0x3] }
 0x5e0   : > { %v1471_v62 = vrot.slane %v1465_v51, 2 }
 0x5e1   : > { %v1461_v61 = vpop.permute.xlu0 %1460  ;;  %v1459_v13 = vpop.permute.xlu1 %1458 }
 0x5e2   : > { %v1467_v14 = vmul.f32 %v1461_v61, %v3938_v35  ;;  %v1466_v15 = vmul.f32 %v1459_v13, %v3941_v39  ;;  %v1495_v13 = vrot.slane %v3630_v46, 6 }
 0x5e4   : > { %v1474_v60 = vrot.slane %v1467_v14, 2  ;;  %v1472_v38 = vrot.slane %v1466_v15, 2  ;;  %v1496_v14 = vrot.slane %v3631_v8, 6  ;;  %v1498_v15 = vrot.slane %v3632_v10, 6  ;;  %v3544_v8 = vld [vmem:[%s5871_s2 + $0x128] sm:$0xff] }
 0x5e5   : > { %v393_v46 = vrot.slane %v3544_v8, 7 }
 0x5e6   : > { %v1475_v51 = vsel %vm536_vm3, %v1472_v38, %v1474_v60  ;;  %v1473_v61 = vsel %vm536_vm3, %v1471_v62, %v1472_v38  ;;  %v1499_v7 = vsel %vm521_vm1, %v1496_v14, %v1498_v15  ;;  %v1497_v1 = vsel %vm521_vm1, %v1495_v13, %v1496_v14  ;;  %v3543_v62 = vld [vmem:[%s5871_s2 + $0x120] sm:$0xff] }
 0x5e7   : > { %1478 = vrot.lane.b32.xlu0 %v1475_v51, %s3701_s7  ;;  %1476 = vrot.lane.b32.xlu1 %v1473_v61, %s3701_s7  ;;  %v392_v38 = vrot.slane %v3543_v62, 7  ;;  %v3557_v51 = vld [vmem:[%s5871_s2 + $0x250] sm:$0x3] }
 0x5e8   : > { %v525_v62 = vrot.slane %v3557_v51, 6 }
 0x5e9   : > { %v394_v61 = vsel %vm391_vm0, %v392_v38, %v393_v46  ;;  %v400_v27 = vmul.f32 %v392_v38, %v3936_v32  ;;  %v358_v38 = vld [vmem:[%s5871_s2 + $0x8] sm:$0xff] }
 0x5ea   : > { %v401_v29 = vmul.f32 %v394_v61, %v3941_v39 }
 0x5eb   : > { %1500 = vrot.lane.b32.xlu0 %v1495_v13, %s3700_s28  ;;  %1480 = vrot.lane.b32.xlu1 %v1474_v60, %s3701_s7  ;;  %v3545_v60 = vld [vmem:[%s5871_s2 + $0x130] sm:$0x3]  ;;  %v407_v61 = vrot.slane %v400_v27, 1 }
 0x5ec   : > { %v395_v10 = vrot.slane %v3545_v60, 7 }
 0x5ee   : > { %v396_v15 = vsel %vm391_vm0, %v393_v46, %v395_v10  ;;  %v357_v46 = vld [vmem:[%s5871_s2] sm:$0xff]  ;;  %v408_v10 = vrot.slane %v401_v29, 1  ;;  %v359_v29 = vld [vmem:[%s5871_s2 + $0x10] sm:$0x3] }
 0x5ef   : > { %1504 = vrot.lane.b32.xlu0 %v1499_v7, %s3700_s28  ;;  %1502 = vrot.lane.b32.xlu1 %v1497_v1, %s3700_s28  ;;  %v3555_v7 = vld [vmem:[%s5871_s2 + $0x240] sm:$0xff]  ;;  %v3556_v1 = vld [vmem:[%s5871_s2 + $0x248] sm:$0xff]  ;;  %v402_v37 = vmul.f32 %v396_v15, %v3938_v35  ;;  %v360_v59 = vmul.f32 %v357_v46, %v3936_v32  ;;  %v362_v56 = vmul.f32 %v359_v29, %v3938_v35 }
 0x5f0   : > { %v522_v13 = vrot.slane %v3555_v7, 6  ;;  %v523_v14 = vrot.slane %v3556_v1, 6 }
 0x5f1   : > { %v410_v15 = vrot.slane %v402_v37, 1 }
 0x5f2   : > { %v524_v16 = vsel %vm521_vm1, %v522_v13, %v523_v14  ;;  %v526_v17 = vsel %vm521_vm1, %v523_v14, %v525_v62  ;;  %v530_v62 = vmul.f32 %v522_v13, %v3936_v32 }
 0x5f3   : > { %v531_v51 = vmul.f32 %v524_v16, %v3941_v39  ;;  %v532_v14 = vmul.f32 %v526_v17, %v3938_v35  ;;  %v361_v16 = vmul.f32 %v358_v38, %v3941_v39  ;;  %v409_v17 = vsel %vm406_vm2, %v407_v61, %v408_v10  ;;  %v3633_v38 = vld [vmem:[%s5871_s2 + $0x330] sm:$0xff] }
 0x5f4   : > { %v411_v13 = vsel %vm406_vm2, %v408_v10, %v410_v15  ;;  %v537_v46 = vrot.slane %v530_v62, 2  ;;  %v417_v29 = vadd.f32 %v410_v15, %v362_v56 }
 0x5f5   : > { %v538_v37 = vrot.slane %v531_v51, 2  ;;  %v540_v52 = vrot.slane %v532_v14, 2  ;;  %v416_v51 = vadd.f32 %v411_v13, %v361_v16  ;;  %v415_v14 = vadd.f32 %v409_v17, %v360_v59 }
 0x5f7   : > { %v539_v62 = vsel %vm536_vm3, %v537_v46, %v538_v37 }
 0x5f8   : > { %v545_v25 = vadd.f32 %v539_v62, %v415_v14 }
 0x5fa   : > { %v675_v17 = vadd.f32 %v4060_v21, %v545_v25 }
 0x659   : > { %v4404_v8 = vpop.permute.xlu0 %1478  ;;  %v4406_v60 = vpop.permute.xlu1 %1476 }
 0x65d   : > { %v1501_v0 = vpop.permute.xlu0 %1500  ;;  %v4413_v7 = vpop.permute.xlu1 %1480 }
 0x65e   : > { %v1509_v1 = vmul.f32 %v1501_v0, %v3936_v32 }
 0x660   : > { %v1515_v27 = vrot.slane %v1509_v1, 2  ;;  %v3635_v1 = vld [vmem:[%s5871_s2 + $0x340] sm:$0x3] }
 0x661   : > { %v1505_v57 = vpop.permute.xlu0 %1504  ;;  %v1503_v0 = vpop.permute.xlu1 %1502  ;;  %v1542_v49 = vrot.slane %v3635_v1, 6 }
 0x662   : > { %v1511_v18 = vmul.f32 %v1505_v57, %v3938_v35  ;;  %v1510_v58 = vmul.f32 %v1503_v0, %v3941_v39  ;;  %v3634_v57 = vld [vmem:[%s5871_s2 + $0x338] sm:$0xff] }
 0x663   : > { %v1540_v0 = vrot.slane %v3634_v57, 6  ;;  %v1623_v57 = vstv %s4471_s6  ;;  %s4807_s6 = sld [smem:[#allocation2 + $0x2c]] }
 0x664   : > { %v1518_v44 = vrot.slane %v1511_v18, 2  ;;  %v1516_v36 = vrot.slane %v1510_v58, 2  ;;  %v541_v58 = vsel %vm536_vm3, %v538_v37, %v540_v52  ;;  %v1539_v18 = vrot.slane %v3633_v38, 6 }
 0x665   : > { %v546_v26 = vadd.f32 %v541_v58, %v416_v51  ;;  %v1543_v59 = vsel %vm521_vm1, %v1540_v0, %v1542_v49  ;;  %v1693_v37 = vstv %s3487_s5  ;;  %s4802_s5 = sld [smem:[#allocation2 + $0x4f]] }
 0x666   : > { %v1519_v10 = vsel %vm536_vm3, %v1516_v36, %v1518_v44  ;;  %v1517_v61 = vsel %vm536_vm3, %v1515_v27, %v1516_v36  ;;  %v547_v36 = vadd.f32 %v540_v52, %v417_v29  ;;  %v1541_v16 = vsel %vm521_vm1, %v1539_v18, %v1540_v0 }
 0x667   : > { %1522 = vrot.lane.b32.xlu0 %v1519_v10, %s3701_s7  ;;  %1520 = vrot.lane.b32.xlu1 %v1517_v61, %s3701_s7  ;;  %v676_v27 = vadd.f32 %v4074_v28, %v546_v26  ;;  %v1626_v10 = vstv %s4474_s8  ;;  %s4811_s8 = sld [smem:[#allocation2 + $0x50]] }
 0x668   : > { %v677_v56 = vadd.f32 %v4062_v22, %v547_v36 }
 0x669   : > { %v822_v15 = vadd.f32 %v4092_v40, %v676_v27  ;;  %v1661_v27 = vstv %s3452_s9  ;;  %s4895_s9 = sld [smem:[#allocation2 + $0x18]] }
 0x66a   : > { %v823_v49 = vadd.f32 %v4080_v31, %v677_v56 }
 0x66b   : > { %1544 = vrot.lane.b32.xlu0 %v1539_v18, %s3700_s28  ;;  %1524 = vrot.lane.b32.xlu1 %v1518_v44, %s3701_s7  ;;  %v821_v44 = vadd.f32 %v4102_v45, %v675_v17  ;;  %v998_v52 = vadd.f32 %v4108_v48, %v822_v15  ;;  %v1709_v17 = vstv %s3488_s10  ;;  %s4911_s10 = sld [smem:[#allocation2 + $0x19]] }
 0x66c   : > { %v999_v21 = vadd.f32 %v4094_v41, %v823_v49 }
 0x66d   : > { %v997_v26 = vadd.f32 %v4118_v53, %v821_v44  ;;  %v1164_v25 = vadd.f32 %v4172_v20, %v998_v52  ;;  %v1629_v53 = vstv %s3450_s27  ;;  %s4767_s27 = sld [smem:[#allocation2 + $0x56]] }
 0x66e   : > { %v1165_v28 = vadd.f32 %v4174_v55, %v999_v21  ;;  %v1620_v55 = vstv %s4464_s29  ;;  %s4794_s29 = sld [smem:[#allocation2 + $0x4e]] }
 0x66f   : > { %1548 = vrot.lane.b32.xlu0 %v1543_v59, %s3700_s28  ;;  %1546 = vrot.lane.b32.xlu1 %v1541_v16, %s3700_s28  ;;  %v1163_v22 = vadd.f32 %v4170_v19, %v997_v26  ;;  %v1310_v40 = vadd.f32 %v4272_v63, %v1164_v25  ;;  %v1677_v19 = vstv %s3486_s26  ;;  %s4787_s26 = sld [smem:[#allocation2 + $0x2a]] }
 0x670   : > { %v1311_v45 = vadd.f32 %v4276_v12, %v1165_v28 }
 0x671   : > { %v1309_v31 = vadd.f32 %v4274_v11, %v1163_v22  ;;  %v4478_v41 = vadd.f32 %v4404_v8, %v1310_v40 }
 0x672   : > { %v4484_v20 = vadd.f32 %v4413_v7, %v1311_v45 }
 0x673   : > { %v4481_v48 = vadd.f32 %v4406_v60, %v1309_v31  ;;  %v1631_v63 = vmul.f32 %v1629_v53, %v4478_v41  ;;  %v1679_v11 = vmul.f32 %v1677_v19, %v4478_v41  ;;  %v1645_v60 = vstv %s3451_s30  ;;  %s4798_s30 = sld [smem:[#allocation2 + $0x2b]] }
 0x674   : > { %v1632_v38 = vmul.f32 %v1629_v53, %v4484_v20  ;;  %v1680_v51 = vmul.f32 %v1677_v19, %v4484_v20  ;;  %v1647_v58 = vmul.f32 %v1645_v60, %v4478_v41  ;;  %v1695_v18 = vmul.f32 %v1693_v37, %v4478_v41 }
 0x675   : > { %v1630_v12 = vmul.f32 %v1629_v53, %v4481_v48  ;;  %v1678_v8 = vmul.f32 %v1677_v19, %v4481_v48  ;;  %v1637_v13 = vrot.slane %v1631_v63, 1  ;;  %v1685_v46 = vrot.slane %v1679_v11, 2 }
 0x676   : > { %v1621_v61 = vmul.f32 %v1620_v55, %v4481_v48  ;;  %v1639_v14 = vrot.slane %v1632_v38, 1  ;;  %v1622_v0 = vmul.f32 %v1620_v55, %v4478_v41  ;;  %v1687_v36 = vrot.slane %v1680_v51, 2 }
 0x677   : > { %v1636_v7 = vrot.slane %v1630_v12, 1  ;;  %v1684_v1 = vrot.slane %v1678_v8, 2  ;;  %v1653_v44 = vrot.slane %v1647_v58, 1  ;;  %v1646_v49 = vmul.f32 %v1645_v60, %v4481_v48 }
 0x678   : > { %v1640_v16 = vsel %vm406_vm2, %v1637_v13, %v1639_v14  ;;  %v1688_v15 = vsel %vm536_vm3, %v1685_v46, %v1687_v36  ;;  %v1701_v26 = vrot.slane %v1695_v18, 2  ;;  %v1624_v21 = vmul.f32 %v1623_v57, %v4481_v48 }
 0x679   : > { %v1638_v62 = vsel %vm406_vm2, %v1636_v7, %v1637_v13  ;;  %v1686_v29 = vsel %vm536_vm3, %v1684_v1, %v1685_v46  ;;  %v1644_v56 = vadd.f32 %v1640_v16, %v1622_v0  ;;  %v1694_v25 = vmul.f32 %v1693_v37, %v4481_v48 }
 0x67a   : > { %v1643_v59 = vadd.f32 %v1638_v62, %v1621_v61  ;;  %v1652_v28 = vrot.slane %v1646_v49, 1  ;;  %v1648_v40 = vmul.f32 %v1645_v60, %v4484_v20  ;;  %v1696_v31 = vmul.f32 %v1693_v37, %v4484_v20 }
 0x67b   : > { %v4508_v22 = vadd.f32 %v1688_v15, %v1644_v56  ;;  %v1700_v45 = vrot.slane %v1694_v25, 2  ;;  %v1625_v53 = vmul.f32 %v1623_v57, %v4478_v41  ;;  %v1663_v19 = vmul.f32 %v1661_v27, %v4478_v41 }
 0x67c   : > { %v4504_v52 = vadd.f32 %v1686_v29, %v1643_v59  ;;  %v1711_v55 = vmul.f32 %v1709_v17, %v4478_v41  ;;  %v1654_v63 = vsel %vm406_vm2, %v1652_v28, %v1653_v44  ;;  %v1655_v11 = vrot.slane %v1648_v40, 1  ;;  %v3548_v28 = vld [vmem:[%s5871_s2 + $0x148] sm:$0x3] }
 0x67d   : > { %v1703_v12 = vrot.slane %v1696_v31, 2  ;;  %v1662_v8 = vmul.f32 %v1661_v27, %v4481_v48  ;;  %v1659_v13 = vadd.f32 %v1654_v63, %v1624_v21  ;;  %v1702_v46 = vsel %vm536_vm3, %v1700_v45, %v1701_v26  ;;  %v3558_v31 = vld [vmem:[%s5871_s2 + $0x258] sm:$0xff]  ;;  %v3559_v45 = vld [vmem:[%s5871_s2 + $0x260] sm:$0xff] }
 0x67e   : > { %v1669_v38 = vrot.slane %v1663_v19, 1  ;;  %v1717_v60 = vrot.slane %v1711_v55, 2  ;;  %v1656_v37 = vsel %vm406_vm2, %v1653_v44, %v1655_v11  ;;  %v1710_v1 = vmul.f32 %v1709_v17, %v4481_v48  ;;  %v3560_v19 = vld [vmem:[%s5871_s2 + $0x268] sm:$0x3] }
 0x67f   : > { %v1704_v7 = vsel %vm536_vm3, %v1701_v26, %v1703_v12  ;;  %v1668_v57 = vrot.slane %v1662_v8, 1  ;;  %v4521_v51 = vadd.f32 %v1702_v46, %v1659_v13  ;;  %v1660_v61 = vadd.f32 %v1656_v37, %v1625_v53 }
 0x680   : > { %v1627_v14 = vmul.f32 %v1626_v10, %v4481_v48  ;;  %v1716_v18 = vrot.slane %v1710_v1, 2  ;;  %v1664_v62 = vmul.f32 %v1661_v27, %v4484_v20  ;;  %v1712_v29 = vmul.f32 %v1709_v17, %v4484_v20  ;;  %v3546_v27 = vld [vmem:[%s5871_s2 + $0x138] sm:$0xff]  ;;  %v3547_v17 = vld [vmem:[%s5871_s2 + $0x140] sm:$0xff] }
 0x681   : > { %v1670_v58 = vsel %vm406_vm2, %v1668_v57, %v1669_v38  ;;  %v4527_v0 = vadd.f32 %v1704_v7, %v1660_v61  ;;  %v1628_v44 = vmul.f32 %v1626_v10, %v4478_v41  ;;  %v425_v10 = vrot.slane %v3546_v27, 7  ;;  %v3535_v1 = vld [vmem:[%s5871_s2 + $0x20] sm:$0xff] }
 0x682   : > { %v1675_v36 = vadd.f32 %v1670_v58, %v1627_v14  ;;  %v1718_v59 = vsel %vm536_vm3, %v1716_v18, %v1717_v60  ;;  %v1671_v16 = vrot.slane %v1664_v62, 1  ;;  %v1719_v56 = vrot.slane %v1712_v29, 2  ;;  %v3534_v58 = vld [vmem:[%s5871_s2 + $0x18] sm:$0xff] }
 0x683   : > { %v426_v40 = vrot.slane %v3547_v17, 7  ;;  %v428_v53 = vrot.slane %v3548_v28, 7  ;;  %v555_v55 = vrot.slane %v3558_v31, 6  ;;  %v556_v63 = vrot.slane %v3559_v45, 6 }
 0x684   : > { %v4530_v15 = vadd.f32 %v1718_v59, %v1675_v36  ;;  %v1672_v49 = vsel %vm406_vm2, %v1669_v38, %v1671_v16  ;;  %v1720_v26 = vsel %vm536_vm3, %v1717_v60, %v1719_v56  ;;  %v558_v8 = vrot.slane %v3560_v19, 6  ;;  %v3536_v56 = vld [vmem:[%s5871_s2 + $0x28] sm:$0x3] }
 0x685   : > { %v1676_v21 = vadd.f32 %v1672_v49, %v1628_v44  ;;  %v427_v11 = vsel %vm391_vm0, %v425_v10, %v426_v40  ;;  %v429_v12 = vsel %vm391_vm0, %v426_v40, %v428_v53  ;;  %v557_v46 = vsel %vm521_vm1, %v555_v55, %v556_v63 }
 0x686   : > { %v434_v13 = vmul.f32 %v427_v11, %v3941_v39  ;;  %v433_v38 = vmul.f32 %v425_v10, %v3936_v32  ;;  %v435_v60 = vmul.f32 %v429_v12, %v3938_v35  ;;  %v559_v57 = vsel %vm521_vm1, %v556_v63, %v558_v8 }
 0x687   : > { %v4535_v25 = vadd.f32 %v1720_v26, %v1676_v21  ;;  %v564_v61 = vmul.f32 %v557_v46, %v3941_v39  ;;  %v563_v14 = vmul.f32 %v555_v55, %v3936_v32  ;;  %v565_v36 = vmul.f32 %v559_v57, %v3938_v35  ;;  %v3636_v46 = vld [vmem:[%s5871_s2 + $0x348] sm:$0xff]  ;;  %v3637_v57 = vld [vmem:[%s5871_s2 + $0x350] sm:$0xff] }
 0x688   : > { %v440_v18 = vrot.slane %v434_v13, 1  ;;  %v439_v62 = vrot.slane %v433_v38, 1  ;;  %v442_v29 = vrot.slane %v435_v60, 1  ;;  %v368_v44 = vmul.f32 %v3535_v1, %v3941_v39  ;;  %v3638_v1 = vld [vmem:[%s5871_s2 + $0x358] sm:$0x3] }
 0x689   : > { %v367_v21 = vmul.f32 %v3534_v58, %v3936_v32  ;;  %v569_v27 = vrot.slane %v563_v14, 2  ;;  %v570_v17 = vrot.slane %v564_v61, 2  ;;  %v369_v10 = vmul.f32 %v3536_v56, %v3938_v35 }
 0x68a   : > { %v443_v26 = vsel %vm406_vm2, %v440_v18, %v442_v29  ;;  %v441_v28 = vsel %vm406_vm2, %v439_v62, %v440_v18  ;;  %v572_v40 = vrot.slane %v565_v36, 2  ;;  %v1583_v18 = vrot.slane %v3636_v46, 6 }
 0x68b   : > { %v448_v53 = vadd.f32 %v443_v26, %v368_v44  ;;  %v447_v12 = vadd.f32 %v441_v28, %v367_v21  ;;  %v571_v38 = vsel %vm536_vm3, %v569_v27, %v570_v17  ;;  %v449_v60 = vadd.f32 %v442_v29, %v369_v10 }
 0x68c   : > { %v573_v11 = vsel %vm536_vm3, %v570_v17, %v572_v40  ;;  %v1584_v29 = vrot.slane %v3637_v57, 6  ;;  %v1586_v36 = vrot.slane %v3638_v1, 6 }
 0x68d   : > { %v578_v61 = vadd.f32 %v573_v11, %v448_v53  ;;  %v577_v62 = vadd.f32 %v571_v38, %v447_v12  ;;  %v2122_v53 = vstv %s3490_s20  ;;  %s4740_s20 = sld [smem:[#allocation2 + $0xd]] }
 0x68e   : > { %v1585_v26 = vsel %vm521_vm1, %v1583_v18, %v1584_v29 }
 0x68f   : > { %v710_v56 = vadd.f32 %v4078_v30, %v578_v61  ;;  %v709_v44 = vadd.f32 %v4064_v23, %v577_v62 }
 0x691   : > { %v866_v27 = vadd.f32 %v4096_v42, %v710_v56  ;;  %v865_v17 = vadd.f32 %v4106_v47, %v709_v44 }
 0x693   : > { %v1042_v23 = vadd.f32 %v4112_v50, %v866_v27  ;;  %v1041_v30 = vadd.f32 %v4120_v54, %v865_v17 }
 0x695   : > { %v1197_v42 = vadd.f32 %v4196_v4, %v1041_v30  ;;  %v2058_v4 = vstv %s3453_s14  ;;  %s3476_s14 = sld [smem:[#allocation2 + $0x3e]] }
 0x6d9   : > { %v4561_v37 = vpop.permute.xlu0 %1522  ;;  %v4563_v7 = vpop.permute.xlu1 %1520 }
 0x6dd   : > { %v1545_v59 = vpop.permute.xlu0 %1544  ;;  %v4575_v16 = vpop.permute.xlu1 %1524 }
 0x6de   : > { %v1553_v49 = vmul.f32 %v1545_v59, %v3936_v32  ;;  %v579_v59 = vadd.f32 %v572_v40, %v449_v60  ;;  %v1353_v40 = vadd.f32 %v4302_v2, %v1197_v42  ;;  %v2090_v2 = vstv %s3455_s21  ;;  %s4742_s21 = sld [smem:[#allocation2 + $0xe]] }
 0x6e0   : > { %v1559_v19 = vrot.slane %v1553_v49, 2  ;;  %v1587_v49 = vsel %vm521_vm1, %v1584_v29, %v1586_v36  ;;  %v711_v21 = vadd.f32 %v4066_v24, %v579_v59  ;;  %v1198_v24 = vadd.f32 %v4194_v3, %v1042_v23 }
 0x6e1   : > { %v1549_v31 = vpop.permute.xlu0 %1548  ;;  %v1547_v45 = vpop.permute.xlu1 %1546 }
 0x6e2   : > { %v1555_v55 = vmul.f32 %v1549_v31, %v3938_v35  ;;  %v1554_v63 = vmul.f32 %v1547_v45, %v3941_v39  ;;  %v867_v28 = vadd.f32 %v4084_v34, %v711_v21  ;;  %v1354_v47 = vadd.f32 %v4300_v9, %v1198_v24 }
 0x6e3   : > { %v2106_v31 = vstv %s3489_s17  ;;  %v2074_v45 = vstv %s3454_s18  ;;  %s4738_s18 = sld [smem:[#allocation2 + $0xc]] }
 0x6e4   : > { %v1562_v8 = vrot.slane %v1555_v55, 2  ;;  %v1560_v13 = vrot.slane %v1554_v63, 2  ;;  %v1043_v10 = vadd.f32 %v4098_v43, %v867_v28  ;;  %v4625_v54 = vadd.f32 %v4561_v37, %v1354_v47  ;;  %s3510_s17 = sld [smem:[#allocation2 + $0x60]] }
 0x6e5   : > { %v4628_v43 = vadd.f32 %v4563_v7, %v1353_v40  ;;  %v2138_v7 = vstv %s3491_s22  ;;  %s3462_s22 = sld [smem:[#allocation2 + $0x30]] }
 0x6e6   : > { %v1563_v14 = vsel %vm536_vm3, %v1560_v13, %v1562_v8  ;;  %v1561_v58 = vsel %vm536_vm3, %v1559_v19, %v1560_v13  ;;  %v1199_v34 = vadd.f32 %v4198_v6, %v1043_v10  ;;  %v2060_v9 = vmul.f32 %v2058_v4, %v4625_v54 }
 0x6e7   : > { %1566 = vrot.lane.b32.xlu0 %v1563_v14, %s3701_s7  ;;  %1564 = vrot.lane.b32.xlu1 %v1561_v58, %s3701_s7  ;;  %v2059_v6 = vmul.f32 %v2058_v4, %v4628_v43  ;;  %v2108_v37 = vmul.f32 %v2106_v31, %v4625_v54  ;;  %v2075_v11 = vmul.f32 %v2074_v45, %v4628_v43 }
 0x6e8   : > { %v1355_v50 = vadd.f32 %v4304_v5, %v1199_v34  ;;  %v2107_v5 = vmul.f32 %v2106_v31, %v4628_v43  ;;  %v2066_v63 = vrot.slane %v2060_v9, 1  ;;  %v2076_v46 = vmul.f32 %v2074_v45, %v4625_v54 }
 0x6e9   : > { %v2065_v55 = vrot.slane %v2059_v6, 1  ;;  %v2081_v57 = vrot.slane %v2075_v11, 1  ;;  %v2123_v1 = vmul.f32 %v2122_v53, %v4628_v43  ;;  %v2139_v17 = vmul.f32 %v2138_v7, %v4628_v43  ;;  %v3563_v11 = vld [vmem:[%s5871_s2 + $0x280] sm:$0x3] }
 0x6ea   : > { %v4631_v3 = vadd.f32 %v4575_v16, %v1355_v50  ;;  %v2113_v12 = vrot.slane %v2107_v5, 2  ;;  %v2082_v58 = vrot.slane %v2076_v46, 1  ;;  %v2140_v28 = vmul.f32 %v2138_v7, %v4625_v54  ;;  %v3550_v5 = vld [vmem:[%s5871_s2 + $0x158] sm:$0xff] }
 0x6eb   : > { %1588 = vrot.lane.b32.xlu0 %v1583_v18, %s3700_s28  ;;  %1568 = vrot.lane.b32.xlu1 %v1562_v8, %s3701_s7  ;;  %v2114_v8 = vrot.slane %v2108_v37, 2  ;;  %v4642_v38 = vsel %vm406_vm2, %v2065_v55, %v2066_v63  ;;  %v2124_v18 = vmul.f32 %v2122_v53, %v4625_v54  ;;  %v2129_v29 = vrot.slane %v2123_v1, 2  ;;  %v3551_v37 = vld [vmem:[%s5871_s2 + $0x160] sm:$0x3]  ;;  %v3561_v55 = vld [vmem:[%s5871_s2 + $0x270] sm:$0xff] }
 0x6ec   : > { %v2061_v19 = vmul.f32 %v2058_v4, %v4631_v3  ;;  %v2109_v16 = vmul.f32 %v2106_v31, %v4631_v3  ;;  %5904 = vst [vmem:[#allocation34_spill] sm:$0xff] %v4642_v38  ;;  %v2077_v36 = vmul.f32 %v2074_v45, %v4631_v3  ;;  %v2125_v59 = vmul.f32 %v2122_v53, %v4631_v3 }
 0x6ed   : > { %v4646_v61 = vsel %vm536_vm3, %v2113_v12, %v2114_v8  ;;  %v4658_v56 = vsel %vm406_vm2, %v2081_v57, %v2082_v58  ;;  %v2130_v44 = vrot.slane %v2124_v18, 2  ;;  %v2093_v24 = vmul.f32 %v2090_v2, %v4631_v3 }
 0x6ee   : > { %v2068_v13 = vrot.slane %v2061_v19, 1  ;;  %v2116_v60 = vrot.slane %v2109_v16, 2  ;;  %5905 = vst [vmem:[#allocation35_spill] sm:$0xff] %v4646_v61  ;;  %5908 = vst [vmem:[#allocation38_spill] sm:$0xff] %v4658_v56  ;;  %v2084_v21 = vrot.slane %v2077_v36, 1  ;;  %v2132_v27 = vrot.slane %v2125_v59, 2 }
 0x6ef   : > { %1592 = vrot.lane.b32.xlu0 %v1587_v49, %s3700_s28  ;;  %1590 = vrot.lane.b32.xlu1 %v1585_v26, %s3700_s28  ;;  %v2091_v49 = vmul.f32 %v2090_v2, %v4628_v43  ;;  %v2092_v26 = vmul.f32 %v2090_v2, %v4625_v54  ;;  %v4665_v23 = vsel %vm536_vm3, %v2129_v29, %v2130_v44  ;;  %v2145_v47 = vrot.slane %v2139_v17, 2  ;;  %v3549_v2 = vld [vmem:[%s5871_s2 + $0x150] sm:$0xff]  ;;  %v3538_v36 = vld [vmem:[%s5871_s2 + $0x38] sm:$0xff]  ;;  %s3463_s28 = sld [smem:[#allocation2 + $0x31]] }
 0x6f0   : > { %v4649_v14 = vsel %vm406_vm2, %v2066_v63, %v2068_v13  ;;  %v4653_v62 = vsel %vm536_vm3, %v2114_v8, %v2116_v60  ;;  %5909 = vst [vmem:[#allocation39_spill] sm:$0xff] %v4665_v23  ;;  %v4669_v42 = vsel %vm406_vm2, %v2082_v58, %v2084_v21  ;;  %v4672_v34 = vsel %vm536_vm3, %v2130_v44, %v2132_v27  ;;  %v3562_v63 = vld [vmem:[%s5871_s2 + $0x278] sm:$0xff]  ;;  %v3537_v59 = vld [vmem:[%s5871_s2 + $0x30] sm:$0xff]  ;;  %v3539_v27 = vld [vmem:[%s5871_s2 + $0x40] sm:$0x3] }
 0x6f1   : > { %5906 = vst [vmem:[#allocation36_spill] sm:$0xff] %v4649_v14  ;;  %5907 = vst [vmem:[#allocation37_spill] sm:$0xff] %v4653_v62  ;;  %v2097_v30 = vrot.slane %v2091_v49, 1  ;;  %v2098_v10 = vrot.slane %v2092_v26, 1  ;;  %v2146_v40 = vrot.slane %v2140_v28, 2  ;;  %v2100_v4 = vrot.slane %v2093_v24, 1 }
 0x6f2   : > { %5910 = vst [vmem:[#allocation40_spill] sm:$0xff] %v4669_v42  ;;  %5911 = vst [vmem:[#allocation41_spill] sm:$0xff] %v4672_v34  ;;  %v2141_v31 = vmul.f32 %v2138_v7, %v4631_v3  ;;  %v457_v19 = vrot.slane %v3549_v2, 7  ;;  %v458_v7 = vrot.slane %v3550_v5, 7  ;;  %v460_v16 = vrot.slane %v3551_v37, 7 }
 0x6f3   : > { %v4675_v50 = vsel %vm406_vm2, %v2097_v30, %v2098_v10  ;;  %v4679_v45 = vsel %vm536_vm3, %v2145_v47, %v2146_v40  ;;  %v4682_v6 = vsel %vm406_vm2, %v2098_v10, %v2100_v4  ;;  %v587_v8 = vrot.slane %v3561_v55, 6 }
 0x6f4   : > { %5912 = vst [vmem:[#allocation42_spill] sm:$0xff] %v4675_v50  ;;  %5913 = vst [vmem:[#allocation43_spill] sm:$0xff] %v4679_v45  ;;  %v2148_v9 = vrot.slane %v2141_v31, 2  ;;  %v459_v12 = vsel %vm391_vm0, %v457_v19, %v458_v7  ;;  %v588_v13 = vrot.slane %v3562_v63, 6  ;;  %v461_v46 = vsel %vm391_vm0, %v458_v7, %v460_v16 }
 0x6f5   : > { %5914 = vst [vmem:[#allocation44_spill] sm:$0xff] %v4682_v6  ;;  %v590_v60 = vrot.slane %v3563_v11, 6  ;;  %v466_v57 = vmul.f32 %v459_v12, %v3941_v39  ;;  %v465_v1 = vmul.f32 %v457_v19, %v3936_v32  ;;  %v467_v18 = vmul.f32 %v461_v46, %v3938_v35 }
 0x6f6   : > { %v4685_v53 = vsel %vm536_vm3, %v2146_v40, %v2148_v9  ;;  %v589_v58 = vsel %vm521_vm1, %v587_v8, %v588_v13  ;;  %v595_v21 = vmul.f32 %v587_v8, %v3936_v32  ;;  %v375_v30 = vmul.f32 %v3538_v36, %v3941_v39 }
 0x6f7   : > { %5915 = vst [vmem:[#allocation45_spill] sm:$0xff] %v4685_v53  ;;  %v591_v29 = vsel %vm521_vm1, %v588_v13, %v590_v60  ;;  %v472_v44 = vrot.slane %v466_v57, 1  ;;  %v596_v49 = vmul.f32 %v589_v58, %v3941_v39  ;;  %v471_v26 = vrot.slane %v465_v1, 1  ;;  %v5916_v58 = vld [vmem:[#allocation5_spill] sm:$0xff] }
 0x6f8   : > { %v474_v17 = vrot.slane %v467_v18, 1  ;;  %v597_v28 = vmul.f32 %v591_v29, %v3938_v35  ;;  %v374_v10 = vmul.f32 %v3537_v59, %v3936_v32  ;;  %v601_v4 = vrot.slane %v595_v21, 2 }
 0x6f9   : > { %v602_v47 = vrot.slane %v596_v49, 2  ;;  %v473_v40 = vsel %vm406_vm2, %v471_v26, %v472_v44  ;;  %v376_v31 = vmul.f32 %v3539_v27, %v3938_v35  ;;  %v5918_v26 = vld [vmem:[#allocation14_spill] sm:$0xff] }
 0x6fa   : > { %v475_v24 = vsel %vm406_vm2, %v472_v44, %v474_v17  ;;  %v604_v9 = vrot.slane %v597_v28, 2  ;;  %v479_v19 = vadd.f32 %v473_v40, %v374_v10  ;;  %v5917_v44 = vld [vmem:[#allocation6_spill] sm:$0xff] }
 0x6fb   : > { %v480_v2 = vadd.f32 %v475_v24, %v375_v30  ;;  %v603_v55 = vsel %vm536_vm3, %v601_v4, %v602_v47  ;;  %v481_v63 = vadd.f32 %v474_v17, %v376_v31  ;;  %v5920_v30 = vld [vmem:[#allocation12_spill] sm:$0xff]  ;;  %v5921_v24 = vld [vmem:[#allocation17_spill] sm:$0xff]  ;;  %v1725_v31 = vstv %s4738_s18  ;;  %s3511_s18 = sld [smem:[#allocation2 + $0x61]] }
 0x6fc   : > { %v605_v7 = vsel %vm536_vm3, %v602_v47, %v604_v9  ;;  %v609_v8 = vadd.f32 %v603_v55, %v479_v19  ;;  %v5923_v19 = vld [vmem:[#allocation18_spill] sm:$0xff] }
 0x6fd   : > { %v610_v16 = vadd.f32 %v605_v7, %v480_v2  ;;  %v611_v46 = vadd.f32 %v604_v9, %v481_v63  ;;  %v5922_v9 = vld [vmem:[#allocation16_spill] sm:$0xff]  ;;  %v5924_v55 = vld [vmem:[#allocation22_spill] sm:$0xff] }
 0x6fe   : > { %v743_v18 = vadd.f32 %v5916_v58, %v609_v8  ;;  %v5926_v8 = vld [vmem:[#allocation24_spill] sm:$0xff] }
 0x6ff   : > { %v744_v60 = vadd.f32 %v4082_v33, %v610_v16  ;;  %v745_v49 = vadd.f32 %v5917_v44, %v611_v46  ;;  %v5919_v33 = vld [vmem:[#allocation9_spill] sm:$0xff]  ;;  %v5925_v16 = vld [vmem:[#allocation23_spill] sm:$0xff]  ;;  %v1726_v46 = vmul.f32 %v1725_v31, %v4481_v48  ;;  %v5927_v58 = vld [vmem:[#allocation28_spill] sm:$0xff] }
 0x700   : > { %v909_v21 = vadd.f32 %v5918_v26, %v743_v18  ;;  %v1751_v26 = vstv %s4742_s21  ;;  %s3429_s21 = sld [smem:[#allocation2 + $0xf]] }
 0x701   : > { %v911_v28 = vadd.f32 %v5919_v33, %v745_v49  ;;  %v910_v10 = vadd.f32 %v5920_v30, %v744_v60  ;;  %v1764_v60 = vstv %s3462_s22  ;;  %v1804_v49 = vstv %s3464_s23  ;;  %s3430_s22 = sld [smem:[#allocation2 + $0x10]] }
 0x702   : > { %v1085_v47 = vadd.f32 %v5921_v24, %v909_v21  ;;  %v1765_v21 = vmul.f32 %v1764_v60, %v4481_v48  ;;  %v1824_v33 = vstv %s3498_s24  ;;  %s5003_s23 = sld [smem:[#allocation2 + $0x11]] }
 0x703   : > { %v1086_v2 = vadd.f32 %v5922_v9, %v910_v10  ;;  %v1087_v7 = vadd.f32 %v5923_v19, %v911_v28  ;;  %v1727_v28 = vmul.f32 %v1725_v31, %v4478_v41  ;;  %v1807_v31 = vmul.f32 %v1804_v49, %v4484_v20  ;;  %s3466_s24 = sld [smem:[#allocation2 + $0x34]] }
 0x704   : > { %v1231_v63 = vadd.f32 %v5924_v55, %v1085_v47  ;;  %v1825_v9 = vmul.f32 %v1824_v33, %v4481_v48  ;;  %v1771_v19 = vrot.slane %v1765_v21, 1  ;;  %v1827_v55 = vmul.f32 %v1824_v33, %v4484_v20 }
 0x705   : > { %v1753_v21 = vmul.f32 %v1751_v26, %v4478_v41 }
 0x759   : > { %v4729_v5 = vpop.permute.xlu0 %1566  ;;  %v4731_v37 = vpop.permute.xlu1 %1564 }
 0x75d   : > { %v1589_v11 = vpop.permute.xlu0 %1588  ;;  %v4735_v12 = vpop.permute.xlu1 %1568 }
 0x75e   : > { %v1597_v13 = vmul.f32 %v1589_v11, %v3936_v32  ;;  %v1232_v11 = vadd.f32 %v5925_v16, %v1086_v2  ;;  %v1826_v2 = vmul.f32 %v1824_v33, %v4478_v41  ;;  %v1834_v33 = vrot.slane %v1827_v55, 2 }
 0x760   : > { %v1603_v29 = vrot.slane %v1597_v13, 2  ;;  %v1233_v13 = vadd.f32 %v5926_v8, %v1087_v7  ;;  %v1398_v18 = vadd.f32 %v5927_v58, %v1232_v11  ;;  %v1752_v11 = vmul.f32 %v1751_v26, %v4481_v48 }
 0x761   : > { %v1593_v57 = vpop.permute.xlu0 %1592  ;;  %v1591_v1 = vpop.permute.xlu1 %1590  ;;  %v4805_v58 = vstv %s4767_s27  ;;  %s3501_s27 = sld [smem:[#allocation2 + $0x57]] }
 0x762   : > { %v1599_v36 = vmul.f32 %v1593_v57, %v3938_v35  ;;  %v1598_v59 = vmul.f32 %v1591_v1, %v3941_v39  ;;  %v1738_v57 = vstv %s4740_s20  ;;  %v1784_v1 = vstv %s3463_s28  ;;  %s3512_s20 = sld [smem:[#allocation2 + $0x62]] }
 0x763   : > { %v1739_v30 = vmul.f32 %v1738_v57, %v4481_v48  ;;  %v1785_v10 = vmul.f32 %v1784_v1, %v4481_v48  ;;  %v1786_v24 = vmul.f32 %v1784_v1, %v4478_v41  ;;  %v1787_v47 = vmul.f32 %v1784_v1, %v4484_v20  ;;  %s3465_s28 = sld [smem:[#allocation2 + $0x33]] }
 0x764   : > { %v1606_v27 = vrot.slane %v1599_v36, 2  ;;  %v1604_v17 = vrot.slane %v1598_v59, 2  ;;  %v5929_v59 = vld [vmem:[#allocation30_spill] sm:$0xff]  ;;  %v1740_v16 = vmul.f32 %v1738_v57, %v4478_v41  ;;  %v1831_v57 = vrot.slane %v1825_v9, 2 }
 0x765   : > { %v4772_v44 = vadd.f32 %v5929_v59, %v1233_v13  ;;  %v1791_v8 = vrot.slane %v1785_v10, 1  ;;  %v1792_v13 = vrot.slane %v1786_v24, 1  ;;  %v1814_v59 = vrot.slane %v1807_v31, 1 }
 0x766   : > { %v1607_v40 = vsel %vm536_vm3, %v1604_v17, %v1606_v27  ;;  %v1605_v4 = vsel %vm536_vm3, %v1603_v29, %v1604_v17  ;;  %v5928_v29 = vld [vmem:[#allocation29_spill] sm:$0xff]  ;;  %v1766_v17 = vmul.f32 %v1764_v60, %v4478_v41  ;;  %v4830_v26 = vadd.f32 %v4729_v5, %v1398_v18 }
 0x767   : > { %1610 = vrot.lane.b32.xlu0 %v1607_v40, %s3701_s7  ;;  %1608 = vrot.lane.b32.xlu1 %v1605_v4, %s3701_s7  ;;  %v1397_v36 = vadd.f32 %v5928_v29, %v1231_v63  ;;  %v1805_v40 = vmul.f32 %v1804_v49, %v4481_v48  ;;  %v1806_v4 = vmul.f32 %v1804_v49, %v4478_v41  ;;  %v1844_v63 = vstv %s4761_s25  ;;  %s3467_s25 = sld [smem:[#allocation2 + $0x35]] }
 0x768   : > { %v1772_v7 = vrot.slane %v1766_v17, 1  ;;  %v1794_v29 = vrot.slane %v1787_v47, 1  ;;  %v1832_v49 = vrot.slane %v1826_v2, 2  ;;  %v4820_v10 = vmul.f32 %v1844_v63, %v4478_v41 }
 0x769   : > { %v1812_v1 = vrot.slane %v1806_v4, 1  ;;  %v4823_v24 = vmul.f32 %v1844_v63, %v4484_v20  ;;  %v4833_v47 = vadd.f32 %v4731_v37, %v1397_v36  ;;  %v2487_v18 = vstv %s4787_s26  ;;  %s3502_s26 = sld [smem:[#allocation2 + $0x58]] }
 0x76a   : > { %v1773_v17 = vsel %vm406_vm2, %v1771_v19, %v1772_v7  ;;  %v1795_v31 = vsel %vm406_vm2, %v1792_v13, %v1794_v29  ;;  %v1833_v5 = vsel %vm536_vm3, %v1831_v57, %v1832_v49  ;;  %v4845_v37 = vadd.f32 %v4735_v12, %v4772_v44 }
 0x76b   : > { %1612 = vrot.lane.b32.xlu1 %v1606_v27, %s3701_s7  ;;  %1730 = vrot.lane.b32.xlu0 %v1726_v46, %s3699_s19  ;;  %v1767_v27 = vmul.f32 %v1764_v60, %v4484_v20  ;;  %v1811_v60 = vrot.slane %v1805_v40, 1  ;;  %v1815_v9 = vsel %vm406_vm2, %v1812_v1, %v1814_v59  ;;  %v4848_v36 = vsel %vm536_vm3, %v1832_v49, %v1834_v33 }
 0x76c   : > { %v2535_v19 = vstv %s4794_s29  ;;  %v2488_v12 = vmul.f32 %v2487_v18, %v4833_v47  ;;  %v2489_v44 = vmul.f32 %v2487_v18, %v4830_v26  ;;  %v2490_v57 = vmul.f32 %v2487_v18, %v4845_v37  ;;  %s3503_s29 = sld [smem:[#allocation2 + $0x59]] }
 0x76d   : > { %v1774_v46 = vrot.slane %v1767_v27, 1  ;;  %v4827_v27 = vmul.f32 %v4805_v58, %v4481_v48  ;;  %v1813_v4 = vsel %vm406_vm2, %v1811_v60, %v1812_v1  ;;  %v2519_v60 = vstv %s4807_s6  ;;  %s5135_s6 = sld [smem:[#allocation2 + $0x63]] }
 0x76e   : > { %v2567_v1 = vstv %s4811_s8  ;;  %v2494_v29 = vrot.slane %v2488_v12, 1  ;;  %v2495_v59 = vrot.slane %v2489_v44, 1  ;;  %v2538_v49 = vmul.f32 %v2535_v19, %v4845_v37  ;;  %s5152_s8 = sld [smem:[#allocation2 + $0x64]] }
 0x76f   : > { %1732 = vrot.lane.b32.xlu1 %v1727_v28, %s3699_s19  ;;  %1743 = vrot.lane.b32.xlu0 %v1739_v30, %s3699_s19  ;;  %v4816_v28 = vmul.f32 %v1844_v63, %v4481_v48  ;;  %v1793_v30 = vsel %vm406_vm2, %v1791_v8, %v1792_v13  ;;  %v1775_v40 = vsel %vm406_vm2, %v1772_v7, %v1774_v46  ;;  %v2551_v8 = vstv %s4802_s5  ;;  %s5455_s5 = sld [smem:[#allocation2 + $0x1e]] }
 0x770   : > { %v4856_v63 = vmul.f32 %v4805_v58, %v4478_v41  ;;  %v2536_v13 = vmul.f32 %v2535_v19, %v4833_v47  ;;  %v2537_v46 = vmul.f32 %v2535_v19, %v4830_v26  ;;  %v2545_v55 = vrot.slane %v2538_v49, 2 }
 0x771   : > { %v2552_v2 = vmul.f32 %v2551_v8, %v4833_v47  ;;  %v2553_v44 = vmul.f32 %v2551_v8, %v4830_v26  ;;  %v2554_v49 = vmul.f32 %v2551_v8, %v4845_v37  ;;  %v1867_v7 = vmul.f32 %v4805_v58, %v4484_v20 }
 0x773   : > { %1745 = vrot.lane.b32.xlu1 %v1740_v16, %s3699_s19  ;;  %1756 = vrot.lane.b32.xlu0 %v1752_v11, %s3699_s19  ;;  %v2503_v11 = vstv %s4798_s30  ;;  %v2497_v16 = vrot.slane %v2490_v57, 1  ;;  %s5401_s30 = sld [smem:[#allocation2 + $0x5]] }
 0x774   : > { %v2504_v33 = vmul.f32 %v2503_v11, %v4833_v47  ;;  %v2506_v57 = vmul.f32 %v2503_v11, %v4845_v37 }
 0x776   : > { %v2510_v19 = vrot.slane %v2504_v33, 1  ;;  %v2513_v33 = vrot.slane %v2506_v57, 1 }
 0x777   : > { %1758 = vrot.lane.b32.xlu1 %v1753_v21, %s3699_s19  ;;  %1776 = vrot.lane.b32.xlu0 %v1773_v17, %s3699_s19  ;;  %v2542_v21 = vrot.slane %v2536_v13, 2  ;;  %v2543_v17 = vrot.slane %v2537_v46, 2  ;;  %v4884_v13 = vsel %vm406_vm2, %v2495_v59, %v2497_v16  ;;  %v2521_v16 = vmul.f32 %v2519_v60, %v4830_v26 }
 0x778   : > { %5932 = vst [vmem:[#allocation14_spill] sm:$0xff] %v4884_v13 }
 0x779   : > { %v4880_v18 = vsel %vm536_vm3, %v2542_v21, %v2543_v17  ;;  %v4887_v46 = vsel %vm536_vm3, %v2543_v17, %v2545_v55  ;;  %v2520_v21 = vmul.f32 %v2519_v60, %v4833_v47  ;;  %v2569_v55 = vmul.f32 %v2567_v1, %v4830_v26 }
 0x77a   : > { %5931 = vst [vmem:[#allocation6_spill] sm:$0xff] %v4880_v18  ;;  %5933 = vst [vmem:[#allocation9_spill] sm:$0xff] %v4887_v46  ;;  %v2522_v17 = vmul.f32 %v2519_v60, %v4845_v37  ;;  %v5938_v60 = vrot.slane %v4820_v10, 2 }
 0x77b   : > { %1778 = vrot.lane.b32.xlu1 %v1775_v40, %s3699_s19  ;;  %1796 = vrot.lane.b32.xlu0 %v1793_v30, %s3699_s19  ;;  %v2505_v40 = vmul.f32 %v2503_v11, %v4830_v26  ;;  %v4874_v30 = vsel %vm406_vm2, %v2494_v29, %v2495_v59  ;;  %v2558_v29 = vrot.slane %v2552_v2, 2  ;;  %v2568_v59 = vmul.f32 %v2567_v1, %v4833_v47 }
 0x77c   : > { %5930 = vst [vmem:[#allocation5_spill] sm:$0xff] %v4874_v30  ;;  %v2561_v11 = vrot.slane %v2554_v49, 2  ;;  %v2526_v8 = vrot.slane %v2520_v21, 1  ;;  %v2575_v57 = vrot.slane %v2569_v55, 2  ;;  %v1872_v21 = vrot.slane %v4856_v63, 2 }
 0x77d   : > { %v2511_v12 = vrot.slane %v2505_v40, 1  ;;  %v5944_v63 = vrot.slane %v4823_v24, 2  ;;  %v5946_v55 = vrot.slane %v4827_v27, 2 }
 0x77f   : > { %1798 = vrot.lane.b32.xlu1 %v1795_v31, %s3699_s19  ;;  %1816 = vrot.lane.b32.xlu0 %v1813_v4, %s3699_s19  ;;  %v4891_v31 = vsel %vm406_vm2, %v2510_v19, %v2511_v12  ;;  %v2559_v4 = vrot.slane %v2553_v44, 2  ;;  %v4907_v40 = vsel %vm406_vm2, %v2511_v12, %v2513_v33  ;;  %v2527_v19 = vrot.slane %v2521_v16, 1 }
 0x780   : > { %5934 = vst [vmem:[#allocation12_spill] sm:$0xff] %v4891_v31  ;;  %5936 = vst [vmem:[#allocation16_spill] sm:$0xff] %v4907_v40  ;;  %v2574_v44 = vrot.slane %v2568_v59, 2  ;;  %v5939_v12 = vrot.slane %v4816_v28, 2  ;;  %v5945_v16 = vmov %v5938_v60  ;;  %v5957_v31 = vld [vmem:[#allocation26_spill] sm:$0xff] }
 0x781   : > { %v4903_v2 = vsel %vm536_vm3, %v2558_v29, %v2559_v4  ;;  %v2570_v29 = vmul.f32 %v2567_v1, %v4845_v37  ;;  %v4924_v58 = vsel %vm406_vm2, %v2526_v8, %v2527_v19  ;;  %v1855_v59 = vsel %vm536_vm3, %v5945_v16, %v5944_v63 }
 0x782   : > { %5935 = vst [vmem:[#allocation17_spill] sm:$0xff] %v4903_v2  ;;  %v1853_v49 = vsel %vm536_vm3, %v5939_v12, %v5938_v60  ;;  %5940 = vst [vmem:[#allocation22_spill] sm:$0xff] %v4924_v58  ;;  %v4927_v33 = vsel %vm536_vm3, %v2574_v44, %v2575_v57  ;;  %v1884_v8 = vstv %s4895_s9  ;;  %s5155_s9 = sld [smem:[#allocation2 + $0x65]] }
 0x783   : > { %1818 = vrot.lane.b32.xlu1 %v1815_v9, %s3699_s19  ;;  %1836 = vrot.lane.b32.xlu0 %v1833_v5, %s3699_s19  ;;  %v4914_v9 = vsel %vm536_vm3, %v2559_v4, %v2561_v11  ;;  %v2529_v5 = vrot.slane %v2522_v17, 1  ;;  %5941 = vst [vmem:[#allocation23_spill] sm:$0xff] %v4927_v33  ;;  %v2577_v28 = vrot.slane %v2570_v29, 2  ;;  %v1874_v11 = vrot.slane %v1867_v7, 2 }
 0x784   : > { %5937 = vst [vmem:[#allocation18_spill] sm:$0xff] %v4914_v9  ;;  %v1885_v24 = vmul.f32 %v1884_v8, %v4481_v48  ;;  %v1897_v17 = vstv %s4911_s10  ;;  %v1886_v27 = vmul.f32 %v1884_v8, %v4478_v41  ;;  %v1943_v29 = vstv %s3475_s13  ;;  %s5186_s10 = sld [smem:[#allocation2 + $0x36]] }
 0x785   : > { %v4933_v1 = vsel %vm406_vm2, %v2527_v19, %v2529_v5  ;;  %v4936_v4 = vsel %vm536_vm3, %v2575_v57, %v2577_v28  ;;  %v1875_v10 = vsel %vm536_vm3, %v1872_v21, %v1874_v11  ;;  %v1923_v19 = vstv %s3474_s11  ;;  %s5195_s11 = sld [smem:[#allocation2 + $0x12]] }
 0x786   : > { %5942 = vst [vmem:[#allocation24_spill] sm:$0xff] %v4933_v1  ;;  %5943 = vst [vmem:[#allocation28_spill] sm:$0xff] %v4936_v4  ;;  %v1898_v7 = vmul.f32 %v1897_v17, %v4481_v48  ;;  %v1924_v44 = vmul.f32 %v1923_v19, %v4481_v48  ;;  %v1910_v57 = vstv %s4947_s12  ;;  %v1925_v5 = vmul.f32 %v1923_v19, %v4478_v41  ;;  %s5199_s12 = sld [smem:[#allocation2 + $0x13]] }
 0x787   : > { %1838 = vrot.lane.b32.xlu1 %v4848_v36, %s3699_s19  ;;  %1856 = vrot.lane.b32.xlu0 %v1853_v49, %s3699_s19  ;;  %v1873_v36 = vsel %vm536_vm3, %v5946_v55, %v1872_v21  ;;  %v1899_v60 = vmul.f32 %v1897_v17, %v4478_v41  ;;  %v1911_v12 = vmul.f32 %v1910_v57, %v4481_v48  ;;  %v1963_v21 = vstv %s3476_s14  ;;  %s5203_s13 = sld [smem:[#allocation2 + $0x14]] }
 0x788   : > { %v1930_v49 = vrot.slane %v1924_v44, 1  ;;  %v1931_v28 = vrot.slane %v1925_v5, 1  ;;  %v1926_v63 = vmul.f32 %v1923_v19, %v4484_v20  ;;  %v1944_v16 = vmul.f32 %v1943_v29, %v4481_v48  ;;  %s5209_s14 = sld [smem:[#allocation2 + $0x37]] }
 0x789   : > { %v1912_v55 = vmul.f32 %v1910_v57, %v4478_v41  ;;  %v1964_v11 = vmul.f32 %v1963_v21, %v4481_v48  ;;  %v1965_v8 = vmul.f32 %v1963_v21, %v4478_v41  ;;  %v1966_v57 = vmul.f32 %v1963_v21, %v4484_v20 }
 0x78a   : > { %v1950_v17 = vrot.slane %v1944_v16, 1  ;;  %v2023_v16 = vstv %s3512_s20  ;;  %v2622_v46 = vstv %s5186_s10  ;;  %s5235_s20 = sld [smem:[#allocation2 + $0x2d]] }
 0x78b   : > { %1858 = vrot.lane.b32.xlu1 %v1855_v59, %s3699_s19  ;;  %1876 = vrot.lane.b32.xlu0 %v1873_v36, %s3699_s19  ;;  %v1945_v59 = vmul.f32 %v1943_v29, %v4478_v41  ;;  %v1946_v36 = vmul.f32 %v1943_v29, %v4484_v20  ;;  %v1970_v44 = vrot.slane %v1964_v11, 1  ;;  %v1971_v5 = vrot.slane %v1965_v8, 1  ;;  %s5517_s10 = sld [smem:[#allocation2 + $0x43]] }
 0x78d   : > { %v1951_v19 = vrot.slane %v1945_v59, 1 }
 0x78f   : > { %1878 = vrot.lane.b32.xlu1 %v1875_v10, %s3699_s19  ;;  %1889 = vrot.lane.b32.xlu0 %v1885_v24, %s3701_s7  ;;  %v1932_v24 = vsel %vm406_vm2, %v1930_v49, %v1931_v28  ;;  %v1933_v10 = vrot.slane %v1926_v63, 1  ;;  %v2003_v63 = vstv %s3511_s18  ;;  %s5222_s18 = sld [smem:[#allocation2 + $0x5a]] }
 0x790   : > { %v2004_v8 = vmul.f32 %v2003_v63, %v4481_v48 }
 0x791   : > { %v1934_v29 = vsel %vm406_vm2, %v1931_v28, %v1933_v10 }
 0x793   : > { %1891 = vrot.lane.b32.xlu1 %v1886_v27, %s3701_s7  ;;  %1902 = vrot.lane.b32.xlu0 %v1898_v7, %s3701_s7  ;;  %v1983_v27 = vstv %s3510_s17  ;;  %v1953_v7 = vrot.slane %v1946_v36, 1  ;;  %v1973_v36 = vrot.slane %v1966_v57, 1  ;;  %s5068_s17 = sld [smem:[#allocation2 + $0x1b]] }
 0x794   : > { %v1985_v49 = vmul.f32 %v1983_v27, %v4478_v41  ;;  %v1986_v21 = vmul.f32 %v1983_v27, %v4484_v20 }
 0x795   : > { %v1954_v59 = vsel %vm406_vm2, %v1951_v19, %v1953_v7  ;;  %v1974_v10 = vsel %vm406_vm2, %v1971_v5, %v1973_v36  ;;  %v2024_v7 = vmul.f32 %v2023_v16, %v4481_v48 }
 0x796   : > { %v1991_v11 = vrot.slane %v1985_v49, 2 }
 0x797   : > { %1904 = vrot.lane.b32.xlu1 %v1899_v60, %s3701_s7  ;;  %1915 = vrot.lane.b32.xlu0 %v1911_v12, %s3701_s7  ;;  %v1952_v60 = vsel %vm406_vm2, %v1950_v17, %v1951_v19  ;;  %v1984_v12 = vmul.f32 %v1983_v27, %v4481_v48  ;;  %v1993_v17 = vrot.slane %v1986_v21, 2  ;;  %v2006_v19 = vmul.f32 %v2003_v63, %v4484_v20 }
 0x798   : > { %v2010_v27 = vrot.slane %v2004_v8, 2  ;;  %v2167_v21 = vstv %s3430_s22  ;;  %s3477_s22 = sld [smem:[#allocation2 + $0x3f]] }
 0x799   : > { %v1990_v28 = vrot.slane %v1984_v12, 2  ;;  %v2013_v49 = vrot.slane %v2006_v19, 2  ;;  %v2168_v8 = vmul.f32 %v2167_v21, %v4628_v43  ;;  %v2213_v19 = vstv %s3466_s24  ;;  %s5314_s24 = sld [smem:[#allocation2 + $0x53]] }
 0x79b   : > { %1917 = vrot.lane.b32.xlu1 %v1912_v55, %s3701_s7  ;;  %1935 = vrot.lane.b32.xlu0 %v1932_v24, %s3701_s7  ;;  %v1972_v55 = vsel %vm406_vm2, %v1970_v44, %v1971_v5  ;;  %v2005_v24 = vmul.f32 %v2003_v63, %v4478_v41  ;;  %v1992_v44 = vsel %vm536_vm3, %v1990_v28, %v1991_v11  ;;  %v2030_v63 = vrot.slane %v2024_v7, 2 }
 0x79c   : > { %v2026_v5 = vmul.f32 %v2023_v16, %v4484_v20  ;;  %v2154_v20 = vstv %s3429_s21  ;;  %v2193_v28 = vstv %s3465_s28  ;;  %v2169_v7 = vmul.f32 %v2167_v21, %v4625_v54  ;;  %s5078_s21 = sld [smem:[#allocation2 + $0x1c]] }
 0x79d   : > { %v2011_v57 = vrot.slane %v2005_v24, 2  ;;  %v2180_v24 = vstv %s5003_s23  ;;  %s5088_s28 = sld [smem:[#allocation2 + $0x1d]] }
 0x79e   : > { %s5095_s23 = sld [smem:[#allocation2 + $0x40]] }
 0x79f   : > { %1937 = vrot.lane.b32.xlu1 %v1934_v29, %s3701_s7  ;;  %1955 = vrot.lane.b32.xlu0 %v1952_v60, %s3701_s7  ;;  %v2025_v29 = vmul.f32 %v2023_v16, %v4478_v41  ;;  %v1994_v60 = vsel %vm536_vm3, %v1991_v11, %v1993_v17  ;;  %v2012_v12 = vsel %vm536_vm3, %v2010_v27, %v2011_v57 }
 0x7a0   : > { %v2014_v41 = vsel %vm536_vm3, %v2011_v57, %v2013_v49  ;;  %v2155_v16 = vmul.f32 %v2154_v20, %v4628_v43  ;;  %v2156_v11 = vmul.f32 %v2154_v20, %v4625_v54  ;;  %v2195_v17 = vmul.f32 %v2193_v28, %v4625_v54 }
 0x7a1   : > { %v2031_v48 = vrot.slane %v2025_v29, 2  ;;  %v2214_v27 = vmul.f32 %v2213_v19, %v4628_v43  ;;  %v2233_v57 = vstv %s3467_s25  ;;  %v2253_v49 = vstv %s3501_s27  ;;  %s5103_s27 = sld [smem:[#allocation2 + $0x41]] }
 0x7a2   : > { %s5370_s25 = sld [smem:[#allocation2 + $0x5b]] }
 0x7a3   : > { %1957 = vrot.lane.b32.xlu1 %v1954_v59, %s3701_s7  ;;  %1975 = vrot.lane.b32.xlu0 %v1972_v55, %s3701_s7  ;;  %v2032_v59 = vsel %vm536_vm3, %v2030_v63, %v2031_v48  ;;  %v2033_v55 = vrot.slane %v2026_v5, 2  ;;  %v2196_v5 = vmul.f32 %v2193_v28, %v4631_v3  ;;  %v2182_v63 = vmul.f32 %v2180_v24, %v4625_v54 }
 0x7a5   : > { %v2034_v36 = vsel %vm536_vm3, %v2031_v48, %v2033_v55  ;;  %v2220_v48 = vrot.slane %v2214_v27, 1  ;;  %v2203_v20 = vrot.slane %v2196_v5, 1 }
 0x7a7   : > { %1977 = vrot.lane.b32.xlu1 %v1974_v10, %s3701_s7  ;;  %1995 = vrot.lane.b32.xlu0 %v1992_v44, %s3701_s7  ;;  %v2194_v10 = vmul.f32 %v2193_v28, %v4628_v43  ;;  %v2181_v44 = vmul.f32 %v2180_v24, %v4628_v43  ;;  %v2236_v28 = vmul.f32 %v2233_v57, %v4631_v3 }
 0x7a9   : > { %v2200_v29 = vrot.slane %v2194_v10, 1 }
 0x7ab   : > { %1997 = vrot.lane.b32.xlu1 %v1994_v60, %s3701_s7  ;;  %2015 = vrot.lane.b32.xlu0 %v2012_v12, %s3701_s7  ;;  %v2201_v60 = vrot.slane %v2195_v17, 1  ;;  %v2215_v12 = vmul.f32 %v2213_v19, %v4625_v54 }
 0x7ad   : > { %v2202_v55 = vsel %vm406_vm2, %v2200_v29, %v2201_v60  ;;  %v2204_v24 = vsel %vm406_vm2, %v2201_v60, %v2203_v20 }
 0x7af   : > { %2017 = vrot.lane.b32.xlu1 %v2014_v41, %s3701_s7  ;;  %2035 = vrot.lane.b32.xlu0 %v2032_v59, %s3701_s7  ;;  %v2234_v41 = vmul.f32 %v2233_v57, %v4628_v43  ;;  %v2235_v59 = vmul.f32 %v2233_v57, %v4625_v54  ;;  %v2256_v57 = vmul.f32 %v2253_v49, %v4631_v3 }
 0x7b1   : > { %v2240_v21 = vrot.slane %v2234_v41, 1  ;;  %v3552_v41 = vld [vmem:[%s5871_s2 + $0x168] sm:$0xff] }
 0x7b3   : > { %2037 = vrot.lane.b32.xlu1 %v2034_v36, %s3701_s7  ;;  %2159 = vrot.lane.b32.xlu0 %v2155_v16, %s3699_s19  ;;  %v2221_v16 = vrot.slane %v2215_v12, 1  ;;  %v2216_v36 = vmul.f32 %v2213_v19, %v4631_v3  ;;  %v2273_v19 = vstv %s3502_s26  ;;  %s5382_s26 = sld [smem:[#allocation2 + $0x5c]] }
 0x7b4   : > { %v2274_v60 = vmul.f32 %v2273_v19, %v4628_v43 }
 0x7b5   : > { %v2222_v10 = vsel %vm406_vm2, %v2220_v48, %v2221_v16  ;;  %v2223_v17 = vrot.slane %v2216_v36, 1  ;;  %v2293_v48 = vstv %s3503_s29  ;;  %v2276_v36 = vmul.f32 %v2273_v19, %v4631_v3  ;;  %s5396_s29 = sld [smem:[#allocation2 + $0x4]] }
 0x7b7   : > { %2161 = vrot.lane.b32.xlu1 %v2156_v11, %s3699_s19  ;;  %2172 = vrot.lane.b32.xlu0 %v2168_v8, %s3699_s19  ;;  %v2254_v11 = vmul.f32 %v2253_v49, %v4628_v43  ;;  %v2255_v8 = vmul.f32 %v2253_v49, %v4625_v54  ;;  %v2224_v5 = vsel %vm406_vm2, %v2221_v16, %v2223_v17  ;;  %v3553_v49 = vld [vmem:[%s5871_s2 + $0x170] sm:$0xff]  ;;  %v2263_v16 = vrot.slane %v2256_v57, 2 }
 0x7b8   : > { %v489_v17 = vrot.slane %v3552_v41, 7 }
 0x7b9   : > { %v2260_v27 = vrot.slane %v2254_v11, 2  ;;  %v2261_v29 = vrot.slane %v2255_v8, 2  ;;  %v2280_v11 = vrot.slane %v2274_v60, 2 }
 0x7bb   : > { %2174 = vrot.lane.b32.xlu1 %v2169_v7, %s3699_s19  ;;  %2185 = vrot.lane.b32.xlu0 %v2181_v44, %s3699_s19  ;;  %v2241_v7 = vrot.slane %v2235_v59, 1  ;;  %v2243_v44 = vrot.slane %v2236_v28, 1  ;;  %v3554_v59 = vld [vmem:[%s5871_s2 + $0x178] sm:$0x3]  ;;  %v2262_v20 = vsel %vm536_vm3, %v2260_v27, %v2261_v29  ;;  %v3565_v28 = vld [vmem:[%s5871_s2 + $0x290] sm:$0xff] }
 0x7bc   : > { %v620_v57 = vrot.slane %v3565_v28, 6 }
 0x7bd   : > { %v2242_v12 = vsel %vm406_vm2, %v2240_v21, %v2241_v7  ;;  %v3564_v21 = vld [vmem:[%s5871_s2 + $0x288] sm:$0xff] }
 0x7be   : > { %v619_v27 = vrot.slane %v3564_v21, 6 }
 0x7bf   : > { %2187 = vrot.lane.b32.xlu1 %v2182_v63, %s3699_s19  ;;  %2205 = vrot.lane.b32.xlu0 %v2202_v55, %s3699_s19  ;;  %v2275_v63 = vmul.f32 %v2273_v19, %v4625_v54  ;;  %v2244_v55 = vsel %vm406_vm2, %v2241_v7, %v2243_v44  ;;  %v490_v7 = vrot.slane %v3553_v49, 7  ;;  %v492_v19 = vrot.slane %v3554_v59, 7  ;;  %v3566_v44 = vld [vmem:[%s5871_s2 + $0x298] sm:$0x3] }
 0x7c0   : > { %v622_v41 = vrot.slane %v3566_v44, 6  ;;  %v621_v59 = vsel %vm521_vm1, %v619_v27, %v620_v57 }
 0x7c1   : > { %v2281_v8 = vrot.slane %v2275_v63, 2  ;;  %v491_v49 = vsel %vm391_vm0, %v489_v17, %v490_v7 }
 0x7c2   : > { %v498_v21 = vmul.f32 %v491_v49, %v3941_v39 }
 0x7c3   : > { %2207 = vrot.lane.b32.xlu1 %v2204_v24, %s3699_s19  ;;  %2225 = vrot.lane.b32.xlu0 %v2222_v10, %s3699_s19  ;;  %v2294_v24 = vmul.f32 %v2293_v48, %v4628_v43  ;;  %v2295_v10 = vmul.f32 %v2293_v48, %v4625_v54  ;;  %v2282_v60 = vsel %vm536_vm3, %v2280_v11, %v2281_v8 }
 0x7c4   : > { %v623_v11 = vsel %vm521_vm1, %v620_v57, %v622_v41  ;;  %v2326_v57 = vstv %s5078_s21  ;;  %s5240_s21 = sld [smem:[#allocation2 + $0x51]] }
 0x7c5   : > { %v2300_v63 = vrot.slane %v2294_v24, 2  ;;  %v2301_v4 = vrot.slane %v2295_v10, 2  ;;  %v628_v24 = vmul.f32 %v621_v59, %v3941_v39  ;;  %v3541_v10 = vld [vmem:[%s5871_s2 + $0x50] sm:$0xff] }
 0x7c6   : > { %v382_v41 = vmul.f32 %v3541_v10, %v3941_v39 }
 0x7c7   : > { %2227 = vrot.lane.b32.xlu1 %v2224_v5, %s3699_s19  ;;  %2245 = vrot.lane.b32.xlu0 %v2242_v12, %s3699_s19  ;;  %v2264_v5 = vsel %vm536_vm3, %v2261_v29, %v2263_v16  ;;  %v2283_v12 = vrot.slane %v2276_v36, 2  ;;  %v493_v29 = vsel %vm391_vm0, %v490_v7, %v492_v19  ;;  %v2302_v16 = vsel %vm536_vm3, %v2300_v63, %v2301_v4  ;;  %v3540_v63 = vld [vmem:[%s5871_s2 + $0x48] sm:$0xff] }
 0x7c8   : > { %v499_v28 = vmul.f32 %v493_v29, %v3938_v35  ;;  %v5106_v19 = vmul.f32 %v623_v11, %v3938_v35  ;;  %v381_v11 = vmul.f32 %v3540_v63, %v3936_v32 }
 0x7cb   : > { %2247 = vrot.lane.b32.xlu1 %v2244_v55, %s3699_s19  ;;  %2265 = vrot.lane.b32.xlu0 %v2262_v20, %s3699_s19  ;;  %v2296_v55 = vmul.f32 %v2293_v48, %v4631_v3  ;;  %v2284_v20 = vsel %vm536_vm3, %v2281_v8, %v2283_v12  ;;  %v2313_v48 = vstv %s5068_s17  ;;  %v497_v8 = vmul.f32 %v489_v17, %v3936_v32  ;;  %s5218_s17 = sld [smem:[#allocation2 + $0x38]] }
 0x7cc   : > { %v2314_v7 = vmul.f32 %v2313_v48, %v4628_v43  ;;  %v627_v12 = vmul.f32 %v619_v27, %v3936_v32  ;;  %v506_v17 = vrot.slane %v499_v28, 1  ;;  %v3542_v27 = vld [vmem:[%s5871_s2 + $0x58] sm:$0x3]  ;;  %v2328_v32 = vmul.f32 %v2326_v57, %v4625_v54 }
 0x7cd   : > { %v2303_v36 = vrot.slane %v2296_v55, 2  ;;  %v503_v55 = vrot.slane %v497_v8, 1  ;;  %v383_v10 = vmul.f32 %v3542_v27, %v3938_v35 }
 0x7ce   : > { %v633_v8 = vrot.slane %v627_v12, 2 }
 0x7cf   : > { %2267 = vrot.lane.b32.xlu1 %v2264_v5, %s3699_s19  ;;  %2285 = vrot.lane.b32.xlu0 %v2282_v60, %s3699_s19  ;;  %v2304_v44 = vsel %vm536_vm3, %v2301_v4, %v2303_v36  ;;  %v504_v5 = vrot.slane %v498_v21, 1  ;;  %v2352_v60 = vstv %s3477_s22  ;;  %v634_v4 = vrot.slane %v628_v24, 2  ;;  %s5253_s22 = sld [smem:[#allocation2 + $0x2e]] }
 0x7d0   : > { %v636_v36 = vrot.slane %v5106_v19, 2  ;;  %v2339_v21 = vstv %s5088_s28  ;;  %v2353_v39 = vmul.f32 %v2352_v60, %v4628_v43  ;;  %v2354_v28 = vmul.f32 %v2352_v60, %v4625_v54  ;;  %s5265_s28 = sld [smem:[#allocation2 + $0x52]] }
 0x7d1   : > { %v507_v49 = vsel %vm406_vm2, %v504_v5, %v506_v17  ;;  %v2372_v24 = vstv %s5095_s23  ;;  %v2340_v12 = vmul.f32 %v2339_v21, %v4628_v43  ;;  %v2355_v63 = vmul.f32 %v2352_v60, %v4631_v3  ;;  %s5273_s23 = sld [smem:[#allocation2 + $0x2f]] }
 0x7d2   : > { %v637_v19 = vsel %vm536_vm3, %v634_v4, %v636_v36  ;;  %v2360_v33 = vrot.slane %v2354_v28, 1  ;;  %v2374_v35 = vmul.f32 %v2372_v24, %v4625_v54  ;;  %v2375_v28 = vmul.f32 %v2372_v24, %v4631_v3 }
 0x7d3   : > { %2287 = vrot.lane.b32.xlu1 %v2284_v20, %s3699_s19  ;;  %2305 = vrot.lane.b32.xlu0 %v2302_v16, %s3699_s19  ;;  %v2315_v20 = vmul.f32 %v2313_v48, %v4625_v54  ;;  %v2327_v16 = vmul.f32 %v2326_v57, %v4628_v43  ;;  %v505_v48 = vsel %vm406_vm2, %v503_v55, %v504_v5  ;;  %v5263_v13 = vstv %s5218_s17  ;;  %s5628_s17 = sld [smem:[#allocation2 + $0x15]] }
 0x7d4   : > { %v2373_v5 = vmul.f32 %v2372_v24, %v4628_v43  ;;  %v511_v55 = vadd.f32 %v505_v48, %v381_v11  ;;  %v635_v57 = vsel %vm536_vm3, %v633_v8, %v634_v4  ;;  %v2362_v4 = vrot.slane %v2355_v63, 1 }
 0x7d5   : > { %v2412_v48 = vstv %s5135_s6  ;;  %v2382_v58 = vrot.slane %v2375_v28, 1  ;;  %v2932_v45 = vstv %s5253_s22  ;;  %s5461_s6 = sld [smem:[#allocation2 + $0x1f]] }
 0x7d6   : > { %v2379_v8 = vrot.slane %v2373_v5, 1  ;;  %s3472_s22 = sld [smem:[#allocation2 + $0x3a]] }
 0x7d7   : > { %2307 = vrot.lane.b32.xlu1 %v2304_v44, %s3699_s19  ;;  %2318 = vrot.lane.b32.xlu0 %v2314_v7, %s3701_s7  ;;  %v512_v7 = vadd.f32 %v507_v49, %v382_v41  ;;  %v513_v41 = vadd.f32 %v506_v17, %v383_v10  ;;  %v2380_v17 = vrot.slane %v2374_v35, 1  ;;  %v641_v10 = vadd.f32 %v635_v57, %v511_v55  ;;  %v5948_v57 = vld [vmem:[#allocation7_spill] sm:$0xff] }
 0x7d8   : > { %v2363_v35 = vsel %vm406_vm2, %v2360_v33, %v2362_v4  ;;  %v2432_v55 = vstv %s5152_s8  ;;  %v2948_v42 = vstv %s5273_s23  ;;  %s5481_s8 = sld [smem:[#allocation2 + $0x20]] }
 0x7d9   : > { %v5121_v29 = vpop.permute.xlu0 %1610  ;;  %v5123_v59 = vpop.permute.xlu1 %1608  ;;  %v642_v27 = vadd.f32 %v637_v19, %v512_v7  ;;  %v643_v7 = vadd.f32 %v636_v36, %v513_v41  ;;  %v2414_v36 = vmul.f32 %v2412_v48, %v4625_v54  ;;  %v777_v41 = vadd.f32 %v5948_v57, %v641_v10  ;;  %s3507_s23 = sld [smem:[#allocation2 + $0x5d]] }
 0x7da   : > { %v2434_v57 = vmul.f32 %v2432_v55, %v4625_v54 }
 0x7db   : > { %2320 = vrot.lane.b32.xlu1 %v2315_v20, %s3701_s7  ;;  %2331 = vrot.lane.b32.xlu0 %v2327_v16, %s3701_s7  ;;  %v2392_v20 = vstv %s5103_s27  ;;  %v2359_v16 = vrot.slane %v2353_v39, 1  ;;  %v2341_v39 = vmul.f32 %v2339_v21, %v4625_v54  ;;  %v5947_v21 = vld [vmem:[#allocation10_spill] sm:$0xff]  ;;  %s5372_s27 = sld [smem:[#allocation2 + $0x3]] }
 0x7dc   : > { %v778_v19 = vadd.f32 %v5947_v21, %v642_v27  ;;  %v2395_v5 = vmul.f32 %v2392_v20, %v4631_v3  ;;  %v5949_v27 = vld [vmem:[#allocation8_spill] sm:$0xff] }
 0x7dd   : > { %v5140_v44 = vpop.permute.xlu1 %1612  ;;  %v5142_v1 = vpop.permute.xlu0 %1730  ;;  %v2361_v11 = vsel %vm406_vm2, %v2359_v16, %v2360_v33  ;;  %v779_v28 = vadd.f32 %v5949_v27, %v643_v7  ;;  %v2420_v7 = vrot.slane %v2414_v36, 2 }
 0x7df   : > { %2333 = vrot.lane.b32.xlu1 %v2328_v32, %s3701_s7  ;;  %2344 = vrot.lane.b32.xlu0 %v2340_v12, %s3701_s7  ;;  %v2393_v32 = vmul.f32 %v2392_v20, %v4628_v43  ;;  %v2394_v12 = vmul.f32 %v2392_v20, %v4625_v54  ;;  %v2452_v20 = vstv %s5155_s9  ;;  %s5494_s9 = sld [smem:[#allocation2 + $0x42]] }
 0x7e0   : > { %v2453_v40 = vmul.f32 %v2452_v20, %v4628_v43 }
 0x7e1   : > { %v5157_v60 = vpop.permute.xlu1 %1732  ;;  %v5159_v49 = vpop.permute.xlu0 %1743  ;;  %v2399_v16 = vrot.slane %v2393_v32, 1  ;;  %v2400_v63 = vrot.slane %v2394_v12, 1  ;;  %v5950_v32 = vld [vmem:[#allocation13_spill] sm:$0xff] }
 0x7e2   : > { %v954_v12 = vadd.f32 %v5950_v32, %v778_v19  ;;  %v2433_v19 = vmul.f32 %v2432_v55, %v4628_v43 }
 0x7e3   : > { %2346 = vrot.lane.b32.xlu1 %v2341_v39, %s3701_s7  ;;  %2364 = vrot.lane.b32.xlu0 %v2361_v11, %s3701_s7  ;;  %v2381_v39 = vsel %vm406_vm2, %v2379_v8, %v2380_v17  ;;  %v2413_v11 = vmul.f32 %v2412_v48, %v4628_v43  ;;  %v2383_v8 = vsel %vm406_vm2, %v2380_v17, %v2382_v58  ;;  %v5951_v58 = vld [vmem:[#allocation11_spill] sm:$0xff] }
 0x7e4   : > { %v2401_v21 = vsel %vm406_vm2, %v2399_v16, %v2400_v63  ;;  %v955_v17 = vadd.f32 %v5951_v58, %v779_v28  ;;  %v5952_v16 = vld [vmem:[#allocation15_spill] sm:$0xff]  ;;  %v2454_v28 = vmul.f32 %v2452_v20, %v4625_v54  ;;  %v2455_v58 = vmul.f32 %v2452_v20, %v4631_v3 }
 0x7e5   : > { %v5170_v24 = vpop.permute.xlu1 %1745  ;;  %v5172_v9 = vpop.permute.xlu0 %1756  ;;  %v2419_v10 = vrot.slane %v2413_v11, 2  ;;  %v2435_v11 = vmul.f32 %v2432_v55, %v4631_v3  ;;  %v2440_v55 = vrot.slane %v2434_v57, 2  ;;  %v2459_v20 = vrot.slane %v2453_v40, 2 }
 0x7e6   : > { %v2623_v40 = vmul.f32 %v2622_v46, %v4833_v47 }
 0x7e7   : > { %2366 = vrot.lane.b32.xlu1 %v2363_v35, %s3701_s7  ;;  %2384 = vrot.lane.b32.xlu0 %v2381_v39, %s3701_s7  ;;  %v2402_v35 = vrot.slane %v2395_v5, 1  ;;  %v2415_v39 = vmul.f32 %v2412_v48, %v4631_v3  ;;  %v953_v48 = vadd.f32 %v5952_v16, %v777_v41  ;;  %v5953_v5 = vld [vmem:[#allocation19_spill] sm:$0xff]  ;;  %v2421_v41 = vsel %vm536_vm3, %v2419_v10, %v2420_v7  ;;  %v5954_v16 = vld [vmem:[#allocation20_spill] sm:$0xff] }
 0x7e8   : > { %v1130_v27 = vadd.f32 %v5953_v5, %v954_v12  ;;  %v2439_v12 = vrot.slane %v2433_v19, 2  ;;  %v2442_v3 = vrot.slane %v2435_v11, 2  ;;  %v5247_v11 = vmul.f32 %v2622_v46, %v4830_v26 }
 0x7e9   : > { %v5188_v33 = vpop.permute.xlu1 %1758  ;;  %v5190_v4 = vpop.permute.xlu0 %1776  ;;  %v1129_v5 = vadd.f32 %v5954_v16, %v953_v48  ;;  %v2460_v48 = vrot.slane %v2454_v28, 2  ;;  %v2462_v16 = vrot.slane %v2455_v58, 2  ;;  %v5959_v28 = vld [vmem:[#allocation31_spill] sm:$0xff]  ;;  %v5961_v58 = vld [vmem:[#allocation33_spill] sm:$0xff] }
 0x7eb   : > { %2386 = vrot.lane.b32.xlu1 %v2383_v8, %s3701_s7  ;;  %2404 = vrot.lane.b32.xlu0 %v2401_v21, %s3701_s7  ;;  %v2403_v8 = vsel %vm406_vm2, %v2400_v63, %v2402_v35  ;;  %v2422_v21 = vrot.slane %v2415_v39, 2  ;;  %v5955_v63 = vld [vmem:[#allocation21_spill] sm:$0xff]  ;;  %v1265_v10 = vadd.f32 %v5957_v31, %v1129_v5  ;;  %v2583_v31 = vstv %s5195_s11  ;;  %s5536_s11 = sld [smem:[#allocation2 + $0x44]] }
 0x7ec   : > { %v1131_v35 = vadd.f32 %v5955_v63, %v955_v17  ;;  %v5956_v39 = vld [vmem:[#allocation25_spill] sm:$0xff]  ;;  %v2642_v63 = vstv %s5209_s14  ;;  %s3518_s14 = sld [smem:[#allocation2 + $0x68]] }
 0x7ed   : > { %v5211_v36 = vpop.permute.xlu1 %1778  ;;  %v5213_v32 = vpop.permute.xlu0 %1796  ;;  %v1266_v2 = vadd.f32 %v5956_v39, %v1130_v27  ;;  %v2423_v17 = vsel %vm536_vm3, %v2420_v7, %v2422_v21  ;;  %v2441_v27 = vsel %vm536_vm3, %v2439_v12, %v2440_v55  ;;  %v5960_v21 = vld [vmem:[#allocation32_spill] sm:$0xff] }
 0x7ee   : > { %v1441_v12 = vadd.f32 %v5960_v21, %v1265_v10  ;;  %v2584_v10 = vmul.f32 %v2583_v31, %v4833_v47 }
 0x7ef   : > { %2406 = vrot.lane.b32.xlu1 %v2403_v8, %s3701_s7  ;;  %2424 = vrot.lane.b32.xlu0 %v2421_v41, %s3701_s7  ;;  %v5958_v8 = vld [vmem:[#allocation27_spill] sm:$0xff]  ;;  %v1442_v7 = vadd.f32 %v5959_v28, %v1266_v2  ;;  %v2463_v2 = vsel %vm536_vm3, %v2460_v48, %v2462_v16  ;;  %v5271_v28 = vstv %s5222_s18  ;;  %v2585_v16 = vmul.f32 %v2583_v31, %v4830_v26  ;;  %s5634_s18 = sld [smem:[#allocation2 + $0x16]] }
 0x7f0   : > { %v1267_v41 = vadd.f32 %v5958_v8, %v1131_v35  ;;  %v2443_v8 = vsel %vm536_vm3, %v2440_v55, %v2442_v3  ;;  %v2629_v55 = vrot.slane %v2623_v40, 1  ;;  %v5292_v40 = vmul.f32 %v5263_v13, %v4830_v26 }
 0x7f1   : > { %v5231_v19 = vpop.permute.xlu1 %1798  ;;  %v5233_v57 = vpop.permute.xlu0 %1816 }
 0x7f2   : > { %v1443_v5 = vadd.f32 %v5961_v58, %v1267_v41  ;;  %v2609_v41 = vstv %s5203_s13  ;;  %v5288_v58 = vmul.f32 %v5263_v13, %v4833_v47  ;;  %s5586_s13 = sld [smem:[#allocation2 + $0x67]] }
 0x7f3   : > { %2426 = vrot.lane.b32.xlu1 %v2423_v17, %s3701_s7  ;;  %2444 = vrot.lane.b32.xlu0 %v2441_v27, %s3701_s7  ;;  %v2461_v17 = vsel %vm536_vm3, %v2459_v20, %v2460_v48  ;;  %v2596_v27 = vstv %s5199_s12  ;;  %v5279_v20 = vmul.f32 %v2642_v63, %v4833_v47  ;;  %v5282_v48 = vmul.f32 %v2642_v63, %v4830_v26  ;;  %s5567_s12 = sld [smem:[#allocation2 + $0x66]] }
 0x7f4   : > { %v2597_v21 = vmul.f32 %v2596_v27, %v4833_v47  ;;  %v2598_v31 = vmul.f32 %v2596_v27, %v4830_v26  ;;  %v2610_v30 = vmul.f32 %v2609_v41, %v4833_v47  ;;  %v5307_v53 = vadd.f32 %v5140_v44, %v1443_v5 }
 0x7f5   : > { %v5255_v35 = vpop.permute.xlu1 %1818  ;;  %v5257_v39 = vpop.permute.xlu0 %1836  ;;  %v5310_v6 = vmul.f32 %v2609_v41, %v4830_v26  ;;  %v5322_v27 = vmul.f32 %v2622_v46, %v4845_v37  ;;  %v2649_v44 = vrot.slane %v5279_v20, 1  ;;  %v5327_v41 = vmul.f32 %v2642_v63, %v4845_v37 }
 0x7f6   : > { %5962 = vst [vmem:[#allocation29_spill] sm:$0xff] %v5255_v35 }
 0x7f7   : > { %2446 = vrot.lane.b32.xlu1 %v2443_v8, %s3701_s7  ;;  %2464 = vrot.lane.b32.xlu0 %v2461_v17, %s3701_s7  ;;  %v5295_v8 = vadd.f32 %v5121_v29, %v1442_v7  ;;  %v5298_v17 = vadd.f32 %v5123_v59, %v1441_v12  ;;  %v2916_v29 = vstv %s5235_s20  ;;  %v2964_v7 = vstv %s5240_s21  ;;  %s3471_s20 = sld [smem:[#allocation2 + $0x39]] }
 0x7f8   : > { %v5963_v59 = vrot.slane %v5247_v11, 1  ;;  %v2919_v63 = vmul.f32 %v2916_v29, %v5307_v53  ;;  %v2967_v50 = vmul.f32 %v2964_v7, %v5307_v53  ;;  %s5645_s21 = sld [smem:[#allocation2 + $0x17]] }
 0x7f9   : > { %v5300_v3 = vpop.permute.xlu1 %1838  ;;  %v5302_v18 = vpop.permute.xlu0 %1856  ;;  %v2917_v46 = vmul.f32 %v2916_v29, %v5298_v17  ;;  %v2965_v20 = vmul.f32 %v2964_v7, %v5298_v17  ;;  %v2966_v5 = vmul.f32 %v2964_v7, %v5295_v8  ;;  %v2933_v38 = vmul.f32 %v2932_v45, %v5298_v17 }
 0x7fa   : > { %v2631_v12 = vsel %vm406_vm2, %v2629_v55, %v5963_v59  ;;  %v2918_v59 = vmul.f32 %v2916_v29, %v5295_v8  ;;  %v2926_v14 = vrot.slane %v2919_v63, 1  ;;  %v2974_v61 = vrot.slane %v2967_v50, 2 }
 0x7fb   : > { %2466 = vrot.lane.b32.xlu1 %v2463_v2, %s3701_s7  ;;  %2588 = vrot.lane.b32.xlu0 %v2584_v10, %s3699_s19  ;;  %v2980_v2 = vstv %s5265_s28  ;;  %v2923_v10 = vrot.slane %v2917_v46, 1  ;;  %v2971_v62 = vrot.slane %v2965_v20, 2  ;;  %v2972_v56 = vrot.slane %v2966_v5, 2  ;;  %s3473_s28 = sld [smem:[#allocation2 + $0x3b]] }
 0x7fc   : > { %v2924_v23 = vrot.slane %v2918_v59, 1  ;;  %v2934_v35 = vmul.f32 %v2932_v45, %v5295_v8  ;;  %v2982_v5 = vmul.f32 %v2980_v2, %v5295_v8  ;;  %v2632_v50 = vrot.slane %v5322_v27, 1 }
 0x7fd   : > { %v5332_v34 = vpop.permute.xlu1 %1858  ;;  %v5334_v55 = vpop.permute.xlu0 %1876  ;;  %v5365_v59 = vsel %vm536_vm3, %v2972_v56, %v2974_v61  ;;  %v2996_v20 = vstv %s5314_s24  ;;  %v2935_v27 = vmul.f32 %v2932_v45, %v5307_v53  ;;  %v2949_v61 = vmul.f32 %v2948_v42, %v5298_v17  ;;  %s5668_s24 = sld [smem:[#allocation2 + $0x5e]] }
 0x7fe   : > { %5964 = vst [vmem:[#allocation30_spill] sm:$0xff] %v5334_v55  ;;  %v5353_v55 = vsel %vm406_vm2, %v2923_v10, %v2924_v23  ;;  %v5362_v46 = vsel %vm406_vm2, %v2924_v23, %v2926_v14  ;;  %5968 = vst [vmem:[#allocation13_spill] sm:$0xff] %v5365_v59  ;;  %v2940_v10 = vrot.slane %v2934_v35, 1  ;;  %v2983_v14 = vmul.f32 %v2980_v2, %v5307_v53 }
 0x7ff   : > { %2590 = vrot.lane.b32.xlu1 %v2585_v16, %s3699_s19  ;;  %2601 = vrot.lane.b32.xlu0 %v2597_v21, %s3699_s19  ;;  %5965 = vst [vmem:[#allocation10_spill] sm:$0xff] %v5353_v55  ;;  %v5356_v16 = vsel %vm536_vm3, %v2971_v62, %v2972_v56  ;;  %v2981_v21 = vmul.f32 %v2980_v2, %v5298_v17  ;;  %5967 = vst [vmem:[#allocation8_spill] sm:$0xff] %v5362_v46  ;;  %v2939_v62 = vrot.slane %v2933_v38, 1 }
 0x800   : > { %5966 = vst [vmem:[#allocation7_spill] sm:$0xff] %v5356_v16  ;;  %v2988_v16 = vrot.slane %v2982_v5, 2  ;;  %v2950_v56 = vmul.f32 %v2948_v42, %v5295_v8  ;;  %v2997_v45 = vmul.f32 %v2996_v20, %v5298_v17  ;;  %v2998_v35 = vmul.f32 %v2996_v20, %v5295_v8 }
 0x801   : > { %v5348_v29 = vpop.permute.xlu1 %1878  ;;  %v5350_v7 = vpop.permute.xlu0 %1889  ;;  %v2987_v63 = vrot.slane %v2981_v21, 2  ;;  %v5385_v38 = vsel %vm406_vm2, %v2939_v62, %v2940_v10  ;;  %v5971_v2 = vrot.slane %v5282_v48, 1  ;;  %v2652_v5 = vrot.slane %v5327_v41, 1 }
 0x802   : > { %5969 = vst [vmem:[#allocation11_spill] sm:$0xff] %v5385_v38  ;;  %v2942_v59 = vrot.slane %v2935_v27, 1  ;;  %v2990_v46 = vrot.slane %v2983_v14, 2  ;;  %v2955_v62 = vrot.slane %v2949_v61, 1  ;;  %v3004_v38 = vrot.slane %v2998_v35, 2 }
 0x803   : > { %2603 = vrot.lane.b32.xlu1 %v2598_v31, %s3699_s19  ;;  %2614 = vrot.lane.b32.xlu0 %v2610_v30, %s3699_s19  ;;  %v5388_v30 = vsel %vm536_vm3, %v2987_v63, %v2988_v16  ;;  %v2651_v21 = vsel %vm406_vm2, %v2649_v44, %v5971_v2  ;;  %v2956_v63 = vrot.slane %v2950_v56, 1  ;;  %v2951_v41 = vmul.f32 %v2948_v42, %v5307_v53 }
 0x804   : > { %5970 = vst [vmem:[#allocation15_spill] sm:$0xff] %v5388_v30  ;;  %v3003_v30 = vrot.slane %v2997_v45, 2  ;;  %v5404_v55 = vsel %vm406_vm2, %v2940_v10, %v2942_v59  ;;  %v5407_v44 = vsel %vm536_vm3, %v2988_v16, %v2990_v46  ;;  %v2665_v14 = vmul.f32 %v5263_v13, %v4845_v37 }
 0x805   : > { %v5378_v23 = vpop.permute.xlu1 %1891  ;;  %v5380_v31 = vpop.permute.xlu0 %1902  ;;  %v2683_v59 = vmul.f32 %v5271_v28, %v4833_v47  ;;  %v5420_v10 = vsel %vm406_vm2, %v2955_v62, %v2956_v63  ;;  %v5973_v42 = vrot.slane %v5247_v11, 1  ;;  %v2958_v61 = vrot.slane %v2951_v41, 1 }
 0x806   : > { %v5423_v16 = vsel %vm536_vm3, %v3003_v30, %v3004_v38  ;;  %v2702_v13 = vstv %s5370_s25  ;;  %v2685_v45 = vmul.f32 %v5271_v28, %v4845_v37  ;;  %v2043_v30 = vstv %s5372_s27  ;;  %s5678_s25 = sld [smem:[#allocation2 + $0x5f]] }
 0x807   : > { %2616 = vrot.lane.b32.xlu1 %v5310_v6, %s3699_s19  ;;  %2634 = vrot.lane.b32.xlu0 %v2631_v12, %s3699_s19  ;;  %v2999_v6 = vmul.f32 %v2996_v20, %v5307_v53  ;;  %5972 = vst [vmem:[#allocation19_spill] sm:$0xff] %v5423_v16  ;;  %v2633_v46 = vsel %vm406_vm2, %v5973_v42, %v2632_v50  ;;  %v5976_v62 = vrot.slane %v5282_v48, 1  ;;  %v5977_v41 = vrot.slane %v5292_v40, 1  ;;  %s5694_s27 = sld [smem:[#allocation2 + $0x6]] }
 0x808   : > { %v2684_v20 = vmul.f32 %v5271_v28, %v4830_v26  ;;  %v5437_v11 = vsel %vm406_vm2, %v2956_v63, %v2958_v61  ;;  %v5978_v28 = vrot.slane %v5288_v58, 1  ;;  %v2672_v42 = vrot.slane %v2665_v14, 1 }
 0x809   : > { %v5411_v27 = vpop.permute.xlu1 %1904  ;;  %v5413_v12 = vpop.permute.xlu0 %1915  ;;  %v3006_v56 = vrot.slane %v2999_v6, 2  ;;  %5974 = vst [vmem:[#allocation20_spill] sm:$0xff] %v5437_v11  ;;  %v2722_v63 = vstv %s5382_s26  ;;  %v2048_v48 = vstv %s5396_s29  ;;  %v1736_v58 = vadd.f32 %v5142_v1, %v4504_v52  ;;  %s5704_s26 = sld [smem:[#allocation2 + $0x7]] }
 0x80a   : > { %v2671_v6 = vsel %vm406_vm2, %v5978_v28, %v5977_v41  ;;  %v2690_v61 = vrot.slane %v2684_v20, 2  ;;  %v2692_v14 = vrot.slane %v2685_v45, 2  ;;  %v5469_v20 = vmul.f32 %v2043_v30, %v4625_v54  ;;  %s5708_s29 = sld [smem:[#allocation2 + $0x21]] }
 0x80b   : > { %2636 = vrot.lane.b32.xlu1 %v2633_v46, %s3699_s19  ;;  %2654 = vrot.lane.b32.xlu0 %v2651_v21, %s3699_s19  ;;  %v5440_v50 = vsel %vm536_vm3, %v3004_v38, %v3006_v56  ;;  %v2653_v21 = vsel %vm406_vm2, %v5976_v62, %v2652_v5  ;;  %v2689_v46 = vrot.slane %v2683_v59, 2  ;;  %v2703_v38 = vmul.f32 %v2702_v13, %v4833_v47 }
 0x80c   : > { %5975 = vst [vmem:[#allocation21_spill] sm:$0xff] %v5440_v50  ;;  %v2704_v56 = vmul.f32 %v2702_v13, %v4830_v26  ;;  %v2053_v5 = vstv %s5401_s30  ;;  %v5466_v59 = vmul.f32 %v2043_v30, %v4628_v43  ;;  %v2723_v50 = vmul.f32 %v2722_v63, %v4833_v47  ;;  %s5714_s30 = sld [smem:[#allocation2 + $0x8]] }
 0x80d   : > { %v5442_v35 = vpop.permute.xlu1 %1917  ;;  %v1936_v2 = vpop.permute.xlu0 %1935  ;;  %v5477_v11 = vmul.f32 %v2722_v63, %v4830_v26  ;;  %v1782_v52 = vadd.f32 %v5190_v4, %v1736_v58  ;;  %v2691_v1 = vsel %vm536_vm3, %v2689_v46, %v2690_v61  ;;  %v2709_v45 = vrot.slane %v2703_v38, 2 }
 0x80e   : > { %v2710_v30 = vrot.slane %v2704_v56, 2  ;;  %v1737_v4 = vadd.f32 %v5157_v60, %v4508_v22  ;;  %v1749_v46 = vadd.f32 %v5159_v49, %v4521_v51  ;;  %v2693_v56 = vsel %vm536_vm3, %v2690_v61, %v2692_v14 }
 0x80f   : > { %2656 = vrot.lane.b32.xlu1 %v2653_v21, %s3699_s19  ;;  %2674 = vrot.lane.b32.xlu0 %v2671_v6, %s3699_s19  ;;  %v5979_v21 = vrot.slane %v5292_v40, 1  ;;  %v2705_v6 = vmul.f32 %v2702_v13, %v4845_v37  ;;  %v5486_v40 = vmul.f32 %v2048_v48, %v4628_v43  ;;  %v5489_v13 = vmul.f32 %v2048_v48, %v4625_v54 }
 0x810   : > { %v1842_v38 = vadd.f32 %v5257_v39, %v1782_v52  ;;  %v1783_v16 = vadd.f32 %v5211_v36, %v1737_v4  ;;  %v1802_v22 = vadd.f32 %v5213_v32, %v1749_v46  ;;  %v2711_v60 = vsel %vm536_vm3, %v2709_v45, %v2710_v30  ;;  %v5980_v52 = vld [vmem:[#allocation30_spill] sm:$0xff] }
 0x811   : > { %v1938_v62 = vpop.permute.xlu1 %1937  ;;  %v1956_v41 = vpop.permute.xlu0 %1955  ;;  %v2673_v28 = vsel %vm406_vm2, %v5979_v21, %v2672_v42  ;;  %v5492_v42 = vmul.f32 %v2053_v5, %v4628_v43  ;;  %v2712_v21 = vrot.slane %v2705_v6, 2  ;;  %v2730_v43 = vrot.slane %v5477_v11, 2 }
 0x812   : > { %v1895_v51 = vadd.f32 %v5350_v7, %v1842_v38  ;;  %v1750_v49 = vadd.f32 %v5170_v24, %v4527_v0  ;;  %v2742_v39 = vstv %s5455_s5  ;;  %v5515_v11 = vmul.f32 %v2053_v5, %v4625_v54  ;;  %s5717_s5 = sld [smem:[#allocation2 + $0x22]] }
 0x813   : > { %2676 = vrot.lane.b32.xlu1 %v2673_v28, %s3699_s19  ;;  %2694 = vrot.lane.b32.xlu0 %v2691_v1, %s3699_s19  ;;  %v2729_v28 = vrot.slane %v2723_v50, 2  ;;  %v2725_v1 = vmul.f32 %v2722_v63, %v4845_v37  ;;  %v2755_v50 = vstv %s5461_s6  ;;  %v1762_v36 = vadd.f32 %v5172_v9, %v4530_v15  ;;  %s5722_s6 = sld [smem:[#allocation2 + $0x45]] }
 0x814   : > { %v1843_v32 = vadd.f32 %v5300_v3, %v1783_v16  ;;  %v1862_v7 = vadd.f32 %v5302_v18, %v1802_v22  ;;  %v1941_v0 = vadd.f32 %v1936_v2, %v1895_v51  ;;  %v1803_v24 = vadd.f32 %v5231_v19, %v1750_v49 }
 0x815   : > { %v1958_v58 = vpop.permute.xlu1 %1957  ;;  %v1976_v48 = vpop.permute.xlu0 %1975  ;;  %v2713_v14 = vsel %vm536_vm3, %v2710_v30, %v2712_v21  ;;  %v2731_v54 = vsel %vm536_vm3, %v2729_v28, %v2730_v43  ;;  %v2732_v5 = vrot.slane %v2725_v1, 2  ;;  %v1822_v6 = vadd.f32 %v5233_v57, %v1762_v36  ;;  %v5981_v30 = vld [vmem:[#allocation29_spill] sm:$0xff]  ;;  %v5982_v1 = vld [vmem:[#allocation34_spill] sm:$0xff] }
 0x816   : > { %v1896_v15 = vadd.f32 %v5378_v23, %v1843_v32  ;;  %v1908_v9 = vadd.f32 %v5380_v31, %v1862_v7  ;;  %v1763_v18 = vadd.f32 %v5188_v33, %v4535_v25  ;;  %v1863_v16 = vadd.f32 %v5332_v34, %v1803_v24  ;;  %v5984_v24 = vld [vmem:[#allocation36_spill] sm:$0xff] }
 0x817   : > { %2696 = vrot.lane.b32.xlu1 %v2693_v56, %s3699_s19  ;;  %2714 = vrot.lane.b32.xlu0 %v2711_v60, %s3699_s19  ;;  %v2768_v19 = vstv %s5481_s8  ;;  %v2781_v2 = vstv %s5494_s9  ;;  %v1882_v57 = vadd.f32 %v5980_v52, %v1822_v6  ;;  %v2733_v46 = vsel %vm536_vm3, %v2730_v43, %v2732_v5  ;;  %s5726_s8 = sld [smem:[#allocation2 + $0x23]] }
 0x818   : > { %v1942_v45 = vadd.f32 %v1938_v62, %v1896_v15  ;;  %v1961_v23 = vadd.f32 %v1956_v41, %v1908_v9  ;;  %v1823_v4 = vadd.f32 %v5981_v30, %v1763_v18  ;;  %v1909_v25 = vadd.f32 %v5411_v27, %v1863_v16  ;;  %v5986_v9 = vld [vmem:[#allocation37_spill] sm:$0xff]  ;;  %v5987_v18 = vld [vmem:[#allocation39_spill] sm:$0xff]  ;;  %v5988_v30 = vld [vmem:[#allocation40_spill] sm:$0xff]  ;;  %s5728_s9 = sld [smem:[#allocation2 + $0x46]] }
 0x819   : > { %v1978_v63 = vpop.permute.xlu1 %1977  ;;  %v1996_v61 = vpop.permute.xlu0 %1995  ;;  %v2743_v38 = vmul.f32 %v2742_v39, %v4833_v47  ;;  %v1921_v56 = vadd.f32 %v5413_v12, %v1882_v57  ;;  %v2744_v27 = vmul.f32 %v2742_v39, %v4830_v26  ;;  %v2801_v22 = vstv %s5517_s10  ;;  %v5983_v12 = vld [vmem:[#allocation35_spill] sm:$0xff]  ;;  %s5737_s10 = sld [smem:[#allocation2 + $0x47]] }
 0x81a   : > { %v2001_v3 = vadd.f32 %v1996_v61, %v1941_v0  ;;  %v1883_v41 = vadd.f32 %v5348_v29, %v1823_v4  ;;  %v2756_v32 = vmul.f32 %v2755_v50, %v4833_v47  ;;  %v2782_v7 = vmul.f32 %v2781_v2, %v4833_v47  ;;  %v5985_v61 = vld [vmem:[#allocation38_spill] sm:$0xff] }
 0x81b   : > { %2716 = vrot.lane.b32.xlu1 %v2713_v14, %s3699_s19  ;;  %2734 = vrot.lane.b32.xlu0 %v2731_v54, %s3699_s19  ;;  %v1981_v51 = vadd.f32 %v1976_v48, %v1921_v56  ;;  %v2783_v39 = vmul.f32 %v2781_v2, %v4830_v26  ;;  %v2769_v54 = vmul.f32 %v2768_v19, %v4833_v47  ;;  %v2821_v5 = vstv %s5536_s11  ;;  %v5989_v4 = vld [vmem:[#allocation42_spill] sm:$0xff]  ;;  %s5771_s11 = sld [smem:[#allocation2 + $0x6a]] }
 0x81c   : > { %v2046_v31 = vadd.f32 %v5466_v59, %v2001_v3  ;;  %v1962_v59 = vadd.f32 %v1958_v58, %v1909_v25  ;;  %v1922_v36 = vadd.f32 %v5442_v35, %v1883_v41  ;;  %v2757_v35 = vmul.f32 %v2755_v50, %v4830_v26 }
 0x81d   : > { %v1998_v34 = vpop.permute.xlu1 %1997  ;;  %v2016_v33 = vpop.permute.xlu0 %2015  ;;  %v2788_v57 = vrot.slane %v2782_v7, 1  ;;  %v2784_v50 = vmul.f32 %v2781_v2, %v4845_v37  ;;  %v2770_v2 = vmul.f32 %v2768_v19, %v4830_v26  ;;  %v2822_v41 = vmul.f32 %v2821_v5, %v4833_v47 }
 0x81e   : > { %v2002_v21 = vadd.f32 %v1998_v34, %v1942_v45  ;;  %v2021_v28 = vadd.f32 %v2016_v33, %v1961_v23  ;;  %v2072_v62 = vadd.f32 %v5982_v1, %v2046_v31  ;;  %v1982_v14 = vadd.f32 %v1978_v63, %v1922_v36  ;;  %v5990_v33 = vld [vmem:[#allocation41_spill] sm:$0xff] }
 0x81f   : > { %2736 = vrot.lane.b32.xlu1 %v2733_v46, %s3699_s19  ;;  %2747 = vrot.lane.b32.xlu0 %v2743_v38, %s3701_s7  ;;  %v2802_v45 = vmul.f32 %v2801_v22, %v4833_v47  ;;  %v2803_v23 = vmul.f32 %v2801_v22, %v4830_v26  ;;  %v5991_v38 = vld [vmem:[#allocation43_spill] sm:$0xff]  ;;  %v2791_v1 = vrot.slane %v2784_v50, 1 }
 0x820   : > { %v2047_v43 = vadd.f32 %v5469_v20, %v2002_v21  ;;  %v2051_v60 = vadd.f32 %v5486_v40, %v2021_v28  ;;  %v5554_v49 = vadd.f32 %v5983_v12, %v2072_v62  ;;  %v2804_v62 = vmul.f32 %v2801_v22, %v4845_v37  ;;  %v5993_v12 = vld [vmem:[#allocation45_spill] sm:$0xff] }
 0x821   : > { %v2018_v29 = vpop.permute.xlu1 %2017  ;;  %v2036_v58 = vpop.permute.xlu0 %2035 }
 0x822   : > { %v2022_v0 = vadd.f32 %v2018_v29, %v1962_v59  ;;  %v2041_v48 = vadd.f32 %v2036_v58, %v1981_v51  ;;  %v2073_v20 = vadd.f32 %v5984_v24, %v2047_v43  ;;  %v2088_v40 = vadd.f32 %v5985_v61, %v2051_v60  ;;  %v5992_v51 = vld [vmem:[#allocation44_spill] sm:$0xff] }
 0x823   : > { %2749 = vrot.lane.b32.xlu1 %v2744_v27, %s3701_s7  ;;  %2760 = vrot.lane.b32.xlu0 %v2756_v32, %s3701_s7  ;;  %v2808_v59 = vrot.slane %v2802_v45, 1  ;;  %v2809_v27 = vrot.slane %v2803_v23, 1  ;;  %v2841_v60 = vstv %s5567_s12  ;;  %v2811_v58 = vrot.slane %v2804_v62, 1  ;;  %s5783_s12 = sld [smem:[#allocation2 + $0x6b]] }
 0x824   : > { %v2052_v6 = vadd.f32 %v5489_v13, %v2022_v0  ;;  %v2056_v15 = vadd.f32 %v5492_v42, %v2041_v48  ;;  %v5572_v3 = vadd.f32 %v5986_v9, %v2073_v20  ;;  %v5575_v63 = vadd.f32 %v5987_v18, %v2088_v40 }
 0x825   : > { %v2038_v16 = vpop.permute.xlu1 %2037  ;;  %v5577_v52 = vpop.permute.xlu0 %2159  ;;  %v2789_v13 = vrot.slane %v2783_v39, 1  ;;  %v2828_v32 = vrot.slane %v2822_v41, 1  ;;  %v2824_v39 = vmul.f32 %v2821_v5, %v4845_v37  ;;  %v2810_v48 = vsel %vm406_vm2, %v2808_v59, %v2809_v27 }
 0x826   : > { %v2042_v31 = vadd.f32 %v2038_v16, %v1982_v14  ;;  %v2089_v42 = vadd.f32 %v5988_v30, %v2052_v6  ;;  %v2104_v25 = vadd.f32 %v5989_v4, %v2056_v15  ;;  %v2842_v24 = vmul.f32 %v2841_v60, %v4833_v47 }
 0x827   : > { %2762 = vrot.lane.b32.xlu1 %v2757_v35, %s3701_s7  ;;  %2773 = vrot.lane.b32.xlu0 %v2769_v54, %s3701_s7  ;;  %v2790_v19 = vsel %vm406_vm2, %v2788_v57, %v2789_v13  ;;  %v2792_v0 = vsel %vm406_vm2, %v2789_v13, %v2791_v1  ;;  %v2843_v20 = vmul.f32 %v2841_v60, %v4830_v26  ;;  %v2861_v61 = vstv %s5586_s13  ;;  %s3424_s13 = sld [smem:[#allocation2 + $0xa]] }
 0x828   : > { %v2057_v34 = vadd.f32 %v5515_v11, %v2042_v31  ;;  %v5591_v46 = vadd.f32 %v5990_v33, %v2089_v42  ;;  %v2152_v56 = vadd.f32 %v5991_v38, %v2104_v25  ;;  %v2823_v11 = vmul.f32 %v2821_v5, %v4830_v26 }
 0x829   : > { %v5594_v21 = vpop.permute.xlu1 %2161  ;;  %v5596_v28 = vpop.permute.xlu0 %2172  ;;  %v2881_v40 = vstv %s3518_s14  ;;  %v2812_v54 = vsel %vm406_vm2, %v2809_v27, %v2811_v58  ;;  %v2831_v6 = vrot.slane %v2824_v39, 1  ;;  %v2844_v15 = vmul.f32 %v2841_v60, %v4845_v37  ;;  %s5827_s14 = sld [smem:[#allocation2 + $0xb]] }
 0x82a   : > { %v2105_v43 = vadd.f32 %v5992_v51, %v2057_v34  ;;  %v2829_v7 = vrot.slane %v2823_v11, 1  ;;  %v2848_v9 = vrot.slane %v2842_v24, 2  ;;  %v2849_v18 = vrot.slane %v2843_v20, 2 }
 0x82b   : > { %2775 = vrot.lane.b32.xlu1 %v2770_v2, %s3701_s7  ;;  %2793 = vrot.lane.b32.xlu0 %v2790_v19, %s3701_s7  ;;  %v2862_v16 = vmul.f32 %v2861_v61, %v4833_v47  ;;  %v2863_v57 = vmul.f32 %v2861_v61, %v4830_v26  ;;  %v2864_v31 = vmul.f32 %v2861_v61, %v4845_v37  ;;  %v2851_v4 = vrot.slane %v2844_v15, 2 }
 0x82c   : > { %v2153_v36 = vadd.f32 %v5993_v12, %v2105_v43  ;;  %v2830_v5 = vsel %vm406_vm2, %v2828_v32, %v2829_v7  ;;  %v2832_v23 = vsel %vm406_vm2, %v2829_v7, %v2831_v6  ;;  %v2882_v13 = vmul.f32 %v2881_v40, %v4833_v47 }
 0x82d   : > { %v5607_v29 = vpop.permute.xlu1 %2174  ;;  %v2186_v22 = vpop.permute.xlu0 %2185  ;;  %v2883_v30 = vmul.f32 %v2881_v40, %v4830_v26  ;;  %v2850_v42 = vsel %vm536_vm3, %v2848_v9, %v2849_v18  ;;  %v2868_v25 = vrot.slane %v2862_v16, 2  ;;  %v2869_v34 = vrot.slane %v2863_v57, 2 }
 0x82e   : > { %v2191_v2 = vadd.f32 %v2186_v22, %v2152_v56  ;;  %v2871_v1 = vrot.slane %v2864_v31, 2  ;;  %v2888_v62 = vrot.slane %v2882_v13, 2  ;;  %v2884_v11 = vmul.f32 %v2881_v40, %v4845_v37 }
 0x82f   : > { %2795 = vrot.lane.b32.xlu1 %v2792_v0, %s3701_s7  ;;  %2813 = vrot.lane.b32.xlu0 %v2810_v48, %s3701_s7  ;;  %v2889_v41 = vrot.slane %v2883_v30, 2  ;;  %v2165_v19 = vadd.f32 %v5577_v52, %v5554_v49  ;;  %v2852_v27 = vsel %vm536_vm3, %v2849_v18, %v2851_v4  ;;  %v2870_v51 = vsel %vm536_vm3, %v2868_v25, %v2869_v34 }
 0x830   : > { %v2872_v12 = vsel %vm536_vm3, %v2869_v34, %v2871_v1  ;;  %v2891_v58 = vrot.slane %v2884_v11, 2  ;;  %v3012_v49 = vstv %s5628_s17  ;;  %v2166_v52 = vadd.f32 %v5594_v21, %v5572_v3  ;;  %s3646_s17 = smul.u32 48, %s6016_s16 }
 0x831   : > { %v2188_v14 = vpop.permute.xlu1 %2187  ;;  %v2206_v35 = vpop.permute.xlu0 %2205  ;;  %v2890_v22 = vsel %vm536_vm3, %v2888_v62, %v2889_v41  ;;  %v2178_v32 = vadd.f32 %v5596_v28, %v5575_v63  ;;  %v3013_v3 = vmul.f32 %v3012_v49, %v5298_v17  ;;  %v3025_v21 = vstv %s5634_s18 }
 0x832   : > { %v2192_v56 = vadd.f32 %v2188_v14, %v2153_v36  ;;  %v2211_v43 = vadd.f32 %v2206_v35, %v2165_v19  ;;  %v2892_v20 = vsel %vm536_vm3, %v2889_v41, %v2891_v58  ;;  %v2179_v63 = vadd.f32 %v5607_v29, %v5591_v46 }
 0x833   : > { %2815 = vrot.lane.b32.xlu1 %v2812_v54, %s3701_s7  ;;  %2833 = vrot.lane.b32.xlu0 %v2830_v5, %s3701_s7  ;;  %v3051_v40 = vstv %s3471_s20  ;;  %v3014_v5 = vmul.f32 %v3012_v49, %v5295_v8  ;;  %v3026_v6 = vmul.f32 %v3025_v21, %v5298_v17  ;;  %v3038_v15 = vstv %s5645_s21  ;;  %s5852_s21 = scalar_lea.vmem %s5873_s4, %s3646_s17 }
 0x834   : > { %v3052_v9 = vmul.f32 %v3051_v40, %v5298_v17  ;;  %v3053_v29 = vmul.f32 %v3051_v40, %v5295_v8  ;;  %v3071_v16 = vstv %s3472_s22  ;;  %v3027_v57 = vmul.f32 %v3025_v21, %v5295_v8 }
 0x835   : > { %v2208_v50 = vpop.permute.xlu1 %2207  ;;  %v2226_v45 = vpop.permute.xlu0 %2225  ;;  %v3039_v31 = vmul.f32 %v3038_v15, %v5298_v17  ;;  %v3072_v30 = vmul.f32 %v3071_v16, %v5298_v17  ;;  %v3111_v1 = vstv %s3507_s23  ;;  %v3151_v21 = vstv %s5678_s25 }
 0x836   : > { %v2212_v39 = vadd.f32 %v2208_v50, %v2166_v52  ;;  %v2231_v0 = vadd.f32 %v2226_v45, %v2178_v32  ;;  %v3091_v50 = vstv %s3473_s28  ;;  %v3058_v13 = vrot.slane %v3052_v9, 1 }
 0x837   : > { %2835 = vrot.lane.b32.xlu1 %v2832_v23, %s3701_s7  ;;  %2853 = vrot.lane.b32.xlu0 %v2850_v42, %s3701_s7  ;;  %v3073_v42 = vmul.f32 %v3071_v16, %v5295_v8  ;;  %v3059_v34 = vrot.slane %v3053_v29, 1  ;;  %v3078_v11 = vrot.slane %v3072_v30, 1  ;;  %v3153_v30 = vmul.f32 %v3151_v21, %v5295_v8 }
 0x839   : > { %v2228_v33 = vpop.permute.xlu1 %2227  ;;  %v2246_v38 = vpop.permute.xlu0 %2245  ;;  %v3079_v19 = vrot.slane %v3073_v42, 1  ;;  %v2472_v42 = vstv %s5694_s27 }
 0x83a   : > { %v2251_v59 = vadd.f32 %v2246_v38, %v2191_v2  ;;  %v2232_v14 = vadd.f32 %v2228_v33, %v2179_v63  ;;  %v3054_v2 = vmul.f32 %v3051_v40, %v5307_v53  ;;  %v3040_v33 = vmul.f32 %v3038_v15, %v5295_v8 }
 0x83b   : > { %2855 = vrot.lane.b32.xlu1 %v2852_v27, %s3701_s7  ;;  %2873 = vrot.lane.b32.xlu0 %v2870_v51, %s3701_s7  ;;  %v3092_v38 = vmul.f32 %v3091_v50, %v5298_v17  ;;  %v3093_v27 = vmul.f32 %v3091_v50, %v5295_v8  ;;  %v3080_v52 = vsel %vm406_vm2, %v3078_v11, %v3079_v19  ;;  %v3159_v11 = vrot.slane %v3153_v30, 2 }
 0x83d   : > { %v2248_v60 = vpop.permute.xlu1 %2247  ;;  %v2266_v37 = vpop.permute.xlu0 %2265 }
 0x83e   : > { %v2252_v7 = vadd.f32 %v2248_v60, %v2192_v56  ;;  %v2271_v36 = vadd.f32 %v2266_v37, %v2211_v43  ;;  %v3060_v43 = vsel %vm406_vm2, %v3058_v13, %v3059_v34  ;;  %v3061_v60 = vrot.slane %v3054_v2, 1 }
 0x83f   : > { %2875 = vrot.lane.b32.xlu1 %v2872_v12, %s3701_s7  ;;  %2893 = vrot.lane.b32.xlu0 %v2890_v22, %s3701_s7  ;;  %v3098_v37 = vrot.slane %v3092_v38, 1  ;;  %v3094_v12 = vmul.f32 %v3091_v50, %v5307_v53  ;;  %v3131_v22 = vstv %s5668_s24  ;;  %v3154_v38 = vmul.f32 %v3151_v21, %v5307_v53 }
 0x840   : > { %v3134_v50 = vmul.f32 %v3131_v22, %v5307_v53 }
 0x841   : > { %v2268_v48 = vpop.permute.xlu1 %2267  ;;  %v2286_v24 = vpop.permute.xlu0 %2285 }
 0x842   : > { %v2272_v28 = vadd.f32 %v2268_v48, %v2212_v39  ;;  %v2291_v61 = vadd.f32 %v2286_v24, %v2231_v0  ;;  %v3062_v48 = vsel %vm406_vm2, %v3059_v34, %v3061_v60  ;;  %v3113_v24 = vmul.f32 %v3111_v1, %v5295_v8 }
 0x843   : > { %2895 = vrot.lane.b32.xlu1 %v2892_v20, %s3701_s7  ;;  %3017 = vrot.lane.b32.xlu0 %v3013_v3, %s3699_s19  ;;  %v3101_v20 = vrot.slane %v3094_v12, 1  ;;  %v3114_v3 = vmul.f32 %v3111_v1, %v5307_v53 }
 0x844   : > { %v3119_v15 = vrot.slane %v3113_v24, 2 }
 0x845   : > { %v2288_v35 = vpop.permute.xlu1 %2287  ;;  %v2306_v54 = vpop.permute.xlu0 %2305 }
 0x846   : > { %v2292_v18 = vadd.f32 %v2288_v35, %v2232_v14  ;;  %v2311_v46 = vadd.f32 %v2306_v54, %v2251_v59  ;;  %v3074_v59 = vmul.f32 %v3071_v16, %v5307_v53  ;;  %v3132_v14 = vmul.f32 %v3131_v22, %v5298_v17 }
 0x847   : > { %3019 = vrot.lane.b32.xlu1 %v3014_v5, %s3699_s19  ;;  %3030 = vrot.lane.b32.xlu0 %v3026_v6, %s3699_s19  ;;  %v3133_v35 = vmul.f32 %v3131_v22, %v5295_v8 }
 0x848   : > { %v3081_v32 = vrot.slane %v3074_v59, 1  ;;  %v3138_v16 = vrot.slane %v3132_v14, 2  ;;  %v2473_v59 = vmul.f32 %v2472_v42, %v4833_v47  ;;  %v3197_v14 = vstv %s5726_s8 }
 0x849   : > { %v2308_v45 = vpop.permute.xlu1 %2307  ;;  %v2319_v23 = vpop.permute.xlu0 %2318  ;;  %v3198_v30 = vmul.f32 %v3197_v14, %v5298_v17 }
 0x84a   : > { %v2312_v4 = vadd.f32 %v2308_v45, %v2252_v7  ;;  %v2324_v25 = vadd.f32 %v2319_v23, %v2271_v36  ;;  %v3099_v7 = vrot.slane %v3093_v27, 1  ;;  %v3112_v36 = vmul.f32 %v3111_v1, %v5298_v17 }
 0x84b   : > { %3032 = vrot.lane.b32.xlu1 %v3027_v57, %s3699_s19  ;;  %3043 = vrot.lane.b32.xlu0 %v3039_v31, %s3699_s19  ;;  %v3139_v57 = vrot.slane %v3133_v35, 2  ;;  %v3152_v45 = vmul.f32 %v3151_v21, %v5298_v17  ;;  %v5994_v21 = vld [vmem:[#allocation5_spill] sm:$0xff] }
 0x84c   : > { %v3100_v40 = vsel %vm406_vm2, %v3098_v37, %v3099_v7  ;;  %v3118_v6 = vrot.slane %v3112_v36, 2  ;;  %v3102_v9 = vsel %vm406_vm2, %v3099_v7, %v3101_v20 }
 0x84d   : > { %v2321_v62 = vpop.permute.xlu1 %2320  ;;  %v2332_v41 = vpop.permute.xlu0 %2331  ;;  %v3140_v2 = vsel %vm536_vm3, %v3138_v16, %v3139_v57 }
 0x84e   : > { %v2325_v51 = vadd.f32 %v2321_v62, %v2272_v28  ;;  %v2337_v56 = vadd.f32 %v2332_v41, %v2291_v61  ;;  %v3082_v61 = vsel %vm406_vm2, %v3079_v19, %v3081_v32  ;;  %v3120_v13 = vsel %vm536_vm3, %v3118_v6, %v3119_v15 }
 0x84f   : > { %3045 = vrot.lane.b32.xlu1 %v3040_v33, %s3699_s19  ;;  %3063 = vrot.lane.b32.xlu0 %v3060_v43, %s3699_s19  ;;  %v3141_v33 = vrot.slane %v3134_v50, 2  ;;  %v3158_v41 = vrot.slane %v3152_v45, 2  ;;  %v3171_v43 = vstv %s5708_s29 }
 0x851   : > { %v2334_v58 = vpop.permute.xlu1 %2333  ;;  %v2345_v49 = vpop.permute.xlu0 %2344  ;;  %v3142_v12 = vsel %vm536_vm3, %v3139_v57, %v3141_v33  ;;  %v3160_v22 = vsel %vm536_vm3, %v3158_v41, %v3159_v11 }
 0x852   : > { %v2338_v39 = vadd.f32 %v2334_v58, %v2292_v18  ;;  %v2350_v0 = vadd.f32 %v2345_v49, %v2311_v46  ;;  %v3121_v18 = vrot.slane %v3114_v3, 2  ;;  %v2474_v49 = vmul.f32 %v2472_v42, %v4830_v26 }
 0x853   : > { %3065 = vrot.lane.b32.xlu1 %v3062_v48, %s3699_s19  ;;  %3083 = vrot.lane.b32.xlu0 %v3080_v52, %s3699_s19  ;;  %v2482_v52 = vstv %s5714_s30  ;;  %v3210_v48 = vstv %s5722_s6 }
 0x854   : > { %v3122_v34 = vsel %vm536_vm3, %v3119_v15, %v3121_v18  ;;  %v3230_v15 = vstv %s5728_s9  ;;  %v3211_v16 = vmul.f32 %v3210_v48, %v5298_v17  ;;  %v3212_v57 = vmul.f32 %v3210_v48, %v5295_v8 }
 0x855   : > { %v2347_v63 = vpop.permute.xlu1 %2346  ;;  %v2365_v28 = vpop.permute.xlu0 %2364  ;;  %v3213_v42 = vmul.f32 %v3210_v48, %v5307_v53 }
 0x856   : > { %v2351_v54 = vadd.f32 %v2347_v63, %v2312_v4  ;;  %v2370_v5 = vadd.f32 %v2365_v28, %v2324_v25 }
 0x857   : > { %3085 = vrot.lane.b32.xlu1 %v3082_v61, %s3699_s19  ;;  %3103 = vrot.lane.b32.xlu0 %v3100_v40, %s3699_s19  ;;  %v2483_v61 = vmul.f32 %v2482_v52, %v4833_v47  ;;  %v2484_v40 = vmul.f32 %v2482_v52, %v4830_v26 }
 0x859   : > { %v2367_v46 = vpop.permute.xlu1 %2366  ;;  %v2385_v29 = vpop.permute.xlu0 %2384 }
 0x85a   : > { %v2371_v23 = vadd.f32 %v2367_v46, %v2325_v51  ;;  %v2390_v31 = vadd.f32 %v2385_v29, %v2337_v56  ;;  %v2477_v51 = vstv %s5704_s26  ;;  %v3161_v56 = vrot.slane %v3154_v38, 2  ;;  %v5999_v38 = vld [vmem:[#allocation17_spill] sm:$0xff] }
 0x85b   : > { %3105 = vrot.lane.b32.xlu1 %v3102_v9, %s3699_s19  ;;  %3123 = vrot.lane.b32.xlu0 %v3120_v13, %s3699_s19  ;;  %v2478_v7 = vmul.f32 %v2477_v51, %v4833_v47  ;;  %v2479_v28 = vmul.f32 %v2477_v51, %v4830_v26  ;;  %v3173_v46 = vmul.f32 %v3171_v43, %v5295_v8  ;;  %v5996_v26 = vld [vmem:[#allocation14_spill] sm:$0xff] }
 0x85c   : > { %v3162_v3 = vsel %vm536_vm3, %v3159_v11, %v3161_v56  ;;  %v3217_v11 = vrot.slane %v3211_v16, 1 }
 0x85d   : > { %v2387_v4 = vpop.permute.xlu1 %2386  ;;  %v2405_v25 = vpop.permute.xlu0 %2404 }
 0x85e   : > { %v2391_v1 = vadd.f32 %v2387_v4, %v2338_v39  ;;  %v2410_v62 = vadd.f32 %v2405_v25, %v2350_v0  ;;  %v3172_v39 = vmul.f32 %v3171_v43, %v5298_v17  ;;  %v3184_v0 = vstv %s5717_s5  ;;  %v6000_v43 = vld [vmem:[#allocation16_spill] sm:$0xff] }
 0x85f   : > { %3125 = vrot.lane.b32.xlu1 %v3122_v34, %s3699_s19  ;;  %3143 = vrot.lane.b32.xlu0 %v3140_v2, %s3699_s19  ;;  %v3185_v29 = vmul.f32 %v3184_v0, %v5298_v17  ;;  %v3186_v13 = vmul.f32 %v3184_v0, %v5295_v8  ;;  %v3250_v4 = vstv %s5737_s10  ;;  %v5998_v2 = vld [vmem:[#allocation9_spill] sm:$0xff] }
 0x861   : > { %v2407_v19 = vpop.permute.xlu1 %2406  ;;  %v2425_v27 = vpop.permute.xlu0 %2424 }
 0x862   : > { %v2411_v60 = vadd.f32 %v2407_v19, %v2351_v54  ;;  %v2430_v37 = vadd.f32 %v2425_v27, %v2370_v5  ;;  %v5995_v5 = vld [vmem:[#allocation6_spill] sm:$0xff]  ;;  %v3218_v19 = vrot.slane %v3212_v57, 1  ;;  %v3232_v27 = vmul.f32 %v3230_v15, %v5295_v8 }
 0x863   : > { %3145 = vrot.lane.b32.xlu1 %v3142_v12, %s3699_s19  ;;  %3163 = vrot.lane.b32.xlu0 %v3160_v22, %s3699_s19  ;;  %v6001_v12 = vld [vmem:[#allocation22_spill] sm:$0xff] }
 0x864   : > { %v2475_v58 = vadd.f32 %v2473_v59, %v2430_v37  ;;  %v3231_v59 = vmul.f32 %v3230_v15, %v5298_v17 }
 0x865   : > { %v2427_v32 = vpop.permute.xlu1 %2426  ;;  %v2445_v36 = vpop.permute.xlu0 %2444 }
 0x866   : > { %v2431_v24 = vadd.f32 %v2427_v32, %v2371_v23  ;;  %v2450_v20 = vadd.f32 %v2445_v36, %v2390_v31  ;;  %v2501_v63 = vadd.f32 %v5994_v21, %v2475_v58  ;;  %v5997_v23 = vld [vmem:[#allocation12_spill] sm:$0xff]  ;;  %v3199_v58 = vmul.f32 %v3197_v14, %v5295_v8  ;;  %v6002_v32 = vld [vmem:[#allocation18_spill] sm:$0xff]  ;;  %v6003_v36 = vld [vmem:[#allocation23_spill] sm:$0xff] }
 0x867   : > { %3165 = vrot.lane.b32.xlu1 %v3162_v3, %s3699_s19  ;;  %3176 = vrot.lane.b32.xlu0 %v3172_v39, %s3701_s7  ;;  %s5767_s19 = sld [smem:[#allocation2 + $0x69]]  ;;  %v3251_v3 = vmul.f32 %v3250_v4, %v5298_v17  ;;  %v3252_v21 = vmul.f32 %v3250_v4, %v5295_v8 }
 0x868   : > { %v2476_v35 = vadd.f32 %v2474_v49, %v2431_v24  ;;  %v2480_v54 = vadd.f32 %v2478_v7, %v2450_v20  ;;  %v2549_v6 = vadd.f32 %v5995_v5, %v2501_v63  ;;  %v3220_v49 = vrot.slane %v3213_v42, 1 }
 0x869   : > { %v2447_v9 = vpop.permute.xlu1 %2446  ;;  %v2465_v18 = vpop.permute.xlu0 %2464  ;;  %v3237_v24 = vrot.slane %v3231_v59, 1  ;;  %v3238_v20 = vrot.slane %v3232_v27, 1  ;;  %v3257_v57 = vrot.slane %v3251_v3, 1 }
 0x86a   : > { %v2451_v47 = vadd.f32 %v2447_v9, %v2391_v1  ;;  %v2470_v50 = vadd.f32 %v2465_v18, %v2410_v62  ;;  %v2502_v45 = vadd.f32 %v5996_v26, %v2476_v35  ;;  %v2517_v31 = vadd.f32 %v5997_v23, %v2480_v54  ;;  %v6005_v54 = vld [vmem:[#allocation28_spill] sm:$0xff] }
 0x86b   : > { %3178 = vrot.lane.b32.xlu1 %v3173_v46, %s3701_s7  ;;  %3189 = vrot.lane.b32.xlu0 %v3185_v29, %s3701_s7  ;;  %v3290_v9 = vstv %s5771_s11  ;;  %v3221_v29 = vsel %vm406_vm2, %v3218_v19, %v3220_v49  ;;  %v3239_v16 = vsel %vm406_vm2, %v3237_v24, %v3238_v20 }
 0x86c   : > { %v2481_v25 = vadd.f32 %v2479_v28, %v2451_v47  ;;  %v2485_v34 = vadd.f32 %v2483_v61, %v2470_v50  ;;  %v2550_v33 = vadd.f32 %v5998_v2, %v2502_v45  ;;  %v2565_v1 = vadd.f32 %v5999_v38, %v2517_v31 }
 0x86d   : > { %v2467_v62 = vpop.permute.xlu1 %2466  ;;  %v2589_v41 = vpop.permute.xlu0 %2588  ;;  %v3219_v61 = vsel %vm406_vm2, %v3217_v11, %v3218_v19  ;;  %v3270_v35 = vstv %s5767_s19  ;;  %v3258_v47 = vrot.slane %v3252_v21, 1  ;;  %v3291_v2 = vmul.f32 %v3290_v9, %v5298_v17 }
 0x86e   : > { %v2471_v51 = vadd.f32 %v2467_v62, %v2411_v60  ;;  %v2594_v56 = vadd.f32 %v2589_v41, %v2549_v6  ;;  %v2518_v37 = vadd.f32 %v6000_v43, %v2481_v25  ;;  %v2533_v22 = vadd.f32 %v6001_v12, %v2485_v34 }
 0x86f   : > { %3191 = vrot.lane.b32.xlu1 %v3186_v13, %s3701_s7  ;;  %3202 = vrot.lane.b32.xlu0 %v3198_v30, %s3701_s7  ;;  %v3233_v60 = vmul.f32 %v3230_v15, %v5307_v53  ;;  %v3253_v15 = vmul.f32 %v3250_v4, %v5307_v53  ;;  %v3271_v45 = vmul.f32 %v3270_v35, %v5298_v17  ;;  %v3310_v30 = vstv %s5783_s12 }
 0x870   : > { %v2486_v52 = vadd.f32 %v2484_v40, %v2471_v51  ;;  %v2566_v7 = vadd.f32 %v6002_v32, %v2518_v37  ;;  %v2581_v39 = vadd.f32 %v6003_v36, %v2533_v22  ;;  %v6004_v40 = vld [vmem:[#allocation24_spill] sm:$0xff]  ;;  %v3272_v23 = vmul.f32 %v3270_v35, %v5295_v8 }
 0x871   : > { %v2591_v0 = vpop.permute.xlu1 %2590  ;;  %v2602_v48 = vpop.permute.xlu0 %2601  ;;  %v3240_v6 = vrot.slane %v3233_v60, 1  ;;  %v3260_v13 = vrot.slane %v3253_v15, 1  ;;  %v3259_v25 = vsel %vm406_vm2, %v3257_v57, %v3258_v47  ;;  %v3273_v34 = vmul.f32 %v3270_v35, %v5307_v53 }
 0x872   : > { %v2595_v63 = vadd.f32 %v2591_v0, %v2550_v33  ;;  %v2607_v28 = vadd.f32 %v2602_v48, %v2565_v1  ;;  %v2534_v14 = vadd.f32 %v6004_v40, %v2486_v52  ;;  %v3292_v33 = vmul.f32 %v3290_v9, %v5295_v8 }
 0x873   : > { %3204 = vrot.lane.b32.xlu1 %v3199_v58, %s3701_s7  ;;  %3222 = vrot.lane.b32.xlu0 %v3219_v61, %s3701_s7  ;;  %v3241_v31 = vsel %vm406_vm2, %v3238_v20, %v3240_v6  ;;  %v3277_v62 = vrot.slane %v3271_v45, 2  ;;  %v3278_v41 = vrot.slane %v3272_v23, 2  ;;  %v3261_v11 = vsel %vm406_vm2, %v3258_v47, %v3260_v13 }
 0x874   : > { %v2582_v5 = vadd.f32 %v6005_v54, %v2534_v14  ;;  %v3293_v19 = vmul.f32 %v3290_v9, %v5307_v53  ;;  %v3280_v51 = vrot.slane %v3273_v34, 2  ;;  %v3297_v43 = vrot.slane %v3291_v2, 2 }
 0x875   : > { %v2604_v18 = vpop.permute.xlu1 %2603  ;;  %v2615_v46 = vpop.permute.xlu0 %2614  ;;  %v3298_v37 = vrot.slane %v3292_v33, 2  ;;  %v3311_v12 = vmul.f32 %v3310_v30, %v5298_v17  ;;  %v3312_v49 = vmul.f32 %v3310_v30, %v5295_v8  ;;  %v3313_v60 = vmul.f32 %v3310_v30, %v5307_v53 }
 0x876   : > { %v2608_v50 = vadd.f32 %v2604_v18, %v2566_v7  ;;  %v2620_v26 = vadd.f32 %v2615_v46, %v2581_v39  ;;  %v3281_v7 = vsel %vm536_vm3, %v3278_v41, %v3280_v51  ;;  %v3300_v39 = vrot.slane %v3293_v19, 2 }
 0x877   : > { %3224 = vrot.lane.b32.xlu1 %v3221_v29, %s3701_s7  ;;  %3242 = vrot.lane.b32.xlu0 %v3239_v16, %s3701_s7  ;;  %v3299_v36 = vsel %vm536_vm3, %v3297_v43, %v3298_v37  ;;  %v3317_v24 = vrot.slane %v3311_v12, 2  ;;  %v3318_v20 = vrot.slane %v3312_v49, 2  ;;  %v3320_v14 = vrot.slane %v3313_v60, 2 }
 0x879   : > { %v2617_v42 = vpop.permute.xlu1 %2616  ;;  %v2635_v4 = vpop.permute.xlu0 %2634  ;;  %v3319_v40 = vsel %vm536_vm3, %v3317_v24, %v3318_v20  ;;  %v3321_v6 = vsel %vm536_vm3, %v3318_v20, %v3320_v14 }
 0x87a   : > { %v2621_v38 = vadd.f32 %v2617_v42, %v2582_v5  ;;  %v2640_v1 = vadd.f32 %v2635_v4, %v2594_v56  ;;  %v3279_v56 = vsel %vm536_vm3, %v3277_v62, %v3278_v41 }
 0x87b   : > { %3244 = vrot.lane.b32.xlu1 %v3241_v31, %s3701_s7  ;;  %3262 = vrot.lane.b32.xlu0 %v3259_v25, %s3701_s7 }
 0x87d   : > { %v2637_v59 = vpop.permute.xlu1 %2636  ;;  %v2655_v27 = vpop.permute.xlu0 %2654 }
 0x87e   : > { %v2641_v22 = vadd.f32 %v2637_v59, %v2595_v63  ;;  %v2660_v58 = vadd.f32 %v2655_v27, %v2607_v28  ;;  %v3301_v63 = vsel %vm536_vm3, %v3298_v37, %v3300_v39 }
 0x87f   : > { %3264 = vrot.lane.b32.xlu1 %v3261_v11, %s3701_s7  ;;  %3282 = vrot.lane.b32.xlu0 %v3279_v56, %s3701_s7 }
 0x881   : > { %v2657_v52 = vpop.permute.xlu1 %2656  ;;  %v2675_v32 = vpop.permute.xlu0 %2674 }
 0x882   : > { %v2661_v0 = vadd.f32 %v2657_v52, %v2608_v50  ;;  %v2680_v48 = vadd.f32 %v2675_v32, %v2620_v26 }
 0x883   : > { %3284 = vrot.lane.b32.xlu1 %v3281_v7, %s3701_s7  ;;  %3302 = vrot.lane.b32.xlu0 %v3299_v36, %s3701_s7  ;;  %v2911_v7 = vstv %s5827_s14 }
 0x885   : > { %v2677_v3 = vpop.permute.xlu1 %2676  ;;  %v2695_v21 = vpop.permute.xlu0 %2694 }
 0x886   : > { %v2681_v28 = vadd.f32 %v2677_v3, %v2621_v38  ;;  %v2700_v61 = vadd.f32 %v2695_v21, %v2640_v1  ;;  %v6007_v3 = vld [vmem:[#allocation7_spill] sm:$0xff] }
 0x887   : > { %3304 = vrot.lane.b32.xlu1 %v3301_v63, %s3701_s7  ;;  %3322 = vrot.lane.b32.xlu0 %v3319_v40, %s3701_s7 }
 0x889   : > { %v2697_v53 = vpop.permute.xlu1 %2696  ;;  %v2715_v35 = vpop.permute.xlu0 %2714 }
 0x88a   : > { %v2701_v54 = vadd.f32 %v2697_v53, %v2641_v22  ;;  %v2720_v5 = vadd.f32 %v2715_v35, %v2660_v58  ;;  %v2906_v58 = vstv %s3424_s13  ;;  %v6008_v35 = vld [vmem:[#allocation8_spill] sm:$0xff] }
 0x88b   : > { %3324 = vrot.lane.b32.xlu1 %v3321_v6, %s3701_s7  ;;  %s3423_s7 = sld [smem:[#allocation2 + $0x9]]  ;;  %v2907_v39 = vmul.f32 %v2906_v58, %v5298_v17  ;;  %v2908_v63 = vmul.f32 %v2906_v58, %v5295_v8 }
 0x88d   : > { %v2717_v15 = vpop.permute.xlu1 %2716  ;;  %v2735_v9 = vpop.permute.xlu0 %2734 }
 0x88e   : > { %v2721_v18 = vadd.f32 %v2717_v15, %v2661_v0  ;;  %v2740_v46 = vadd.f32 %v2735_v9, %v2680_v48  ;;  %v6006_v0 = vld [vmem:[#allocation10_spill] sm:$0xff] }
 0x891   : > { %v2737_v29 = vpop.permute.xlu1 %2736  ;;  %v2748_v16 = vpop.permute.xlu0 %2747  ;;  %v2901_v27 = vstv %s3423_s7 }
 0x892   : > { %v2741_v57 = vadd.f32 %v2737_v29, %v2681_v28  ;;  %v2753_v47 = vadd.f32 %v2748_v16, %v2700_v61  ;;  %v2902_v12 = vmul.f32 %v2901_v27, %v5298_v17  ;;  %v2903_v49 = vmul.f32 %v2901_v27, %v5295_v8  ;;  %v6011_v29 = vld [vmem:[#allocation15_spill] sm:$0xff] }
 0x893   : > { %v2912_v61 = vmul.f32 %v2911_v7, %v5298_v17 }
 0x895   : > { %v2750_v50 = vpop.permute.xlu1 %2749  ;;  %v2761_v26 = vpop.permute.xlu0 %2760 }
 0x896   : > { %v2754_v45 = vadd.f32 %v2750_v50, %v2701_v54  ;;  %v2766_v23 = vadd.f32 %v2761_v26, %v2720_v5  ;;  %v6009_v5 = vld [vmem:[#allocation11_spill] sm:$0xff]  ;;  %v2913_v50 = vmul.f32 %v2911_v7, %v5295_v8 }
 0x899   : > { %v2763_v31 = vpop.permute.xlu1 %2762  ;;  %v2774_v13 = vpop.permute.xlu0 %2773 }
 0x89a   : > { %v2767_v30 = vadd.f32 %v2763_v31, %v2721_v18  ;;  %v2779_v42 = vadd.f32 %v2774_v13, %v2740_v46  ;;  %v6010_v18 = vld [vmem:[#allocation13_spill] sm:$0xff]  ;;  %v6012_v13 = vld [vmem:[#allocation19_spill] sm:$0xff] }
 0x89d   : > { %v2776_v4 = vpop.permute.xlu1 %2775  ;;  %v2794_v25 = vpop.permute.xlu0 %2793 }
 0x89e   : > { %v2780_v34 = vadd.f32 %v2776_v4, %v2741_v57  ;;  %v2799_v2 = vadd.f32 %v2794_v25, %v2753_v47  ;;  %v6013_v25 = vld [vmem:[#allocation20_spill] sm:$0xff] }
 0x8a1   : > { %v2796_v33 = vpop.permute.xlu1 %2795  ;;  %v2814_v38 = vpop.permute.xlu0 %2813 }
 0x8a2   : > { %v2800_v1 = vadd.f32 %v2796_v33, %v2754_v45  ;;  %v2819_v62 = vadd.f32 %v2814_v38, %v2766_v23 }
 0x8a5   : > { %v2816_v41 = vpop.permute.xlu1 %2815  ;;  %v2834_v11 = vpop.permute.xlu0 %2833 }
 0x8a6   : > { %v2820_v19 = vadd.f32 %v2816_v41, %v2767_v30  ;;  %v2839_v59 = vadd.f32 %v2834_v11, %v2779_v42 }
 0x8a9   : > { %v2836_v51 = vpop.permute.xlu1 %2835  ;;  %v2854_v43 = vpop.permute.xlu0 %2853 }
 0x8aa   : > { %v2840_v37 = vadd.f32 %v2836_v51, %v2780_v34  ;;  %v2859_v22 = vadd.f32 %v2854_v43, %v2799_v2  ;;  %v6014_v2 = vld [vmem:[#allocation21_spill] sm:$0xff] }
 0x8ac   : > { %v2904_v56 = vadd.f32 %v2902_v12, %v2859_v22 }
 0x8ad   : > { %v2856_v52 = vpop.permute.xlu1 %2855  ;;  %v2874_v32 = vpop.permute.xlu0 %2873 }
 0x8ae   : > { %v2860_v36 = vadd.f32 %v2856_v52, %v2800_v1  ;;  %v2879_v60 = vadd.f32 %v2874_v32, %v2819_v62  ;;  %v2930_v48 = vadd.f32 %v6006_v0, %v2904_v56 }
 0x8b0   : > { %v2905_v24 = vadd.f32 %v2903_v49, %v2860_v36  ;;  %v2909_v20 = vadd.f32 %v2907_v39, %v2879_v60  ;;  %v2978_v21 = vadd.f32 %v6007_v3, %v2930_v48 }
 0x8b1   : > { %v2876_v28 = vpop.permute.xlu1 %2875  ;;  %v2894_v40 = vpop.permute.xlu0 %2893 }
 0x8b2   : > { %v2880_v14 = vadd.f32 %v2876_v28, %v2820_v19  ;;  %v2899_v53 = vadd.f32 %v2894_v40, %v2839_v59  ;;  %v2931_v54 = vadd.f32 %v6008_v35, %v2905_v24  ;;  %v2946_v6 = vadd.f32 %v6009_v5, %v2909_v20 }
 0x8b4   : > { %v2910_v15 = vadd.f32 %v2908_v63, %v2880_v14  ;;  %v2914_v9 = vadd.f32 %v2912_v61, %v2899_v53  ;;  %v2979_v46 = vadd.f32 %v6010_v18, %v2931_v54  ;;  %v2994_v16 = vadd.f32 %v6011_v29, %v2946_v6 }
 0x8b5   : > { %v2896_v57 = vpop.permute.xlu1 %2895  ;;  %v3018_v47 = vpop.permute.xlu0 %3017 }
 0x8b6   : > { %v2900_v26 = vadd.f32 %v2896_v57, %v2840_v37  ;;  %v2947_v17 = vadd.f32 %v5404_v55, %v2910_v15  ;;  %v2962_v45 = vadd.f32 %v5420_v10, %v2914_v9  ;;  %v3023_v7 = vadd.f32 %v3018_v47, %v2978_v21 }
 0x8b8   : > { %v2915_v23 = vadd.f32 %v2913_v50, %v2900_v26  ;;  %v2995_v31 = vadd.f32 %v5407_v44, %v2947_v17  ;;  %v3010_v30 = vadd.f32 %v6012_v13, %v2962_v45 }
 0x8b9   : > { %v3020_v42 = vpop.permute.xlu1 %3019  ;;  %v3031_v4 = vpop.permute.xlu0 %3030 }
 0x8ba   : > { %v2963_v34 = vadd.f32 %v6013_v25, %v2915_v23  ;;  %v3024_v0 = vadd.f32 %v3020_v42, %v2979_v46  ;;  %v3036_v48 = vadd.f32 %v3031_v4, %v2994_v16 }
 0x8bc   : > { %v3011_v33 = vadd.f32 %v6014_v2, %v2963_v34 }
 0x8bd   : > { %v3033_v38 = vpop.permute.xlu1 %3032  ;;  %v3044_v1 = vpop.permute.xlu0 %3043 }
 0x8be   : > { %v3037_v40 = vadd.f32 %v3033_v38, %v2995_v31  ;;  %v3049_v14 = vadd.f32 %v3044_v1, %v3010_v30 }
 0x8c1   : > { %v3046_v62 = vpop.permute.xlu1 %3045  ;;  %v3064_v8 = vpop.permute.xlu0 %3063 }
 0x8c2   : > { %v3069_v60 = vadd.f32 %v3064_v8, %v3023_v7  ;;  %v3050_v29 = vadd.f32 %v3046_v62, %v3011_v33 }
 0x8c5   : > { %v3066_v41 = vpop.permute.xlu1 %3065  ;;  %v3084_v11 = vpop.permute.xlu0 %3083 }
 0x8c6   : > { %v3070_v63 = vadd.f32 %v3066_v41, %v3024_v0  ;;  %v3089_v28 = vadd.f32 %v3084_v11, %v3036_v48 }
 0x8c9   : > { %v3086_v55 = vpop.permute.xlu1 %3085  ;;  %v3104_v19 = vpop.permute.xlu0 %3103 }
 0x8ca   : > { %v3090_v5 = vadd.f32 %v3086_v55, %v3037_v40  ;;  %v3109_v15 = vadd.f32 %v3104_v19, %v3049_v14 }
 0x8cd   : > { %v3106_v10 = vpop.permute.xlu1 %3105  ;;  %v3124_v59 = vpop.permute.xlu0 %3123 }
 0x8ce   : > { %v3129_v24 = vadd.f32 %v3124_v59, %v3069_v60  ;;  %v3110_v26 = vadd.f32 %v3106_v10, %v3050_v29 }
 0x8d1   : > { %v3126_v27 = vpop.permute.xlu1 %3125  ;;  %v3144_v44 = vpop.permute.xlu0 %3143 }
 0x8d2   : > { %v3130_v53 = vadd.f32 %v3126_v27, %v3070_v63  ;;  %v3149_v35 = vadd.f32 %v3144_v44, %v3089_v28 }
 0x8d5   : > { %v3146_v51 = vpop.permute.xlu1 %3145  ;;  %v3164_v43 = vpop.permute.xlu0 %3163 }
 0x8d6   : > { %v3150_v16 = vadd.f32 %v3146_v51, %v3090_v5  ;;  %v3169_v57 = vadd.f32 %v3164_v43, %v3109_v15 }
 0x8d9   : > { %v3166_v37 = vpop.permute.xlu1 %3165  ;;  %v3177_v12 = vpop.permute.xlu0 %3176 }
 0x8da   : > { %v3182_v61 = vadd.f32 %v3177_v12, %v3129_v24  ;;  %v3170_v42 = vadd.f32 %v3166_v37, %v3110_v26 }
 0x8dd   : > { %v3179_v22 = vpop.permute.xlu1 %3178  ;;  %v3190_v58 = vpop.permute.xlu0 %3189 }
 0x8de   : > { %v3183_v9 = vadd.f32 %v3179_v22, %v3130_v53  ;;  %v3195_v18 = vadd.f32 %v3190_v58, %v3149_v35 }
 0x8e1   : > { %v3192_v56 = vpop.permute.xlu1 %3191  ;;  %v3203_v49 = vpop.permute.xlu0 %3202 }
 0x8e2   : > { %v3196_v23 = vadd.f32 %v3192_v56, %v3150_v16  ;;  %v3208_v31 = vadd.f32 %v3203_v49, %v3169_v57 }
 0x8e5   : > { %v3205_v52 = vpop.permute.xlu1 %3204  ;;  %v3223_v32 = vpop.permute.xlu0 %3222 }
 0x8e6   : > { %v3228_v54 = vadd.f32 %v3223_v32, %v3182_v61  ;;  %v3209_v33 = vadd.f32 %v3205_v52, %v3170_v42 }
 0x8e9   : > { %v3225_v36 = vpop.permute.xlu1 %3224  ;;  %v3243_v39 = vpop.permute.xlu0 %3242 }
 0x8ea   : > { %v3229_v47 = vadd.f32 %v3225_v36, %v3183_v9  ;;  %v3248_v50 = vadd.f32 %v3243_v39, %v3195_v18 }
 0x8ed   : > { %v3245_v20 = vpop.permute.xlu1 %3244  ;;  %v3263_v3 = vpop.permute.xlu0 %3262 }
 0x8ee   : > { %v3249_v4 = vadd.f32 %v3245_v20, %v3196_v23  ;;  %v3268_v25 = vadd.f32 %v3263_v3, %v3208_v31 }
 0x8f1   : > { %v3265_v6 = vpop.permute.xlu1 %3264  ;;  %v3283_v21 = vpop.permute.xlu0 %3282 }
 0x8f2   : > { %v3288_v46 = vadd.f32 %v3283_v21, %v3228_v54  ;;  %v3269_v62 = vadd.f32 %v3265_v6, %v3209_v33 }
 0x8f4   : > { %3331 = vst.msk [vmem:[%s5852_s21] sm:$0xff] %vm3330_vm4, %v3288_v46 }
 0x8f5   : > { %v3285_v17 = vpop.permute.xlu1 %3284  ;;  %v3303_v45 = vpop.permute.xlu0 %3302 }
 0x8f6   : > { %v3289_v13 = vadd.f32 %v3285_v17, %v3229_v47  ;;  %v3308_v30 = vadd.f32 %v3303_v45, %v3248_v50 }
 0x8f8   : > { %3332 = vst.msk [vmem:[%s5852_s21 + $0x8] sm:$0xff] %vm3330_vm4, %v3289_v13  ;;  %3639 = vst.msk [vmem:[%s5852_s21 + $0x10] sm:$0xff] %vm3330_vm4, %v3308_v30 }
 0x8f9   : > { %v3305_v34 = vpop.permute.xlu1 %3304  ;;  %v3323_v2 = vpop.permute.xlu0 %3322 }
 0x8fa   : > { %v3309_v38 = vadd.f32 %v3305_v34, %v3249_v4  ;;  %v3328_v1 = vadd.f32 %v3323_v2, %v3268_v25 }
 0x8fc   : > { %3640 = vst.msk [vmem:[%s5852_s21 + $0x18] sm:$0xff] %vm3330_vm4, %v3309_v38  ;;  %3641 = vst.msk [vmem:[%s5852_s21 + $0x20] sm:$0xff] %vm3330_vm4, %v3328_v1 }
 0x8fd   : > { %v3325_v8 = vpop.permute.xlu1 %3324 }
 0x8fe   : > { %v3329_v41 = vadd.f32 %v3325_v8, %v3269_v62 }
 0x900   : > { %3642 = vst.msk [vmem:[%s5852_s21 + $0x28] sm:$0xff] %vm3330_vm4, %v3329_v41 }
 0x901 PF: > { %s15_s15 = sadd.s32 1, %s3695_s15  }
 0x902   : > { %p12_p1 = scmp.ge.s32.totalorder %s15_s15, 4  }
 0x904   :  { %14 = sbr.rel (!%p12_p1) target bundleno = 1 (0x1), region = 112 }
 0x909   :  { %3360 = vsyncpa [#allocation3], 1 }
 0x90a   :  { %3362 = vsyncpa [#allocation3 + $0x1], 1 }

</bundles_post_ra>
